<compile_context>
chip_gen: v6e
topology: v6e:2x2x1
jax: 0.10.0
libtpu: 0.0.40
codegen_flags: <defaults>
</compile_context>

<pallas_src>
import jax
import jax.numpy as jnp
from jax.experimental import pallas as pl
from jax.experimental.pallas import tpu as pltpu

_MIB = 1 << 20

# Flipped to False at runtime if this JAX build rejects pipeline_mode=pl.Buffered(1)
# on main-grid BlockSpecs; we then fall back to default double-buffering.
_SINGLE_BUFFER_INVARIANTS = True


def _pick_batch_block(B):
    """Split the batch into 2 blocks (v7x megacore 'parallel' axis) only when each
    block stays sublane-aligned; otherwise keep the whole batch in one block."""
    if B % 2 == 0 and (B // 2) % 8 == 0:
        return B // 2
    return B


def _layer_vmem_bytes(Bb, Tc, D, H, x_item, y_item, w_item, single_buffer_weights):
    """Per-grid-step VMEM footprint estimate (pipelined blocks + scratch)."""
    wbuf = 1 if single_buffer_weights else 2
    n = 0
    n += 2 * Bb * Tc * D * x_item              # x chunk (double-buffered)
    n += 2 * Bb * Tc * H * y_item              # y chunk (double-buffered)
    n += wbuf * (D + H) * 4 * H * w_item       # W_ih + W_hh
    n += wbuf * 4 * H * 4                      # fused bias (f32)
    n += 2 * 2 * Bb * H * 4                    # h0 / c0 blocks (f32)
    n += 2 * 2 * Bb * H * 4                    # h_T / c_T output blocks (f32)
    n += Bb * Tc * 4 * H * 4                   # gx scratch (f32)
    n += 2 * Bb * H * 4                        # h / c carry scratch (f32)
    return n


def _pick_time_chunk(T, Bb, D, H, x_item, y_item, w_item, budget_bytes, max_unroll=64):
    """Largest legal time chunk (divisor of T, sublane-multiple or full extent,
    bounded unroll length) that fits the per-chunk VMEM byte budget."""
    cands = [tc for tc in range(min(T, max_unroll), 0, -1)
             if T % tc == 0 and (tc % 8 == 0 or tc == T)]
    if not cands:
        cands = [T]      # full-extent block: always legal (may unroll long)
    for tc in cands:
        if _layer_vmem_bytes(Bb, tc, D, H, x_item, y_item, w_item, True) <= budget_bytes:
            return tc
    return cands[-1]


def _lstm_layer_kernel(x_ref, wih_ref, whh_ref, b_ref, h0_ref, c0_ref,
                       y_ref, hT_ref, cT_ref, gx_scr, h_scr, c_scr):
    """One grid step == one (batch block, time chunk) of one unidirectional layer.

    x_ref  : (Bb, Tc, D)   input chunk (batch-first)
    wih_ref: (D, 4H)       input->gate weights, columns ordered [i, f, o, g]
    whh_ref: (H, 4H)       hidden->gate weights, same column order
    b_ref  : (1, 4H)       b_ih + b_hh (same order), f32
    h0_ref : (Bb, H)       initial hidden state block
    c0_ref : (Bb, H)       initial cell state block
    y_ref  : (Bb, Tc, H)   per-timestep hidden outputs for this chunk
    hT_ref : (Bb, H) f32   final hidden (resident over time, written on last chunk)
    cT_ref : (Bb, H) f32   final cell   (resident over time, written on last chunk)
    gx_scr : (Bb, Tc, 4H) f32  VMEM scratch for the hoisted input projection
    h_scr  : (Bb, H) f32   VMEM carry across time chunks
    c_scr  : (Bb, H) f32   VMEM carry across time chunks
    """
    chunk = pl.program_id(1)

    @pl.when(chunk == 0)
    def _():
        h_scr[...] = h0_ref[...].astype(jnp.float32)
        c_scr[...] = c0_ref[...].astype(jnp.float32)

    Bb, Tc, D = x_ref.shape
    H = h_scr.shape[-1]
    mxu_dtype = whh_ref.dtype

    # ---- Hoisted input projection: one MXU matmul for the whole chunk, parked in
    # f32 VMEM scratch so it does not stay live in vregs across the recurrence.
    # (Tc is a sublane multiple except for the full-extent fallback, so the
    # (Bb,Tc,D)->(Bb*Tc,D) collapse is layout-free.)
    x2d = x_ref[...].astype(mxu_dtype).reshape(Bb * Tc, D)               # (Bb*Tc, D)
    gx = jnp.dot(x2d, wih_ref[...], preferred_element_type=jnp.float32) + b_ref[...]
    gx_scr[...] = gx.reshape(Bb, Tc, 4 * H)                              # (Bb, Tc, 4H) f32

    whh = whh_ref[...]                                                   # (H, 4H)
    h = h_scr[...]                                                       # (Bb, H) f32
    c = c_scr[...]                                                       # (Bb, H) f32

    # ---- Serial recurrence over the chunk (statically unrolled; each step reads a
    # static (Bb, 4H) slice of the gx scratch — only per-step values live in vregs).
    # TODO(synk): hold W_hh stationary in the MXU (matmul_push_rhs/acc_lhs/pop) to
    # shorten the per-step critical path at production H.
    for k in range(Tc):
        gates = gx_scr[:, k, :] + jnp.dot(h.astype(mxu_dtype), whh,
                                          preferred_element_type=jnp.float32)   # (Bb, 4H)
        sig = jax.nn.sigmoid(gates[:, :3 * H])      # [ i | f | o ] in one dense EUP span
        i_g = sig[:, 0 * H:1 * H]
        f_g = sig[:, 1 * H:2 * H]
        o_g = sig[:, 2 * H:3 * H]
        g_g = jnp.tanh(gates[:, 3 * H:4 * H])
        c = f_g * c + i_g * g_g
        h = o_g * jnp.tanh(c)
        y_ref[:, k, :] = h.astype(y_ref.dtype)

    h_scr[...] = h
    c_scr[...] = c

    @pl.when(chunk == pl.num_programs(1) - 1)
    def _():
        hT_ref[...] = h.astype(hT_ref.dtype)
        cT_ref[...] = c.astype(cT_ref.dtype)


def _lstm_layer(x, w_ih, w_hh, bias, h0, c0, *, out_dtype, vmem_budget_bytes=24 * _MIB):
    """Run one unidirectional LSTM layer.

    x: (B, T, D); w_ih: (D, 4H); w_hh: (H, 4H); bias: (1, 4H); h0/c0: (B, H) f32.
    Returns y: (B, T, H) out_dtype, h_T: (B, H) f32, c_T: (B, H) f32.
    """
    global _SINGLE_BUFFER_INVARIANTS

    B, T, D = x.shape
    H = w_hh.shape[0]
    x_item = jnp.dtype(x.dtype).itemsize
    y_item = jnp.dtype(out_dtype).itemsize
    w_item = jnp.dtype(w_hh.dtype).itemsize

    Bb = _pick_batch_block(B)
    Tc = _pick_time_chunk(T, Bb, D, H, x_item, y_item, w_item, vmem_budget_bytes)
    assert B % Bb == 0 and T % Tc == 0, (B, Bb, T, Tc)

    need = _layer_vmem_bytes(Bb, Tc, D, H, x_item, y_item, w_item,
                             _SINGLE_BUFFER_INVARIANTS)
    # Explicit scoped-VMEM budget: >= 32 MiB (above v5e's 16 MiB scoped default),
    # capped at v7x's 64 MiB physical VMEM.
    vmem_limit = int(min(64 * _MIB, max(32 * _MIB, 2 * need)))

    def call(single_buffer_weights):
        # Grid-invariant weights only need one VMEM buffer; double-buffering them
        # just burns VMEM (they are DMA'd once anyway).
        inv = ({"pipeline_mode": pl.Buffered(buffer_count=1)}
               if single_buffer_weights else {})
        grid_spec = pltpu.PrefetchScalarGridSpec(
            num_scalar_prefetch=0,
            grid=(B // Bb, T // Tc),                                  # (batch blocks, time chunks)
            in_specs=[
                pl.BlockSpec((Bb, Tc, D), lambda b, c: (b, c, 0)),    # x chunk (batch-first)
                pl.BlockSpec((D, 4 * H), lambda b, c: (0, 0), **inv),  # W_ih (invariant)
                pl.BlockSpec((H, 4 * H), lambda b, c: (0, 0), **inv),  # W_hh (invariant)
                pl.BlockSpec((1, 4 * H), lambda b, c: (0, 0), **inv),  # bias (invariant)
                pl.BlockSpec((Bb, H), lambda b, c: (b, 0)),           # h0 block
                pl.BlockSpec((Bb, H), lambda b, c: (b, 0)),           # c0 block
            ],
            out_specs=[
                pl.BlockSpec((Bb, Tc, H), lambda b, c: (b, c, 0)),    # y chunk
                pl.BlockSpec((Bb, H), lambda b, c: (b, 0)),           # h_T (resident over time)
                pl.BlockSpec((Bb, H), lambda b, c: (b, 0)),           # c_T (resident over time)
            ],
            scratch_shapes=[
                pltpu.VMEM((Bb, Tc, 4 * H), jnp.float32),             # gx (input projection)
                pltpu.VMEM((Bb, H), jnp.float32),                     # h carry
                pltpu.VMEM((Bb, H), jnp.float32),                     # c carry
            ],
        )
        return pl.pallas_call(
            _lstm_layer_kernel,
            out_shape=(
                jax.ShapeDtypeStruct((B, T, H), out_dtype),           # y
                jax.ShapeDtypeStruct((B, H), jnp.float32),            # h_T
                jax.ShapeDtypeStruct((B, H), jnp.float32),            # c_T
            ),
            grid_spec=grid_spec,
            compiler_params=pltpu.CompilerParams(
                dimension_semantics=("parallel", "arbitrary"),        # batch megacore, serial time
                vmem_limit_bytes=vmem_limit,
            ),
        )(x, w_ih, w_hh, bias, h0, c0)

    if _SINGLE_BUFFER_INVARIANTS:
        try:
            return call(True)
        except Exception:
            # This JAX build does not accept pipeline_mode on main-grid BlockSpecs;
            # fall back to default double-buffering (correctness unaffected).
            _SINGLE_BUFFER_INVARIANTS = False
    return call(False)


def make_torch_lstm_params(key, in_features, h_dim, layers_num):
    """Deterministic synthetic PyTorch nn.LSTM parameters (unidirectional):
    per layer (weight_ih (4H, D_in), weight_hh (4H, H), bias_ih (4H,), bias_hh (4H,)),
    gate block order [i, f, g, o]."""
    params = []
    for l in range(layers_num):
        d_in = in_features if l == 0 else h_dim
        key, k1, k2, k3, k4 = jax.random.split(key, 5)
        w_ih = 0.1 * jax.random.normal(k1, (4 * h_dim, d_in), jnp.float32)
        w_hh = 0.1 * jax.random.normal(k2, (4 * h_dim, h_dim), jnp.float32)
        b_ih = 0.1 * jax.random.normal(k3, (4 * h_dim,), jnp.float32)
        b_hh = 0.1 * jax.random.normal(k4, (4 * h_dim,), jnp.float32)
        params.append((w_ih, w_hh, b_ih, b_hh))
    return params


def prepare_params(torch_params, h_dim, mxu_dtype=jnp.bfloat16):
    """Pre-transform PyTorch LSTM weights for the kernel:
      * transpose to (D_in, 4H) / (H, 4H),
      * permute gate blocks [i, f, g, o] -> [i, f, o, g] (contiguous sigmoid span),
      * fold bias_ih + bias_hh into one (1, 4H) f32 row,
      * cast matmul weights to `mxu_dtype` (bf16 for the MXU; jnp.float32 for parity tests).
    """
    H = h_dim
    perm = jnp.concatenate([
        jnp.arange(0 * H, 1 * H),   # i
        jnp.arange(1 * H, 2 * H),   # f
        jnp.arange(3 * H, 4 * H),   # o
        jnp.arange(2 * H, 3 * H),   # g
    ])
    prepped = []
    for (w_ih, w_hh, b_ih, b_hh) in torch_params:
        w_ih_t = jnp.transpose(w_ih)[:, perm].astype(mxu_dtype)          # (D_in, 4H)
        w_hh_t = jnp.transpose(w_hh)[:, perm].astype(mxu_dtype)          # (H, 4H)
        bias = (b_ih + b_hh)[perm].reshape(1, 4 * H).astype(jnp.float32)
        prepped.append((w_ih_t, w_hh_t, bias))
    return prepped


def lstm_decoder_forward(y, params, h_dec_dim, layers_num, hidden_=None, len_=None):
    """Pallas equivalent of LSTMDecoder.forward.

    y: (B, T, F). hidden_: optional (h0, c0), each (layers_num, B, H); zeros if None.
    Returns (output (B, T, H), (h_n, c_n) each (layers_num, B, H)).
    """
    del len_  # TODO(synk): packed variable-length sequences not supported (full length assumed).
    B, T, _ = y.shape
    H = h_dec_dim
    in_dtype = y.dtype
    stream_dtype = params[0][0].dtype    # MXU / inter-layer streaming dtype (bf16 by default)

    if hidden_ is None:
        h0 = jnp.zeros((layers_num, B, H), jnp.float32)
        c0 = jnp.zeros((layers_num, B, H), jnp.float32)
    else:
        h0, c0 = hidden_
        h0 = h0.astype(jnp.float32)
        c0 = c0.astype(jnp.float32)

    # Stream activations between layers in the MXU dtype (halves x/y HBM traffic and
    # pipelined VMEM blocks); final layer emits the caller's dtype, h/c stay f32.
    # TODO(synk): fuse the layer loop into one pallas_call (wavefront over time chunks)
    # to remove the remaining inter-layer HBM round trips.
    layer_in = y.astype(stream_dtype)
    h_n, c_n = [], []
    for l in range(layers_num):
        w_ih, w_hh, bias = params[l]
        out_dtype = in_dtype if l == layers_num - 1 else stream_dtype
        layer_in, hT, cT = _lstm_layer(layer_in, w_ih, w_hh, bias, h0[l], c0[l],
                                       out_dtype=out_dtype)
        h_n.append(hT)
        c_n.append(cT)

    output = layer_in                                    # (B, T, H)
    h_state = jnp.stack(h_n, axis=0).astype(in_dtype)    # (layers_num, B, H)
    c_state = jnp.stack(c_n, axis=0).astype(in_dtype)    # (layers_num, B, H)
    return output, (h_state, c_state)


def _lstm_reference(y, torch_params, H):
    """Pure-JAX f32 reference matching torch.nn.LSTM (unidirectional, zero init state)."""
    x = y.astype(jnp.float32)
    B = x.shape[0]
    h_n, c_n = [], []
    for (w_ih, w_hh, b_ih, b_hh) in torch_params:
        h = jnp.zeros((B, H), jnp.float32)
        c = jnp.zeros((B, H), jnp.float32)
        outs = []
        for t in range(x.shape[1]):
            g = x[:, t, :] @ w_ih.T + b_ih + h @ w_hh.T + b_hh
            i = jax.nn.sigmoid(g[:, 0 * H:1 * H])
            f = jax.nn.sigmoid(g[:, 1 * H:2 * H])
            gg = jnp.tanh(g[:, 2 * H:3 * H])
            o = jax.nn.sigmoid(g[:, 3 * H:4 * H])
            c = f * c + i * gg
            h = o * jnp.tanh(c)
            outs.append(h)
        x = jnp.stack(outs, axis=1)
        h_n.append(h)
        c_n.append(c)
    return x, (jnp.stack(h_n), jnp.stack(c_n))


if __name__ == "__main__":
    B, T, F = 2, 8, 16        # batch, seq, in_features
    H = 32                    # h_dec_dim
    LAYERS = 2

    key = jax.random.PRNGKey(0)
    ky, kp = jax.random.split(key)
    y_in = jax.random.normal(ky, (B, T, F), jnp.float32)

    torch_params = make_torch_lstm_params(kp, F, H, LAYERS)
    params = prepare_params(torch_params, H, mxu_dtype=jnp.bfloat16)

    output, (h_state, c_state) = lstm_decoder_forward(y_in, params, H, LAYERS)
    jax.block_until_ready((output, h_state, c_state))

    assert output.shape == (B, T, H), output.shape
    assert h_state.shape == (LAYERS, B, H), h_state.shape
    assert c_state.shape == (LAYERS, B, H), c_state.shape

    # Correctness vs a pure-JAX f32 reference. bf16 weight/activation streaming gives
    # ~1e-2-class deviation from an f32 PyTorch LSTM; pass mxu_dtype=jnp.float32 to
    # prepare_params for tight parity tests.
    ref_out, (ref_h, ref_c) = _lstm_reference(y_in, torch_params, H)
    for got, want in ((output, ref_out), (h_state, ref_h), (c_state, ref_c)):
        err = float(jnp.max(jnp.abs(got.astype(jnp.float32) - want)))
        assert err < 5e-2, f"max abs error {err}"

    print("KERNEL_OK")
</pallas_src>

<mosaic_0001>
module attributes {stable_mosaic.version = 11 : i64} {
  func.func @_lstm_layer_kernel(%arg0: i32, %arg1: i32, %arg2: memref<2x8x16xbf16, #tpu.memory_space<vmem>>, %arg3: memref<16x128xbf16, #tpu.memory_space<vmem>>, %arg4: memref<32x128xbf16, #tpu.memory_space<vmem>>, %arg5: memref<1x128xf32, #tpu.memory_space<vmem>>, %arg6: memref<2x32xf32, #tpu.memory_space<vmem>>, %arg7: memref<2x32xf32, #tpu.memory_space<vmem>>, %arg8: memref<2x8x32xbf16, #tpu.memory_space<vmem>>, %arg9: memref<2x32xf32, #tpu.memory_space<vmem>>, %arg10: memref<2x32xf32, #tpu.memory_space<vmem>>, %arg11: memref<2x8x128xf32, #tpu.memory_space<vmem>>, %arg12: memref<2x32xf32, #tpu.memory_space<vmem>>, %arg13: memref<2x32xf32, #tpu.memory_space<vmem>>) attributes {dimension_semantics = [#tpu.dimension_semantics<parallel>, #tpu.dimension_semantics<arbitrary>], iteration_bounds = array<i64: 1, 1>, scalar_prefetch = 0 : i64, scratch_operands = 3 : i64, tpu.core_type = #tpu.core_type<tc>, window_params = [{transform_indices = @transform_0, window_bounds = array<i64: 2, 8, 16>}, {pipeline_mode = #tpu.pipeline_mode<synchronous>, transform_indices = @transform_1, window_bounds = array<i64: 16, 128>}, {pipeline_mode = #tpu.pipeline_mode<synchronous>, transform_indices = @transform_2, window_bounds = array<i64: 32, 128>}, {pipeline_mode = #tpu.pipeline_mode<synchronous>, transform_indices = @transform_3, window_bounds = array<i64: 1, 128>}, {transform_indices = @transform_4, window_bounds = array<i64: 2, 32>}, {transform_indices = @transform_5, window_bounds = array<i64: 2, 32>}, {transform_indices = @transform_6, window_bounds = array<i64: 2, 8, 32>}, {transform_indices = @transform_7, window_bounds = array<i64: 2, 32>}, {transform_indices = @transform_8, window_bounds = array<i64: 2, 32>}]} {
    %c0_i32 = arith.constant 0 : i32
    %0 = arith.cmpi eq, %arg1, %c0_i32 : i32
    %1 = arith.extui %0 : i1 to i32
    %c0_i32_0 = arith.constant 0 : i32
    %2 = arith.cmpi ne, %1, %c0_i32_0 : i32
    scf.if %2 {
      %c0_79 = arith.constant 0 : index
      %c0_80 = arith.constant 0 : index
      %220 = vector.load %arg6[%c0_79, %c0_80] : memref<2x32xf32, #tpu.memory_space<vmem>>, vector<2x32xf32>
      %c0_81 = arith.constant 0 : index
      %c0_82 = arith.constant 0 : index
      %221 = vector.load %arg12[%c0_81, %c0_82] : memref<2x32xf32, #tpu.memory_space<vmem>>, vector<2x32xf32>
      tpu.vector_store %arg12[%c0_81, %c0_82], %220 {strides = array<i32>} : memref<2x32xf32, #tpu.memory_space<vmem>>, vector<2x32xf32>,
      %c0_83 = arith.constant 0 : index
      %c0_84 = arith.constant 0 : index
      %222 = vector.load %arg7[%c0_83, %c0_84] : memref<2x32xf32, #tpu.memory_space<vmem>>, vector<2x32xf32>
      %c0_85 = arith.constant 0 : index
      %c0_86 = arith.constant 0 : index
      %223 = vector.load %arg13[%c0_85, %c0_86] : memref<2x32xf32, #tpu.memory_space<vmem>>, vector<2x32xf32>
      tpu.vector_store %arg13[%c0_85, %c0_86], %222 {strides = array<i32>} : memref<2x32xf32, #tpu.memory_space<vmem>>, vector<2x32xf32>,
    } else {
    }
    %c0 = arith.constant 0 : index
    %c0_1 = arith.constant 0 : index
    %c0_2 = arith.constant 0 : index
    %3 = vector.load %arg2[%c0, %c0_1, %c0_2] : memref<2x8x16xbf16, #tpu.memory_space<vmem>>, vector<2x8x16xbf16>
    %4 = vector.shape_cast %3 : vector<2x8x16xbf16> to vector<16x16xbf16>
    %c0_3 = arith.constant 0 : index
    %c0_4 = arith.constant 0 : index
    %5 = vector.load %arg3[%c0_3, %c0_4] : memref<16x128xbf16, #tpu.memory_space<vmem>>, vector<16x128xbf16>
    %cst = arith.constant dense<0.000000e+00> : vector<16x128xf32>
    %6 = tpu.matmul %4, %5, %cst {dimension_numbers = #tpu.dot_dimension_numbers<[1], [0], [0], [1], [0, 0, 1, 1], [], []>} : vector<16x16xbf16>, vector<16x128xbf16>, vector<16x128xf32> -> vector<16x128xf32>
    %c0_5 = arith.constant 0 : index
    %c0_6 = arith.constant 0 : index
    %7 = vector.load %arg5[%c0_5, %c0_6] : memref<1x128xf32, #tpu.memory_space<vmem>>, vector<1x128xf32>
    %8 = vector.broadcast %7 : vector<1x128xf32> to vector<16x128xf32>
    %9 = arith.addf %6, %8 : vector<16x128xf32>
    %10 = vector.shape_cast %9 : vector<16x128xf32> to vector<2x8x128xf32>
    %c0_7 = arith.constant 0 : index
    %c0_8 = arith.constant 0 : index
    %c0_9 = arith.constant 0 : index
    %11 = vector.load %arg11[%c0_7, %c0_8, %c0_9] : memref<2x8x128xf32, #tpu.memory_space<vmem>>, vector<2x8x128xf32>
    tpu.vector_store %arg11[%c0_7, %c0_8, %c0_9], %10 {strides = array<i32>} : memref<2x8x128xf32, #tpu.memory_space<vmem>>, vector<2x8x128xf32>,
    %c0_10 = arith.constant 0 : index
    %c0_11 = arith.constant 0 : index
    %12 = vector.load %arg4[%c0_10, %c0_11] : memref<32x128xbf16, #tpu.memory_space<vmem>>, vector<32x128xbf16>
    %c0_12 = arith.constant 0 : index
    %c0_13 = arith.constant 0 : index
    %13 = vector.load %arg12[%c0_12, %c0_13] : memref<2x32xf32, #tpu.memory_space<vmem>>, vector<2x32xf32>
    %c0_14 = arith.constant 0 : index
    %c0_15 = arith.constant 0 : index
    %14 = vector.load %arg13[%c0_14, %c0_15] : memref<2x32xf32, #tpu.memory_space<vmem>>, vector<2x32xf32>
    %c0_16 = arith.constant 0 : index
    %c0_17 = arith.constant 0 : index
    %c0_18 = arith.constant 0 : index
    %15 = vector.load %arg11[%c0_16, %c0_17, %c0_18] : memref<2x8x128xf32, #tpu.memory_space<vmem>>, vector<2x1x128xf32>
    %16 = vector.shape_cast %15 : vector<2x1x128xf32> to vector<2x128xf32>
    %17 = arith.truncf %13 : vector<2x32xf32> to vector<2x32xbf16>
    %cst_19 = arith.constant dense<0.000000e+00> : vector<2x128xf32>
    %18 = tpu.matmul %17, %12, %cst_19 {dimension_numbers = #tpu.dot_dimension_numbers<[1], [0], [0], [1], [0, 0, 1, 1], [], []>} : vector<2x32xbf16>, vector<32x128xbf16>, vector<2x128xf32> -> vector<2x128xf32>
    %19 = arith.addf %16, %18 : vector<2x128xf32>
    %20 = vector.extract_strided_slice %19 {offsets = [0, 0], sizes = [2, 96], strides = [1, 1]} : vector<2x128xf32> to vector<2x96xf32>
    %21 = arith.negf %20 : vector<2x96xf32>
    %22 = math.exp %21 : vector<2x96xf32>
    %cst_20 = arith.constant 1.000000e+00 : f32
    %23 = vector.broadcast %cst_20 : f32 to vector<2x96xf32>
    %24 = arith.addf %23, %22 : vector<2x96xf32>
    %25 = arith.divf %23, %24 : vector<2x96xf32>
    %26 = vector.extract_strided_slice %25 {offsets = [0, 0], sizes = [2, 32], strides = [1, 1]} : vector<2x96xf32> to vector<2x32xf32>
    %27 = vector.extract_strided_slice %25 {offsets = [0, 32], sizes = [2, 32], strides = [1, 1]} : vector<2x96xf32> to vector<2x32xf32>
    %28 = vector.extract_strided_slice %25 {offsets = [0, 64], sizes = [2, 32], strides = [1, 1]} : vector<2x96xf32> to vector<2x32xf32>
    %29 = vector.extract_strided_slice %19 {offsets = [0, 96], sizes = [2, 32], strides = [1, 1]} : vector<2x128xf32> to vector<2x32xf32>
    %30 = math.tanh %29 : vector<2x32xf32>
    %31 = arith.mulf %27, %14 : vector<2x32xf32>
    %32 = arith.mulf %26, %30 : vector<2x32xf32>
    %33 = arith.addf %31, %32 : vector<2x32xf32>
    %34 = math.tanh %33 : vector<2x32xf32>
    %35 = arith.mulf %28, %34 : vector<2x32xf32>
    %36 = arith.truncf %35 : vector<2x32xf32> to vector<2x32xbf16>
    %c0_21 = arith.constant 0 : index
    %c0_22 = arith.constant 0 : index
    %c0_23 = arith.constant 0 : index
    %37 = vector.load %arg8[%c0_21, %c0_22, %c0_23] : memref<2x8x32xbf16, #tpu.memory_space<vmem>>, vector<2x1x32xbf16>
    %38 = vector.shape_cast %37 : vector<2x1x32xbf16> to vector<2x32xbf16>
    %39 = vector.shape_cast %36 : vector<2x32xbf16> to vector<2x1x32xbf16>
    tpu.vector_store %arg8[%c0_21, %c0_22, %c0_23], %39 {strides = array<i32>} : memref<2x8x32xbf16, #tpu.memory_space<vmem>>, vector<2x1x32xbf16>,
    %c0_24 = arith.constant 0 : index
    %c1 = arith.constant 1 : index
    %c0_25 = arith.constant 0 : index
    %40 = vector.load %arg11[%c0_24, %c1, %c0_25] : memref<2x8x128xf32, #tpu.memory_space<vmem>>, vector<2x1x128xf32>
    %41 = vector.shape_cast %40 : vector<2x1x128xf32> to vector<2x128xf32>
    %42 = arith.truncf %35 : vector<2x32xf32> to vector<2x32xbf16>
    %cst_26 = arith.constant dense<0.000000e+00> : vector<2x128xf32>
    %43 = tpu.matmul %42, %12, %cst_26 {dimension_numbers = #tpu.dot_dimension_numbers<[1], [0], [0], [1], [0, 0, 1, 1], [], []>} : vector<2x32xbf16>, vector<32x128xbf16>, vector<2x128xf32> -> vector<2x128xf32>
    %44 = arith.addf %41, %43 : vector<2x128xf32>
    %45 = vector.extract_strided_slice %44 {offsets = [0, 0], sizes = [2, 96], strides = [1, 1]} : vector<2x128xf32> to vector<2x96xf32>
    %46 = arith.negf %45 : vector<2x96xf32>
    %47 = math.exp %46 : vector<2x96xf32>
    %cst_27 = arith.constant 1.000000e+00 : f32
    %48 = vector.broadcast %cst_27 : f32 to vector<2x96xf32>
    %49 = arith.addf %48, %47 : vector<2x96xf32>
    %50 = arith.divf %48, %49 : vector<2x96xf32>
    %51 = vector.extract_strided_slice %50 {offsets = [0, 0], sizes = [2, 32], strides = [1, 1]} : vector<2x96xf32> to vector<2x32xf32>
    %52 = vector.extract_strided_slice %50 {offsets = [0, 32], sizes = [2, 32], strides = [1, 1]} : vector<2x96xf32> to vector<2x32xf32>
    %53 = vector.extract_strided_slice %50 {offsets = [0, 64], sizes = [2, 32], strides = [1, 1]} : vector<2x96xf32> to vector<2x32xf32>
    %54 = vector.extract_strided_slice %44 {offsets = [0, 96], sizes = [2, 32], strides = [1, 1]} : vector<2x128xf32> to vector<2x32xf32>
    %55 = math.tanh %54 : vector<2x32xf32>
    %56 = arith.mulf %52, %33 : vector<2x32xf32>
    %57 = arith.mulf %51, %55 : vector<2x32xf32>
    %58 = arith.addf %56, %57 : vector<2x32xf32>
    %59 = math.tanh %58 : vector<2x32xf32>
    %60 = arith.mulf %53, %59 : vector<2x32xf32>
    %61 = arith.truncf %60 : vector<2x32xf32> to vector<2x32xbf16>
    %c0_28 = arith.constant 0 : index
    %c1_29 = arith.constant 1 : index
    %c0_30 = arith.constant 0 : index
    %62 = vector.load %arg8[%c0_28, %c1_29, %c0_30] : memref<2x8x32xbf16, #tpu.memory_space<vmem>>, vector<2x1x32xbf16>
    %63 = vector.shape_cast %62 : vector<2x1x32xbf16> to vector<2x32xbf16>
    %64 = vector.shape_cast %61 : vector<2x32xbf16> to vector<2x1x32xbf16>
    tpu.vector_store %arg8[%c0_28, %c1_29, %c0_30], %64 {strides = array<i32>} : memref<2x8x32xbf16, #tpu.memory_space<vmem>>, vector<2x1x32xbf16>,
    %c0_31 = arith.constant 0 : index
    %c2 = arith.constant 2 : index
    %c0_32 = arith.constant 0 : index
    %65 = vector.load %arg11[%c0_31, %c2, %c0_32] : memref<2x8x128xf32, #tpu.memory_space<vmem>>, vector<2x1x128xf32>
    %66 = vector.shape_cast %65 : vector<2x1x128xf32> to vector<2x128xf32>
    %67 = arith.truncf %60 : vector<2x32xf32> to vector<2x32xbf16>
    %cst_33 = arith.constant dense<0.000000e+00> : vector<2x128xf32>
    %68 = tpu.matmul %67, %12, %cst_33 {dimension_numbers = #tpu.dot_dimension_numbers<[1], [0], [0], [1], [0, 0, 1, 1], [], []>} : vector<2x32xbf16>, vector<32x128xbf16>, vector<2x128xf32> -> vector<2x128xf32>
    %69 = arith.addf %66, %68 : vector<2x128xf32>
    %70 = vector.extract_strided_slice %69 {offsets = [0, 0], sizes = [2, 96], strides = [1, 1]} : vector<2x128xf32> to vector<2x96xf32>
    %71 = arith.negf %70 : vector<2x96xf32>
    %72 = math.exp %71 : vector<2x96xf32>
    %cst_34 = arith.constant 1.000000e+00 : f32
    %73 = vector.broadcast %cst_34 : f32 to vector<2x96xf32>
    %74 = arith.addf %73, %72 : vector<2x96xf32>
    %75 = arith.divf %73, %74 : vector<2x96xf32>
    %76 = vector.extract_strided_slice %75 {offsets = [0, 0], sizes = [2, 32], strides = [1, 1]} : vector<2x96xf32> to vector<2x32xf32>
    %77 = vector.extract_strided_slice %75 {offsets = [0, 32], sizes = [2, 32], strides = [1, 1]} : vector<2x96xf32> to vector<2x32xf32>
    %78 = vector.extract_strided_slice %75 {offsets = [0, 64], sizes = [2, 32], strides = [1, 1]} : vector<2x96xf32> to vector<2x32xf32>
    %79 = vector.extract_strided_slice %69 {offsets = [0, 96], sizes = [2, 32], strides = [1, 1]} : vector<2x128xf32> to vector<2x32xf32>
    %80 = math.tanh %79 : vector<2x32xf32>
    %81 = arith.mulf %77, %58 : vector<2x32xf32>
    %82 = arith.mulf %76, %80 : vector<2x32xf32>
    %83 = arith.addf %81, %82 : vector<2x32xf32>
    %84 = math.tanh %83 : vector<2x32xf32>
    %85 = arith.mulf %78, %84 : vector<2x32xf32>
    %86 = arith.truncf %85 : vector<2x32xf32> to vector<2x32xbf16>
    %c0_35 = arith.constant 0 : index
    %c2_36 = arith.constant 2 : index
    %c0_37 = arith.constant 0 : index
    %87 = vector.load %arg8[%c0_35, %c2_36, %c0_37] : memref<2x8x32xbf16, #tpu.memory_space<vmem>>, vector<2x1x32xbf16>
    %88 = vector.shape_cast %87 : vector<2x1x32xbf16> to vector<2x32xbf16>
    %89 = vector.shape_cast %86 : vector<2x32xbf16> to vector<2x1x32xbf16>
    tpu.vector_store %arg8[%c0_35, %c2_36, %c0_37], %89 {strides = array<i32>} : memref<2x8x32xbf16, #tpu.memory_space<vmem>>, vector<2x1x32xbf16>,
    %c0_38 = arith.constant 0 : index
    %c3 = arith.constant 3 : index
    %c0_39 = arith.constant 0 : index
    %90 = vector.load %arg11[%c0_38, %c3, %c0_39] : memref<2x8x128xf32, #tpu.memory_space<vmem>>, vector<2x1x128xf32>
    %91 = vector.shape_cast %90 : vector<2x1x128xf32> to vector<2x128xf32>
    %92 = arith.truncf %85 : vector<2x32xf32> to vector<2x32xbf16>
    %cst_40 = arith.constant dense<0.000000e+00> : vector<2x128xf32>
    %93 = tpu.matmul %92, %12, %cst_40 {dimension_numbers = #tpu.dot_dimension_numbers<[1], [0], [0], [1], [0, 0, 1, 1], [], []>} : vector<2x32xbf16>, vector<32x128xbf16>, vector<2x128xf32> -> vector<2x128xf32>
    %94 = arith.addf %91, %93 : vector<2x128xf32>
    %95 = vector.extract_strided_slice %94 {offsets = [0, 0], sizes = [2, 96], strides = [1, 1]} : vector<2x128xf32> to vector<2x96xf32>
    %96 = arith.negf %95 : vector<2x96xf32>
    %97 = math.exp %96 : vector<2x96xf32>
    %cst_41 = arith.constant 1.000000e+00 : f32
    %98 = vector.broadcast %cst_41 : f32 to vector<2x96xf32>
    %99 = arith.addf %98, %97 : vector<2x96xf32>
    %100 = arith.divf %98, %99 : vector<2x96xf32>
    %101 = vector.extract_strided_slice %100 {offsets = [0, 0], sizes = [2, 32], strides = [1, 1]} : vector<2x96xf32> to vector<2x32xf32>
    %102 = vector.extract_strided_slice %100 {offsets = [0, 32], sizes = [2, 32], strides = [1, 1]} : vector<2x96xf32> to vector<2x32xf32>
    %103 = vector.extract_strided_slice %100 {offsets = [0, 64], sizes = [2, 32], strides = [1, 1]} : vector<2x96xf32> to vector<2x32xf32>
    %104 = vector.extract_strided_slice %94 {offsets = [0, 96], sizes = [2, 32], strides = [1, 1]} : vector<2x128xf32> to vector<2x32xf32>
    %105 = math.tanh %104 : vector<2x32xf32>
    %106 = arith.mulf %102, %83 : vector<2x32xf32>
    %107 = arith.mulf %101, %105 : vector<2x32xf32>
    %108 = arith.addf %106, %107 : vector<2x32xf32>
    %109 = math.tanh %108 : vector<2x32xf32>
    %110 = arith.mulf %103, %109 : vector<2x32xf32>
    %111 = arith.truncf %110 : vector<2x32xf32> to vector<2x32xbf16>
    %c0_42 = arith.constant 0 : index
    %c3_43 = arith.constant 3 : index
    %c0_44 = arith.constant 0 : index
    %112 = vector.load %arg8[%c0_42, %c3_43, %c0_44] : memref<2x8x32xbf16, #tpu.memory_space<vmem>>, vector<2x1x32xbf16>
    %113 = vector.shape_cast %112 : vector<2x1x32xbf16> to vector<2x32xbf16>
    %114 = vector.shape_cast %111 : vector<2x32xbf16> to vector<2x1x32xbf16>
    tpu.vector_store %arg8[%c0_42, %c3_43, %c0_44], %114 {strides = array<i32>} : memref<2x8x32xbf16, #tpu.memory_space<vmem>>, vector<2x1x32xbf16>,
    %c0_45 = arith.constant 0 : index
    %c4 = arith.constant 4 : index
    %c0_46 = arith.constant 0 : index
    %115 = vector.load %arg11[%c0_45, %c4, %c0_46] : memref<2x8x128xf32, #tpu.memory_space<vmem>>, vector<2x1x128xf32>
    %116 = vector.shape_cast %115 : vector<2x1x128xf32> to vector<2x128xf32>
    %117 = arith.truncf %110 : vector<2x32xf32> to vector<2x32xbf16>
    %cst_47 = arith.constant dense<0.000000e+00> : vector<2x128xf32>
    %118 = tpu.matmul %117, %12, %cst_47 {dimension_numbers = #tpu.dot_dimension_numbers<[1], [0], [0], [1], [0, 0, 1, 1], [], []>} : vector<2x32xbf16>, vector<32x128xbf16>, vector<2x128xf32> -> vector<2x128xf32>
    %119 = arith.addf %116, %118 : vector<2x128xf32>
    %120 = vector.extract_strided_slice %119 {offsets = [0, 0], sizes = [2, 96], strides = [1, 1]} : vector<2x128xf32> to vector<2x96xf32>
    %121 = arith.negf %120 : vector<2x96xf32>
    %122 = math.exp %121 : vector<2x96xf32>
    %cst_48 = arith.constant 1.000000e+00 : f32
    %123 = vector.broadcast %cst_48 : f32 to vector<2x96xf32>
    %124 = arith.addf %123, %122 : vector<2x96xf32>
    %125 = arith.divf %123, %124 : vector<2x96xf32>
    %126 = vector.extract_strided_slice %125 {offsets = [0, 0], sizes = [2, 32], strides = [1, 1]} : vector<2x96xf32> to vector<2x32xf32>
    %127 = vector.extract_strided_slice %125 {offsets = [0, 32], sizes = [2, 32], strides = [1, 1]} : vector<2x96xf32> to vector<2x32xf32>
    %128 = vector.extract_strided_slice %125 {offsets = [0, 64], sizes = [2, 32], strides = [1, 1]} : vector<2x96xf32> to vector<2x32xf32>
    %129 = vector.extract_strided_slice %119 {offsets = [0, 96], sizes = [2, 32], strides = [1, 1]} : vector<2x128xf32> to vector<2x32xf32>
    %130 = math.tanh %129 : vector<2x32xf32>
    %131 = arith.mulf %127, %108 : vector<2x32xf32>
    %132 = arith.mulf %126, %130 : vector<2x32xf32>
    %133 = arith.addf %131, %132 : vector<2x32xf32>
    %134 = math.tanh %133 : vector<2x32xf32>
    %135 = arith.mulf %128, %134 : vector<2x32xf32>
    %136 = arith.truncf %135 : vector<2x32xf32> to vector<2x32xbf16>
    %c0_49 = arith.constant 0 : index
    %c4_50 = arith.constant 4 : index
    %c0_51 = arith.constant 0 : index
    %137 = vector.load %arg8[%c0_49, %c4_50, %c0_51] : memref<2x8x32xbf16, #tpu.memory_space<vmem>>, vector<2x1x32xbf16>
    %138 = vector.shape_cast %137 : vector<2x1x32xbf16> to vector<2x32xbf16>
    %139 = vector.shape_cast %136 : vector<2x32xbf16> to vector<2x1x32xbf16>
    tpu.vector_store %arg8[%c0_49, %c4_50, %c0_51], %139 {strides = array<i32>} : memref<2x8x32xbf16, #tpu.memory_space<vmem>>, vector<2x1x32xbf16>,
    %c0_52 = arith.constant 0 : index
    %c5 = arith.constant 5 : index
    %c0_53 = arith.constant 0 : index
    %140 = vector.load %arg11[%c0_52, %c5, %c0_53] : memref<2x8x128xf32, #tpu.memory_space<vmem>>, vector<2x1x128xf32>
    %141 = vector.shape_cast %140 : vector<2x1x128xf32> to vector<2x128xf32>
    %142 = arith.truncf %135 : vector<2x32xf32> to vector<2x32xbf16>
    %cst_54 = arith.constant dense<0.000000e+00> : vector<2x128xf32>
    %143 = tpu.matmul %142, %12, %cst_54 {dimension_numbers = #tpu.dot_dimension_numbers<[1], [0], [0], [1], [0, 0, 1, 1], [], []>} : vector<2x32xbf16>, vector<32x128xbf16>, vector<2x128xf32> -> vector<2x128xf32>
    %144 = arith.addf %141, %143 : vector<2x128xf32>
    %145 = vector.extract_strided_slice %144 {offsets = [0, 0], sizes = [2, 96], strides = [1, 1]} : vector<2x128xf32> to vector<2x96xf32>
    %146 = arith.negf %145 : vector<2x96xf32>
    %147 = math.exp %146 : vector<2x96xf32>
    %cst_55 = arith.constant 1.000000e+00 : f32
    %148 = vector.broadcast %cst_55 : f32 to vector<2x96xf32>
    %149 = arith.addf %148, %147 : vector<2x96xf32>
    %150 = arith.divf %148, %149 : vector<2x96xf32>
    %151 = vector.extract_strided_slice %150 {offsets = [0, 0], sizes = [2, 32], strides = [1, 1]} : vector<2x96xf32> to vector<2x32xf32>
    %152 = vector.extract_strided_slice %150 {offsets = [0, 32], sizes = [2, 32], strides = [1, 1]} : vector<2x96xf32> to vector<2x32xf32>
    %153 = vector.extract_strided_slice %150 {offsets = [0, 64], sizes = [2, 32], strides = [1, 1]} : vector<2x96xf32> to vector<2x32xf32>
    %154 = vector.extract_strided_slice %144 {offsets = [0, 96], sizes = [2, 32], strides = [1, 1]} : vector<2x128xf32> to vector<2x32xf32>
    %155 = math.tanh %154 : vector<2x32xf32>
    %156 = arith.mulf %152, %133 : vector<2x32xf32>
    %157 = arith.mulf %151, %155 : vector<2x32xf32>
    %158 = arith.addf %156, %157 : vector<2x32xf32>
    %159 = math.tanh %158 : vector<2x32xf32>
    %160 = arith.mulf %153, %159 : vector<2x32xf32>
    %161 = arith.truncf %160 : vector<2x32xf32> to vector<2x32xbf16>
    %c0_56 = arith.constant 0 : index
    %c5_57 = arith.constant 5 : index
    %c0_58 = arith.constant 0 : index
    %162 = vector.load %arg8[%c0_56, %c5_57, %c0_58] : memref<2x8x32xbf16, #tpu.memory_space<vmem>>, vector<2x1x32xbf16>
    %163 = vector.shape_cast %162 : vector<2x1x32xbf16> to vector<2x32xbf16>
    %164 = vector.shape_cast %161 : vector<2x32xbf16> to vector<2x1x32xbf16>
    tpu.vector_store %arg8[%c0_56, %c5_57, %c0_58], %164 {strides = array<i32>} : memref<2x8x32xbf16, #tpu.memory_space<vmem>>, vector<2x1x32xbf16>,
    %c0_59 = arith.constant 0 : index
    %c6 = arith.constant 6 : index
    %c0_60 = arith.constant 0 : index
    %165 = vector.load %arg11[%c0_59, %c6, %c0_60] : memref<2x8x128xf32, #tpu.memory_space<vmem>>, vector<2x1x128xf32>
    %166 = vector.shape_cast %165 : vector<2x1x128xf32> to vector<2x128xf32>
    %167 = arith.truncf %160 : vector<2x32xf32> to vector<2x32xbf16>
    %cst_61 = arith.constant dense<0.000000e+00> : vector<2x128xf32>
    %168 = tpu.matmul %167, %12, %cst_61 {dimension_numbers = #tpu.dot_dimension_numbers<[1], [0], [0], [1], [0, 0, 1, 1], [], []>} : vector<2x32xbf16>, vector<32x128xbf16>, vector<2x128xf32> -> vector<2x128xf32>
    %169 = arith.addf %166, %168 : vector<2x128xf32>
    %170 = vector.extract_strided_slice %169 {offsets = [0, 0], sizes = [2, 96], strides = [1, 1]} : vector<2x128xf32> to vector<2x96xf32>
    %171 = arith.negf %170 : vector<2x96xf32>
    %172 = math.exp %171 : vector<2x96xf32>
    %cst_62 = arith.constant 1.000000e+00 : f32
    %173 = vector.broadcast %cst_62 : f32 to vector<2x96xf32>
    %174 = arith.addf %173, %172 : vector<2x96xf32>
    %175 = arith.divf %173, %174 : vector<2x96xf32>
    %176 = vector.extract_strided_slice %175 {offsets = [0, 0], sizes = [2, 32], strides = [1, 1]} : vector<2x96xf32> to vector<2x32xf32>
    %177 = vector.extract_strided_slice %175 {offsets = [0, 32], sizes = [2, 32], strides = [1, 1]} : vector<2x96xf32> to vector<2x32xf32>
    %178 = vector.extract_strided_slice %175 {offsets = [0, 64], sizes = [2, 32], strides = [1, 1]} : vector<2x96xf32> to vector<2x32xf32>
    %179 = vector.extract_strided_slice %169 {offsets = [0, 96], sizes = [2, 32], strides = [1, 1]} : vector<2x128xf32> to vector<2x32xf32>
    %180 = math.tanh %179 : vector<2x32xf32>
    %181 = arith.mulf %177, %158 : vector<2x32xf32>
    %182 = arith.mulf %176, %180 : vector<2x32xf32>
    %183 = arith.addf %181, %182 : vector<2x32xf32>
    %184 = math.tanh %183 : vector<2x32xf32>
    %185 = arith.mulf %178, %184 : vector<2x32xf32>
    %186 = arith.truncf %185 : vector<2x32xf32> to vector<2x32xbf16>
    %c0_63 = arith.constant 0 : index
    %c6_64 = arith.constant 6 : index
    %c0_65 = arith.constant 0 : index
    %187 = vector.load %arg8[%c0_63, %c6_64, %c0_65] : memref<2x8x32xbf16, #tpu.memory_space<vmem>>, vector<2x1x32xbf16>
    %188 = vector.shape_cast %187 : vector<2x1x32xbf16> to vector<2x32xbf16>
    %189 = vector.shape_cast %186 : vector<2x32xbf16> to vector<2x1x32xbf16>
    tpu.vector_store %arg8[%c0_63, %c6_64, %c0_65], %189 {strides = array<i32>} : memref<2x8x32xbf16, #tpu.memory_space<vmem>>, vector<2x1x32xbf16>,
    %c0_66 = arith.constant 0 : index
    %c7 = arith.constant 7 : index
    %c0_67 = arith.constant 0 : index
    %190 = vector.load %arg11[%c0_66, %c7, %c0_67] : memref<2x8x128xf32, #tpu.memory_space<vmem>>, vector<2x1x128xf32>
    %191 = vector.shape_cast %190 : vector<2x1x128xf32> to vector<2x128xf32>
    %192 = arith.truncf %185 : vector<2x32xf32> to vector<2x32xbf16>
    %cst_68 = arith.constant dense<0.000000e+00> : vector<2x128xf32>
    %193 = tpu.matmul %192, %12, %cst_68 {dimension_numbers = #tpu.dot_dimension_numbers<[1], [0], [0], [1], [0, 0, 1, 1], [], []>} : vector<2x32xbf16>, vector<32x128xbf16>, vector<2x128xf32> -> vector<2x128xf32>
    %194 = arith.addf %191, %193 : vector<2x128xf32>
    %195 = vector.extract_strided_slice %194 {offsets = [0, 0], sizes = [2, 96], strides = [1, 1]} : vector<2x128xf32> to vector<2x96xf32>
    %196 = arith.negf %195 : vector<2x96xf32>
    %197 = math.exp %196 : vector<2x96xf32>
    %cst_69 = arith.constant 1.000000e+00 : f32
    %198 = vector.broadcast %cst_69 : f32 to vector<2x96xf32>
    %199 = arith.addf %198, %197 : vector<2x96xf32>
    %200 = arith.divf %198, %199 : vector<2x96xf32>
    %201 = vector.extract_strided_slice %200 {offsets = [0, 0], sizes = [2, 32], strides = [1, 1]} : vector<2x96xf32> to vector<2x32xf32>
    %202 = vector.extract_strided_slice %200 {offsets = [0, 32], sizes = [2, 32], strides = [1, 1]} : vector<2x96xf32> to vector<2x32xf32>
    %203 = vector.extract_strided_slice %200 {offsets = [0, 64], sizes = [2, 32], strides = [1, 1]} : vector<2x96xf32> to vector<2x32xf32>
    %204 = vector.extract_strided_slice %194 {offsets = [0, 96], sizes = [2, 32], strides = [1, 1]} : vector<2x128xf32> to vector<2x32xf32>
    %205 = math.tanh %204 : vector<2x32xf32>
    %206 = arith.mulf %202, %183 : vector<2x32xf32>
    %207 = arith.mulf %201, %205 : vector<2x32xf32>
    %208 = arith.addf %206, %207 : vector<2x32xf32>
    %209 = math.tanh %208 : vector<2x32xf32>
    %210 = arith.mulf %203, %209 : vector<2x32xf32>
    %211 = arith.truncf %210 : vector<2x32xf32> to vector<2x32xbf16>
    %c0_70 = arith.constant 0 : index
    %c7_71 = arith.constant 7 : index
    %c0_72 = arith.constant 0 : index
    %212 = vector.load %arg8[%c0_70, %c7_71, %c0_72] : memref<2x8x32xbf16, #tpu.memory_space<vmem>>, vector<2x1x32xbf16>
    %213 = vector.shape_cast %212 : vector<2x1x32xbf16> to vector<2x32xbf16>
    %214 = vector.shape_cast %211 : vector<2x32xbf16> to vector<2x1x32xbf16>
    tpu.vector_store %arg8[%c0_70, %c7_71, %c0_72], %214 {strides = array<i32>} : memref<2x8x32xbf16, #tpu.memory_space<vmem>>, vector<2x1x32xbf16>,
    %c0_73 = arith.constant 0 : index
    %c0_74 = arith.constant 0 : index
    %215 = vector.load %arg12[%c0_73, %c0_74] : memref<2x32xf32, #tpu.memory_space<vmem>>, vector<2x32xf32>
    tpu.vector_store %arg12[%c0_73, %c0_74], %210 {strides = array<i32>} : memref<2x32xf32, #tpu.memory_space<vmem>>, vector<2x32xf32>,
    %c0_75 = arith.constant 0 : index
    %c0_76 = arith.constant 0 : index
    %216 = vector.load %arg13[%c0_75, %c0_76] : memref<2x32xf32, #tpu.memory_space<vmem>>, vector<2x32xf32>
    tpu.vector_store %arg13[%c0_75, %c0_76], %208 {strides = array<i32>} : memref<2x32xf32, #tpu.memory_space<vmem>>, vector<2x32xf32>,
    %c0_i32_77 = arith.constant 0 : i32
    %217 = arith.cmpi eq, %arg1, %c0_i32_77 : i32
    %218 = arith.extui %217 : i1 to i32
    %c0_i32_78 = arith.constant 0 : i32
    %219 = arith.cmpi ne, %218, %c0_i32_78 : i32
    scf.if %219 {
      %c0_79 = arith.constant 0 : index
      %c0_80 = arith.constant 0 : index
      %220 = vector.load %arg9[%c0_79, %c0_80] : memref<2x32xf32, #tpu.memory_space<vmem>>, vector<2x32xf32>
      tpu.vector_store %arg9[%c0_79, %c0_80], %210 {strides = array<i32>} : memref<2x32xf32, #tpu.memory_space<vmem>>, vector<2x32xf32>,
      %c0_81 = arith.constant 0 : index
      %c0_82 = arith.constant 0 : index
      %221 = vector.load %arg10[%c0_81, %c0_82] : memref<2x32xf32, #tpu.memory_space<vmem>>, vector<2x32xf32>
      tpu.vector_store %arg10[%c0_81, %c0_82], %208 {strides = array<i32>} : memref<2x32xf32, #tpu.memory_space<vmem>>, vector<2x32xf32>,
    } else {
    }
    return
  }
  func.func @transform_0(%arg0: i32, %arg1: i32) -> (i32, i32, i32) {
    %c0_i32 = arith.constant 0 : i32
    %c0_i32_0 = arith.constant 0 : i32
    return %arg0, %arg1, %c0_i32 : i32, i32, i32
  }
  func.func @transform_1(%arg0: i32, %arg1: i32) -> (i32, i32) {
    %c0_i32 = arith.constant 0 : i32
    %c0_i32_0 = arith.constant 0 : i32
    %c0_i32_1 = arith.constant 0 : i32
    return %c0_i32, %c0_i32_0 : i32, i32
  }
  func.func @transform_2(%arg0: i32, %arg1: i32) -> (i32, i32) {
    %c0_i32 = arith.constant 0 : i32
    %c0_i32_0 = arith.constant 0 : i32
    %c0_i32_1 = arith.constant 0 : i32
    return %c0_i32, %c0_i32_0 : i32, i32
  }
  func.func @transform_3(%arg0: i32, %arg1: i32) -> (i32, i32) {
    %c0_i32 = arith.constant 0 : i32
    %c0_i32_0 = arith.constant 0 : i32
    %c0_i32_1 = arith.constant 0 : i32
    return %c0_i32, %c0_i32_0 : i32, i32
  }
  func.func @transform_4(%arg0: i32, %arg1: i32) -> (i32, i32) {
    %c0_i32 = arith.constant 0 : i32
    %c0_i32_0 = arith.constant 0 : i32
    return %arg0, %c0_i32 : i32, i32
  }
  func.func @transform_5(%arg0: i32, %arg1: i32) -> (i32, i32) {
    %c0_i32 = arith.constant 0 : i32
    %c0_i32_0 = arith.constant 0 : i32
    return %arg0, %c0_i32 : i32, i32
  }
  func.func @transform_6(%arg0: i32, %arg1: i32) -> (i32, i32, i32) {
    %c0_i32 = arith.constant 0 : i32
    %c0_i32_0 = arith.constant 0 : i32
    return %arg0, %arg1, %c0_i32 : i32, i32, i32
  }
  func.func @transform_7(%arg0: i32, %arg1: i32) -> (i32, i32) {
    %c0_i32 = arith.constant 0 : i32
    %c0_i32_0 = arith.constant 0 : i32
    return %arg0, %c0_i32 : i32, i32
  }
  func.func @transform_8(%arg0: i32, %arg1: i32) -> (i32, i32) {
    %c0_i32 = arith.constant 0 : i32
    %c0_i32_0 = arith.constant 0 : i32
    return %arg0, %c0_i32 : i32, i32
  }
}

module attributes {stable_mosaic.version = 11 : i64} {
  func.func @_lstm_layer_kernel(%arg0: i32, %arg1: i32, %arg2: memref<2x8x16xbf16, #tpu.memory_space<vmem>>, %arg3: memref<16x128xbf16, #tpu.memory_space<vmem>>, %arg4: memref<32x128xbf16, #tpu.memory_space<vmem>>, %arg5: memref<1x128xf32, #tpu.memory_space<vmem>>, %arg6: memref<2x32xf32, #tpu.memory_space<vmem>>, %arg7: memref<2x32xf32, #tpu.memory_space<vmem>>, %arg8: memref<2x8x32xbf16, #tpu.memory_space<vmem>>, %arg9: memref<2x32xf32, #tpu.memory_space<vmem>>, %arg10: memref<2x32xf32, #tpu.memory_space<vmem>>, %arg11: memref<2x8x128xf32, #tpu.memory_space<vmem>>, %arg12: memref<2x32xf32, #tpu.memory_space<vmem>>, %arg13: memref<2x32xf32, #tpu.memory_space<vmem>>) attributes {dimension_semantics = [#tpu.dimension_semantics<parallel>, #tpu.dimension_semantics<arbitrary>], iteration_bounds = array<i64: 1, 1>, scalar_prefetch = 0 : i64, scratch_operands = 3 : i64, tpu.core_type = #tpu.core_type<tc>, window_params = [{transform_indices = @transform_0, window_bounds = array<i64: 2, 8, 16>}, {pipeline_mode = #tpu.pipeline_mode<synchronous>, transform_indices = @transform_1, window_bounds = array<i64: 16, 128>}, {pipeline_mode = #tpu.pipeline_mode<synchronous>, transform_indices = @transform_2, window_bounds = array<i64: 32, 128>}, {pipeline_mode = #tpu.pipeline_mode<synchronous>, transform_indices = @transform_3, window_bounds = array<i64: 1, 128>}, {transform_indices = @transform_4, window_bounds = array<i64: 2, 32>}, {transform_indices = @transform_5, window_bounds = array<i64: 2, 32>}, {transform_indices = @transform_6, window_bounds = array<i64: 2, 8, 32>}, {transform_indices = @transform_7, window_bounds = array<i64: 2, 32>}, {transform_indices = @transform_8, window_bounds = array<i64: 2, 32>}]} {
    %c0_i32 = arith.constant 0 : i32
    %0 = arith.cmpi eq, %arg1, %c0_i32 : i32
    %1 = arith.extui %0 : i1 to i32
    %c0_i32_0 = arith.constant 0 : i32
    %2 = arith.cmpi ne, %1, %c0_i32_0 : i32
    scf.if %2 {
      %c0_79 = arith.constant 0 : index
      %c0_80 = arith.constant 0 : index
      %220 = vector.load %arg6[%c0_79, %c0_80] : memref<2x32xf32, #tpu.memory_space<vmem>>, vector<2x32xf32>
      %c0_81 = arith.constant 0 : index
      %c0_82 = arith.constant 0 : index
      %221 = vector.load %arg12[%c0_81, %c0_82] : memref<2x32xf32, #tpu.memory_space<vmem>>, vector<2x32xf32>
      tpu.vector_store %arg12[%c0_81, %c0_82], %220 {strides = array<i32>} : memref<2x32xf32, #tpu.memory_space<vmem>>, vector<2x32xf32>,
      %c0_83 = arith.constant 0 : index
      %c0_84 = arith.constant 0 : index
      %222 = vector.load %arg7[%c0_83, %c0_84] : memref<2x32xf32, #tpu.memory_space<vmem>>, vector<2x32xf32>
      %c0_85 = arith.constant 0 : index
      %c0_86 = arith.constant 0 : index
      %223 = vector.load %arg13[%c0_85, %c0_86] : memref<2x32xf32, #tpu.memory_space<vmem>>, vector<2x32xf32>
      tpu.vector_store %arg13[%c0_85, %c0_86], %222 {strides = array<i32>} : memref<2x32xf32, #tpu.memory_space<vmem>>, vector<2x32xf32>,
    } else {
    }
    %c0 = arith.constant 0 : index
    %c0_1 = arith.constant 0 : index
    %c0_2 = arith.constant 0 : index
    %3 = vector.load %arg2[%c0, %c0_1, %c0_2] : memref<2x8x16xbf16, #tpu.memory_space<vmem>>, vector<2x8x16xbf16>
    %4 = vector.shape_cast %3 : vector<2x8x16xbf16> to vector<16x16xbf16>
    %c0_3 = arith.constant 0 : index
    %c0_4 = arith.constant 0 : index
    %5 = vector.load %arg3[%c0_3, %c0_4] : memref<16x128xbf16, #tpu.memory_space<vmem>>, vector<16x128xbf16>
    %cst = arith.constant dense<0.000000e+00> : vector<16x128xf32>
    %6 = tpu.matmul %4, %5, %cst {dimension_numbers = #tpu.dot_dimension_numbers<[1], [0], [0], [1], [0, 0, 1, 1], [], []>} : vector<16x16xbf16>, vector<16x128xbf16>, vector<16x128xf32> -> vector<16x128xf32>
    %c0_5 = arith.constant 0 : index
    %c0_6 = arith.constant 0 : index
    %7 = vector.load %arg5[%c0_5, %c0_6] : memref<1x128xf32, #tpu.memory_space<vmem>>, vector<1x128xf32>
    %8 = vector.broadcast %7 : vector<1x128xf32> to vector<16x128xf32>
    %9 = arith.addf %6, %8 : vector<16x128xf32>
    %10 = vector.shape_cast %9 : vector<16x128xf32> to vector<2x8x128xf32>
    %c0_7 = arith.constant 0 : index
    %c0_8 = arith.constant 0 : index
    %c0_9 = arith.constant 0 : index
    %11 = vector.load %arg11[%c0_7, %c0_8, %c0_9] : memref<2x8x128xf32, #tpu.memory_space<vmem>>, vector<2x8x128xf32>
    tpu.vector_store %arg11[%c0_7, %c0_8, %c0_9], %10 {strides = array<i32>} : memref<2x8x128xf32, #tpu.memory_space<vmem>>, vector<2x8x128xf32>,
    %c0_10 = arith.constant 0 : index
    %c0_11 = arith.constant 0 : index
    %12 = vector.load %arg4[%c0_10, %c0_11] : memref<32x128xbf16, #tpu.memory_space<vmem>>, vector<32x128xbf16>
    %c0_12 = arith.constant 0 : index
    %c0_13 = arith.constant 0 : index
    %13 = vector.load %arg12[%c0_12, %c0_13] : memref<2x32xf32, #tpu.memory_space<vmem>>, vector<2x32xf32>
    %c0_14 = arith.constant 0 : index
    %c0_15 = arith.constant 0 : index
    %14 = vector.load %arg13[%c0_14, %c0_15] : memref<2x32xf32, #tpu.memory_space<vmem>>, vector<2x32xf32>
    %c0_16 = arith.constant 0 : index
    %c0_17 = arith.constant 0 : index
    %c0_18 = arith.constant 0 : index
    %15 = vector.load %arg11[%c0_16, %c0_17, %c0_18] : memref<2x8x128xf32, #tpu.memory_space<vmem>>, vector<2x1x128xf32>
    %16 = vector.shape_cast %15 : vector<2x1x128xf32> to vector<2x128xf32>
    %17 = arith.truncf %13 : vector<2x32xf32> to vector<2x32xbf16>
    %cst_19 = arith.constant dense<0.000000e+00> : vector<2x128xf32>
    %18 = tpu.matmul %17, %12, %cst_19 {dimension_numbers = #tpu.dot_dimension_numbers<[1], [0], [0], [1], [0, 0, 1, 1], [], []>} : vector<2x32xbf16>, vector<32x128xbf16>, vector<2x128xf32> -> vector<2x128xf32>
    %19 = arith.addf %16, %18 : vector<2x128xf32>
    %20 = vector.extract_strided_slice %19 {offsets = [0, 0], sizes = [2, 96], strides = [1, 1]} : vector<2x128xf32> to vector<2x96xf32>
    %21 = arith.negf %20 : vector<2x96xf32>
    %22 = math.exp %21 : vector<2x96xf32>
    %cst_20 = arith.constant 1.000000e+00 : f32
    %23 = vector.broadcast %cst_20 : f32 to vector<2x96xf32>
    %24 = arith.addf %23, %22 : vector<2x96xf32>
    %25 = arith.divf %23, %24 : vector<2x96xf32>
    %26 = vector.extract_strided_slice %25 {offsets = [0, 0], sizes = [2, 32], strides = [1, 1]} : vector<2x96xf32> to vector<2x32xf32>
    %27 = vector.extract_strided_slice %25 {offsets = [0, 32], sizes = [2, 32], strides = [1, 1]} : vector<2x96xf32> to vector<2x32xf32>
    %28 = vector.extract_strided_slice %25 {offsets = [0, 64], sizes = [2, 32], strides = [1, 1]} : vector<2x96xf32> to vector<2x32xf32>
    %29 = vector.extract_strided_slice %19 {offsets = [0, 96], sizes = [2, 32], strides = [1, 1]} : vector<2x128xf32> to vector<2x32xf32>
    %30 = math.tanh %29 : vector<2x32xf32>
    %31 = arith.mulf %27, %14 : vector<2x32xf32>
    %32 = arith.mulf %26, %30 : vector<2x32xf32>
    %33 = arith.addf %31, %32 : vector<2x32xf32>
    %34 = math.tanh %33 : vector<2x32xf32>
    %35 = arith.mulf %28, %34 : vector<2x32xf32>
    %36 = arith.truncf %35 : vector<2x32xf32> to vector<2x32xbf16>
    %c0_21 = arith.constant 0 : index
    %c0_22 = arith.constant 0 : index
    %c0_23 = arith.constant 0 : index
    %37 = vector.load %arg8[%c0_21, %c0_22, %c0_23] : memref<2x8x32xbf16, #tpu.memory_space<vmem>>, vector<2x1x32xbf16>
    %38 = vector.shape_cast %37 : vector<2x1x32xbf16> to vector<2x32xbf16>
    %39 = vector.shape_cast %36 : vector<2x32xbf16> to vector<2x1x32xbf16>
    tpu.vector_store %arg8[%c0_21, %c0_22, %c0_23], %39 {strides = array<i32>} : memref<2x8x32xbf16, #tpu.memory_space<vmem>>, vector<2x1x32xbf16>,
    %c0_24 = arith.constant 0 : index
    %c1 = arith.constant 1 : index
    %c0_25 = arith.constant 0 : index
    %40 = vector.load %arg11[%c0_24, %c1, %c0_25] : memref<2x8x128xf32, #tpu.memory_space<vmem>>, vector<2x1x128xf32>
    %41 = vector.shape_cast %40 : vector<2x1x128xf32> to vector<2x128xf32>
    %42 = arith.truncf %35 : vector<2x32xf32> to vector<2x32xbf16>
    %cst_26 = arith.constant dense<0.000000e+00> : vector<2x128xf32>
    %43 = tpu.matmul %42, %12, %cst_26 {dimension_numbers = #tpu.dot_dimension_numbers<[1], [0], [0], [1], [0, 0, 1, 1], [], []>} : vector<2x32xbf16>, vector<32x128xbf16>, vector<2x128xf32> -> vector<2x128xf32>
    %44 = arith.addf %41, %43 : vector<2x128xf32>
    %45 = vector.extract_strided_slice %44 {offsets = [0, 0], sizes = [2, 96], strides = [1, 1]} : vector<2x128xf32> to vector<2x96xf32>
    %46 = arith.negf %45 : vector<2x96xf32>
    %47 = math.exp %46 : vector<2x96xf32>
    %cst_27 = arith.constant 1.000000e+00 : f32
    %48 = vector.broadcast %cst_27 : f32 to vector<2x96xf32>
    %49 = arith.addf %48, %47 : vector<2x96xf32>
    %50 = arith.divf %48, %49 : vector<2x96xf32>
    %51 = vector.extract_strided_slice %50 {offsets = [0, 0], sizes = [2, 32], strides = [1, 1]} : vector<2x96xf32> to vector<2x32xf32>
    %52 = vector.extract_strided_slice %50 {offsets = [0, 32], sizes = [2, 32], strides = [1, 1]} : vector<2x96xf32> to vector<2x32xf32>
    %53 = vector.extract_strided_slice %50 {offsets = [0, 64], sizes = [2, 32], strides = [1, 1]} : vector<2x96xf32> to vector<2x32xf32>
    %54 = vector.extract_strided_slice %44 {offsets = [0, 96], sizes = [2, 32], strides = [1, 1]} : vector<2x128xf32> to vector<2x32xf32>
    %55 = math.tanh %54 : vector<2x32xf32>
    %56 = arith.mulf %52, %33 : vector<2x32xf32>
    %57 = arith.mulf %51, %55 : vector<2x32xf32>
    %58 = arith.addf %56, %57 : vector<2x32xf32>
    %59 = math.tanh %58 : vector<2x32xf32>
    %60 = arith.mulf %53, %59 : vector<2x32xf32>
    %61 = arith.truncf %60 : vector<2x32xf32> to vector<2x32xbf16>
    %c0_28 = arith.constant 0 : index
    %c1_29 = arith.constant 1 : index
    %c0_30 = arith.constant 0 : index
    %62 = vector.load %arg8[%c0_28, %c1_29, %c0_30] : memref<2x8x32xbf16, #tpu.memory_space<vmem>>, vector<2x1x32xbf16>
    %63 = vector.shape_cast %62 : vector<2x1x32xbf16> to vector<2x32xbf16>
    %64 = vector.shape_cast %61 : vector<2x32xbf16> to vector<2x1x32xbf16>
    tpu.vector_store %arg8[%c0_28, %c1_29, %c0_30], %64 {strides = array<i32>} : memref<2x8x32xbf16, #tpu.memory_space<vmem>>, vector<2x1x32xbf16>,
    %c0_31 = arith.constant 0 : index
    %c2 = arith.constant 2 : index
    %c0_32 = arith.constant 0 : index
    %65 = vector.load %arg11[%c0_31, %c2, %c0_32] : memref<2x8x128xf32, #tpu.memory_space<vmem>>, vector<2x1x128xf32>
    %66 = vector.shape_cast %65 : vector<2x1x128xf32> to vector<2x128xf32>
    %67 = arith.truncf %60 : vector<2x32xf32> to vector<2x32xbf16>
    %cst_33 = arith.constant dense<0.000000e+00> : vector<2x128xf32>
    %68 = tpu.matmul %67, %12, %cst_33 {dimension_numbers = #tpu.dot_dimension_numbers<[1], [0], [0], [1], [0, 0, 1, 1], [], []>} : vector<2x32xbf16>, vector<32x128xbf16>, vector<2x128xf32> -> vector<2x128xf32>
    %69 = arith.addf %66, %68 : vector<2x128xf32>
    %70 = vector.extract_strided_slice %69 {offsets = [0, 0], sizes = [2, 96], strides = [1, 1]} : vector<2x128xf32> to vector<2x96xf32>
    %71 = arith.negf %70 : vector<2x96xf32>
    %72 = math.exp %71 : vector<2x96xf32>
    %cst_34 = arith.constant 1.000000e+00 : f32
    %73 = vector.broadcast %cst_34 : f32 to vector<2x96xf32>
    %74 = arith.addf %73, %72 : vector<2x96xf32>
    %75 = arith.divf %73, %74 : vector<2x96xf32>
    %76 = vector.extract_strided_slice %75 {offsets = [0, 0], sizes = [2, 32], strides = [1, 1]} : vector<2x96xf32> to vector<2x32xf32>
    %77 = vector.extract_strided_slice %75 {offsets = [0, 32], sizes = [2, 32], strides = [1, 1]} : vector<2x96xf32> to vector<2x32xf32>
    %78 = vector.extract_strided_slice %75 {offsets = [0, 64], sizes = [2, 32], strides = [1, 1]} : vector<2x96xf32> to vector<2x32xf32>
    %79 = vector.extract_strided_slice %69 {offsets = [0, 96], sizes = [2, 32], strides = [1, 1]} : vector<2x128xf32> to vector<2x32xf32>
    %80 = math.tanh %79 : vector<2x32xf32>
    %81 = arith.mulf %77, %58 : vector<2x32xf32>
    %82 = arith.mulf %76, %80 : vector<2x32xf32>
    %83 = arith.addf %81, %82 : vector<2x32xf32>
    %84 = math.tanh %83 : vector<2x32xf32>
    %85 = arith.mulf %78, %84 : vector<2x32xf32>
    %86 = arith.truncf %85 : vector<2x32xf32> to vector<2x32xbf16>
    %c0_35 = arith.constant 0 : index
    %c2_36 = arith.constant 2 : index
    %c0_37 = arith.constant 0 : index
    %87 = vector.load %arg8[%c0_35, %c2_36, %c0_37] : memref<2x8x32xbf16, #tpu.memory_space<vmem>>, vector<2x1x32xbf16>
    %88 = vector.shape_cast %87 : vector<2x1x32xbf16> to vector<2x32xbf16>
    %89 = vector.shape_cast %86 : vector<2x32xbf16> to vector<2x1x32xbf16>
    tpu.vector_store %arg8[%c0_35, %c2_36, %c0_37], %89 {strides = array<i32>} : memref<2x8x32xbf16, #tpu.memory_space<vmem>>, vector<2x1x32xbf16>,
    %c0_38 = arith.constant 0 : index
    %c3 = arith.constant 3 : index
    %c0_39 = arith.constant 0 : index
    %90 = vector.load %arg11[%c0_38, %c3, %c0_39] : memref<2x8x128xf32, #tpu.memory_space<vmem>>, vector<2x1x128xf32>
    %91 = vector.shape_cast %90 : vector<2x1x128xf32> to vector<2x128xf32>
    %92 = arith.truncf %85 : vector<2x32xf32> to vector<2x32xbf16>
    %cst_40 = arith.constant dense<0.000000e+00> : vector<2x128xf32>
    %93 = tpu.matmul %92, %12, %cst_40 {dimension_numbers = #tpu.dot_dimension_numbers<[1], [0], [0], [1], [0, 0, 1, 1], [], []>} : vector<2x32xbf16>, vector<32x128xbf16>, vector<2x128xf32> -> vector<2x128xf32>
    %94 = arith.addf %91, %93 : vector<2x128xf32>
    %95 = vector.extract_strided_slice %94 {offsets = [0, 0], sizes = [2, 96], strides = [1, 1]} : vector<2x128xf32> to vector<2x96xf32>
    %96 = arith.negf %95 : vector<2x96xf32>
    %97 = math.exp %96 : vector<2x96xf32>
    %cst_41 = arith.constant 1.000000e+00 : f32
    %98 = vector.broadcast %cst_41 : f32 to vector<2x96xf32>
    %99 = arith.addf %98, %97 : vector<2x96xf32>
    %100 = arith.divf %98, %99 : vector<2x96xf32>
    %101 = vector.extract_strided_slice %100 {offsets = [0, 0], sizes = [2, 32], strides = [1, 1]} : vector<2x96xf32> to vector<2x32xf32>
    %102 = vector.extract_strided_slice %100 {offsets = [0, 32], sizes = [2, 32], strides = [1, 1]} : vector<2x96xf32> to vector<2x32xf32>
    %103 = vector.extract_strided_slice %100 {offsets = [0, 64], sizes = [2, 32], strides = [1, 1]} : vector<2x96xf32> to vector<2x32xf32>
    %104 = vector.extract_strided_slice %94 {offsets = [0, 96], sizes = [2, 32], strides = [1, 1]} : vector<2x128xf32> to vector<2x32xf32>
    %105 = math.tanh %104 : vector<2x32xf32>
    %106 = arith.mulf %102, %83 : vector<2x32xf32>
    %107 = arith.mulf %101, %105 : vector<2x32xf32>
    %108 = arith.addf %106, %107 : vector<2x32xf32>
    %109 = math.tanh %108 : vector<2x32xf32>
    %110 = arith.mulf %103, %109 : vector<2x32xf32>
    %111 = arith.truncf %110 : vector<2x32xf32> to vector<2x32xbf16>
    %c0_42 = arith.constant 0 : index
    %c3_43 = arith.constant 3 : index
    %c0_44 = arith.constant 0 : index
    %112 = vector.load %arg8[%c0_42, %c3_43, %c0_44] : memref<2x8x32xbf16, #tpu.memory_space<vmem>>, vector<2x1x32xbf16>
    %113 = vector.shape_cast %112 : vector<2x1x32xbf16> to vector<2x32xbf16>
    %114 = vector.shape_cast %111 : vector<2x32xbf16> to vector<2x1x32xbf16>
    tpu.vector_store %arg8[%c0_42, %c3_43, %c0_44], %114 {strides = array<i32>} : memref<2x8x32xbf16, #tpu.memory_space<vmem>>, vector<2x1x32xbf16>,
    %c0_45 = arith.constant 0 : index
    %c4 = arith.constant 4 : index
    %c0_46 = arith.constant 0 : index
    %115 = vector.load %arg11[%c0_45, %c4, %c0_46] : memref<2x8x128xf32, #tpu.memory_space<vmem>>, vector<2x1x128xf32>
    %116 = vector.shape_cast %115 : vector<2x1x128xf32> to vector<2x128xf32>
    %117 = arith.truncf %110 : vector<2x32xf32> to vector<2x32xbf16>
    %cst_47 = arith.constant dense<0.000000e+00> : vector<2x128xf32>
    %118 = tpu.matmul %117, %12, %cst_47 {dimension_numbers = #tpu.dot_dimension_numbers<[1], [0], [0], [1], [0, 0, 1, 1], [], []>} : vector<2x32xbf16>, vector<32x128xbf16>, vector<2x128xf32> -> vector<2x128xf32>
    %119 = arith.addf %116, %118 : vector<2x128xf32>
    %120 = vector.extract_strided_slice %119 {offsets = [0, 0], sizes = [2, 96], strides = [1, 1]} : vector<2x128xf32> to vector<2x96xf32>
    %121 = arith.negf %120 : vector<2x96xf32>
    %122 = math.exp %121 : vector<2x96xf32>
    %cst_48 = arith.constant 1.000000e+00 : f32
    %123 = vector.broadcast %cst_48 : f32 to vector<2x96xf32>
    %124 = arith.addf %123, %122 : vector<2x96xf32>
    %125 = arith.divf %123, %124 : vector<2x96xf32>
    %126 = vector.extract_strided_slice %125 {offsets = [0, 0], sizes = [2, 32], strides = [1, 1]} : vector<2x96xf32> to vector<2x32xf32>
    %127 = vector.extract_strided_slice %125 {offsets = [0, 32], sizes = [2, 32], strides = [1, 1]} : vector<2x96xf32> to vector<2x32xf32>
    %128 = vector.extract_strided_slice %125 {offsets = [0, 64], sizes = [2, 32], strides = [1, 1]} : vector<2x96xf32> to vector<2x32xf32>
    %129 = vector.extract_strided_slice %119 {offsets = [0, 96], sizes = [2, 32], strides = [1, 1]} : vector<2x128xf32> to vector<2x32xf32>
    %130 = math.tanh %129 : vector<2x32xf32>
    %131 = arith.mulf %127, %108 : vector<2x32xf32>
    %132 = arith.mulf %126, %130 : vector<2x32xf32>
    %133 = arith.addf %131, %132 : vector<2x32xf32>
    %134 = math.tanh %133 : vector<2x32xf32>
    %135 = arith.mulf %128, %134 : vector<2x32xf32>
    %136 = arith.truncf %135 : vector<2x32xf32> to vector<2x32xbf16>
    %c0_49 = arith.constant 0 : index
    %c4_50 = arith.constant 4 : index
    %c0_51 = arith.constant 0 : index
    %137 = vector.load %arg8[%c0_49, %c4_50, %c0_51] : memref<2x8x32xbf16, #tpu.memory_space<vmem>>, vector<2x1x32xbf16>
    %138 = vector.shape_cast %137 : vector<2x1x32xbf16> to vector<2x32xbf16>
    %139 = vector.shape_cast %136 : vector<2x32xbf16> to vector<2x1x32xbf16>
    tpu.vector_store %arg8[%c0_49, %c4_50, %c0_51], %139 {strides = array<i32>} : memref<2x8x32xbf16, #tpu.memory_space<vmem>>, vector<2x1x32xbf16>,
    %c0_52 = arith.constant 0 : index
    %c5 = arith.constant 5 : index
    %c0_53 = arith.constant 0 : index
    %140 = vector.load %arg11[%c0_52, %c5, %c0_53] : memref<2x8x128xf32, #tpu.memory_space<vmem>>, vector<2x1x128xf32>
    %141 = vector.shape_cast %140 : vector<2x1x128xf32> to vector<2x128xf32>
    %142 = arith.truncf %135 : vector<2x32xf32> to vector<2x32xbf16>
    %cst_54 = arith.constant dense<0.000000e+00> : vector<2x128xf32>
    %143 = tpu.matmul %142, %12, %cst_54 {dimension_numbers = #tpu.dot_dimension_numbers<[1], [0], [0], [1], [0, 0, 1, 1], [], []>} : vector<2x32xbf16>, vector<32x128xbf16>, vector<2x128xf32> -> vector<2x128xf32>
    %144 = arith.addf %141, %143 : vector<2x128xf32>
    %145 = vector.extract_strided_slice %144 {offsets = [0, 0], sizes = [2, 96], strides = [1, 1]} : vector<2x128xf32> to vector<2x96xf32>
    %146 = arith.negf %145 : vector<2x96xf32>
    %147 = math.exp %146 : vector<2x96xf32>
    %cst_55 = arith.constant 1.000000e+00 : f32
    %148 = vector.broadcast %cst_55 : f32 to vector<2x96xf32>
    %149 = arith.addf %148, %147 : vector<2x96xf32>
    %150 = arith.divf %148, %149 : vector<2x96xf32>
    %151 = vector.extract_strided_slice %150 {offsets = [0, 0], sizes = [2, 32], strides = [1, 1]} : vector<2x96xf32> to vector<2x32xf32>
    %152 = vector.extract_strided_slice %150 {offsets = [0, 32], sizes = [2, 32], strides = [1, 1]} : vector<2x96xf32> to vector<2x32xf32>
    %153 = vector.extract_strided_slice %150 {offsets = [0, 64], sizes = [2, 32], strides = [1, 1]} : vector<2x96xf32> to vector<2x32xf32>
    %154 = vector.extract_strided_slice %144 {offsets = [0, 96], sizes = [2, 32], strides = [1, 1]} : vector<2x128xf32> to vector<2x32xf32>
    %155 = math.tanh %154 : vector<2x32xf32>
    %156 = arith.mulf %152, %133 : vector<2x32xf32>
    %157 = arith.mulf %151, %155 : vector<2x32xf32>
    %158 = arith.addf %156, %157 : vector<2x32xf32>
    %159 = math.tanh %158 : vector<2x32xf32>
    %160 = arith.mulf %153, %159 : vector<2x32xf32>
    %161 = arith.truncf %160 : vector<2x32xf32> to vector<2x32xbf16>
    %c0_56 = arith.constant 0 : index
    %c5_57 = arith.constant 5 : index
    %c0_58 = arith.constant 0 : index
    %162 = vector.load %arg8[%c0_56, %c5_57, %c0_58] : memref<2x8x32xbf16, #tpu.memory_space<vmem>>, vector<2x1x32xbf16>
    %163 = vector.shape_cast %162 : vector<2x1x32xbf16> to vector<2x32xbf16>
    %164 = vector.shape_cast %161 : vector<2x32xbf16> to vector<2x1x32xbf16>
    tpu.vector_store %arg8[%c0_56, %c5_57, %c0_58], %164 {strides = array<i32>} : memref<2x8x32xbf16, #tpu.memory_space<vmem>>, vector<2x1x32xbf16>,
    %c0_59 = arith.constant 0 : index
    %c6 = arith.constant 6 : index
    %c0_60 = arith.constant 0 : index
    %165 = vector.load %arg11[%c0_59, %c6, %c0_60] : memref<2x8x128xf32, #tpu.memory_space<vmem>>, vector<2x1x128xf32>
    %166 = vector.shape_cast %165 : vector<2x1x128xf32> to vector<2x128xf32>
    %167 = arith.truncf %160 : vector<2x32xf32> to vector<2x32xbf16>
    %cst_61 = arith.constant dense<0.000000e+00> : vector<2x128xf32>
    %168 = tpu.matmul %167, %12, %cst_61 {dimension_numbers = #tpu.dot_dimension_numbers<[1], [0], [0], [1], [0, 0, 1, 1], [], []>} : vector<2x32xbf16>, vector<32x128xbf16>, vector<2x128xf32> -> vector<2x128xf32>
    %169 = arith.addf %166, %168 : vector<2x128xf32>
    %170 = vector.extract_strided_slice %169 {offsets = [0, 0], sizes = [2, 96], strides = [1, 1]} : vector<2x128xf32> to vector<2x96xf32>
    %171 = arith.negf %170 : vector<2x96xf32>
    %172 = math.exp %171 : vector<2x96xf32>
    %cst_62 = arith.constant 1.000000e+00 : f32
    %173 = vector.broadcast %cst_62 : f32 to vector<2x96xf32>
    %174 = arith.addf %173, %172 : vector<2x96xf32>
    %175 = arith.divf %173, %174 : vector<2x96xf32>
    %176 = vector.extract_strided_slice %175 {offsets = [0, 0], sizes = [2, 32], strides = [1, 1]} : vector<2x96xf32> to vector<2x32xf32>
    %177 = vector.extract_strided_slice %175 {offsets = [0, 32], sizes = [2, 32], strides = [1, 1]} : vector<2x96xf32> to vector<2x32xf32>
    %178 = vector.extract_strided_slice %175 {offsets = [0, 64], sizes = [2, 32], strides = [1, 1]} : vector<2x96xf32> to vector<2x32xf32>
    %179 = vector.extract_strided_slice %169 {offsets = [0, 96], sizes = [2, 32], strides = [1, 1]} : vector<2x128xf32> to vector<2x32xf32>
    %180 = math.tanh %179 : vector<2x32xf32>
    %181 = arith.mulf %177, %158 : vector<2x32xf32>
    %182 = arith.mulf %176, %180 : vector<2x32xf32>
    %183 = arith.addf %181, %182 : vector<2x32xf32>
    %184 = math.tanh %183 : vector<2x32xf32>
    %185 = arith.mulf %178, %184 : vector<2x32xf32>
    %186 = arith.truncf %185 : vector<2x32xf32> to vector<2x32xbf16>
    %c0_63 = arith.constant 0 : index
    %c6_64 = arith.constant 6 : index
    %c0_65 = arith.constant 0 : index
    %187 = vector.load %arg8[%c0_63, %c6_64, %c0_65] : memref<2x8x32xbf16, #tpu.memory_space<vmem>>, vector<2x1x32xbf16>
    %188 = vector.shape_cast %187 : vector<2x1x32xbf16> to vector<2x32xbf16>
    %189 = vector.shape_cast %186 : vector<2x32xbf16> to vector<2x1x32xbf16>
    tpu.vector_store %arg8[%c0_63, %c6_64, %c0_65], %189 {strides = array<i32>} : memref<2x8x32xbf16, #tpu.memory_space<vmem>>, vector<2x1x32xbf16>,
    %c0_66 = arith.constant 0 : index
    %c7 = arith.constant 7 : index
    %c0_67 = arith.constant 0 : index
    %190 = vector.load %arg11[%c0_66, %c7, %c0_67] : memref<2x8x128xf32, #tpu.memory_space<vmem>>, vector<2x1x128xf32>
    %191 = vector.shape_cast %190 : vector<2x1x128xf32> to vector<2x128xf32>
    %192 = arith.truncf %185 : vector<2x32xf32> to vector<2x32xbf16>
    %cst_68 = arith.constant dense<0.000000e+00> : vector<2x128xf32>
    %193 = tpu.matmul %192, %12, %cst_68 {dimension_numbers = #tpu.dot_dimension_numbers<[1], [0], [0], [1], [0, 0, 1, 1], [], []>} : vector<2x32xbf16>, vector<32x128xbf16>, vector<2x128xf32> -> vector<2x128xf32>
    %194 = arith.addf %191, %193 : vector<2x128xf32>
    %195 = vector.extract_strided_slice %194 {offsets = [0, 0], sizes = [2, 96], strides = [1, 1]} : vector<2x128xf32> to vector<2x96xf32>
    %196 = arith.negf %195 : vector<2x96xf32>
    %197 = math.exp %196 : vector<2x96xf32>
    %cst_69 = arith.constant 1.000000e+00 : f32
    %198 = vector.broadcast %cst_69 : f32 to vector<2x96xf32>
    %199 = arith.addf %198, %197 : vector<2x96xf32>
    %200 = arith.divf %198, %199 : vector<2x96xf32>
    %201 = vector.extract_strided_slice %200 {offsets = [0, 0], sizes = [2, 32], strides = [1, 1]} : vector<2x96xf32> to vector<2x32xf32>
    %202 = vector.extract_strided_slice %200 {offsets = [0, 32], sizes = [2, 32], strides = [1, 1]} : vector<2x96xf32> to vector<2x32xf32>
    %203 = vector.extract_strided_slice %200 {offsets = [0, 64], sizes = [2, 32], strides = [1, 1]} : vector<2x96xf32> to vector<2x32xf32>
    %204 = vector.extract_strided_slice %194 {offsets = [0, 96], sizes = [2, 32], strides = [1, 1]} : vector<2x128xf32> to vector<2x32xf32>
    %205 = math.tanh %204 : vector<2x32xf32>
    %206 = arith.mulf %202, %183 : vector<2x32xf32>
    %207 = arith.mulf %201, %205 : vector<2x32xf32>
    %208 = arith.addf %206, %207 : vector<2x32xf32>
    %209 = math.tanh %208 : vector<2x32xf32>
    %210 = arith.mulf %203, %209 : vector<2x32xf32>
    %211 = arith.truncf %210 : vector<2x32xf32> to vector<2x32xbf16>
    %c0_70 = arith.constant 0 : index
    %c7_71 = arith.constant 7 : index
    %c0_72 = arith.constant 0 : index
    %212 = vector.load %arg8[%c0_70, %c7_71, %c0_72] : memref<2x8x32xbf16, #tpu.memory_space<vmem>>, vector<2x1x32xbf16>
    %213 = vector.shape_cast %212 : vector<2x1x32xbf16> to vector<2x32xbf16>
    %214 = vector.shape_cast %211 : vector<2x32xbf16> to vector<2x1x32xbf16>
    tpu.vector_store %arg8[%c0_70, %c7_71, %c0_72], %214 {strides = array<i32>} : memref<2x8x32xbf16, #tpu.memory_space<vmem>>, vector<2x1x32xbf16>,
    %c0_73 = arith.constant 0 : index
    %c0_74 = arith.constant 0 : index
    %215 = vector.load %arg12[%c0_73, %c0_74] : memref<2x32xf32, #tpu.memory_space<vmem>>, vector<2x32xf32>
    tpu.vector_store %arg12[%c0_73, %c0_74], %210 {strides = array<i32>} : memref<2x32xf32, #tpu.memory_space<vmem>>, vector<2x32xf32>,
    %c0_75 = arith.constant 0 : index
    %c0_76 = arith.constant 0 : index
    %216 = vector.load %arg13[%c0_75, %c0_76] : memref<2x32xf32, #tpu.memory_space<vmem>>, vector<2x32xf32>
    tpu.vector_store %arg13[%c0_75, %c0_76], %208 {strides = array<i32>} : memref<2x32xf32, #tpu.memory_space<vmem>>, vector<2x32xf32>,
    %c0_i32_77 = arith.constant 0 : i32
    %217 = arith.cmpi eq, %arg1, %c0_i32_77 : i32
    %218 = arith.extui %217 : i1 to i32
    %c0_i32_78 = arith.constant 0 : i32
    %219 = arith.cmpi ne, %218, %c0_i32_78 : i32
    scf.if %219 {
      %c0_79 = arith.constant 0 : index
      %c0_80 = arith.constant 0 : index
      %220 = vector.load %arg9[%c0_79, %c0_80] : memref<2x32xf32, #tpu.memory_space<vmem>>, vector<2x32xf32>
      tpu.vector_store %arg9[%c0_79, %c0_80], %210 {strides = array<i32>} : memref<2x32xf32, #tpu.memory_space<vmem>>, vector<2x32xf32>,
      %c0_81 = arith.constant 0 : index
      %c0_82 = arith.constant 0 : index
      %221 = vector.load %arg10[%c0_81, %c0_82] : memref<2x32xf32, #tpu.memory_space<vmem>>, vector<2x32xf32>
      tpu.vector_store %arg10[%c0_81, %c0_82], %208 {strides = array<i32>} : memref<2x32xf32, #tpu.memory_space<vmem>>, vector<2x32xf32>,
    } else {
    }
    return
  }
  func.func @transform_0(%arg0: i32, %arg1: i32) -> (i32, i32, i32) {
    %c0_i32 = arith.constant 0 : i32
    %c0_i32_0 = arith.constant 0 : i32
    return %arg0, %arg1, %c0_i32 : i32, i32, i32
  }
  func.func @transform_1(%arg0: i32, %arg1: i32) -> (i32, i32) {
    %c0_i32 = arith.constant 0 : i32
    %c0_i32_0 = arith.constant 0 : i32
    %c0_i32_1 = arith.constant 0 : i32
    return %c0_i32, %c0_i32_0 : i32, i32
  }
  func.func @transform_2(%arg0: i32, %arg1: i32) -> (i32, i32) {
    %c0_i32 = arith.constant 0 : i32
    %c0_i32_0 = arith.constant 0 : i32
    %c0_i32_1 = arith.constant 0 : i32
    return %c0_i32, %c0_i32_0 : i32, i32
  }
  func.func @transform_3(%arg0: i32, %arg1: i32) -> (i32, i32) {
    %c0_i32 = arith.constant 0 : i32
    %c0_i32_0 = arith.constant 0 : i32
    %c0_i32_1 = arith.constant 0 : i32
    return %c0_i32, %c0_i32_0 : i32, i32
  }
  func.func @transform_4(%arg0: i32, %arg1: i32) -> (i32, i32) {
    %c0_i32 = arith.constant 0 : i32
    %c0_i32_0 = arith.constant 0 : i32
    return %arg0, %c0_i32 : i32, i32
  }
  func.func @transform_5(%arg0: i32, %arg1: i32) -> (i32, i32) {
    %c0_i32 = arith.constant 0 : i32
    %c0_i32_0 = arith.constant 0 : i32
    return %arg0, %c0_i32 : i32, i32
  }
  func.func @transform_6(%arg0: i32, %arg1: i32) -> (i32, i32, i32) {
    %c0_i32 = arith.constant 0 : i32
    %c0_i32_0 = arith.constant 0 : i32
    return %arg0, %arg1, %c0_i32 : i32, i32, i32
  }
  func.func @transform_7(%arg0: i32, %arg1: i32) -> (i32, i32) {
    %c0_i32 = arith.constant 0 : i32
    %c0_i32_0 = arith.constant 0 : i32
    return %arg0, %c0_i32 : i32, i32
  }
  func.func @transform_8(%arg0: i32, %arg1: i32) -> (i32, i32) {
    %c0_i32 = arith.constant 0 : i32
    %c0_i32_0 = arith.constant 0 : i32
    return %arg0, %c0_i32 : i32, i32
  }
}

</mosaic_0001>

<bundles_post_ra>
// kernel: tpu_custom_call.1
= control target key start
LH: loop header
LB: loop body
LE: loop exit
PB: predicated region body
PF: predicated region fallthrough
CT: control target
= control target key end

     0   :  { %14 = vsyncpa [#allocation6], 0  ;;  %s2105_s0 = inlined_call_operand.hbm [shape: bf16[2,8,16], index: 0, kind: input, shape index: {}]   ;;  %s2106_s1 = inlined_call_operand.hbm [shape: bf16[16,128], index: 1, kind: input, shape index: {}]   ;;  %s2107_s2 = inlined_call_operand.hbm [shape: bf16[32,128], index: 2, kind: input, shape index: {}]   ;;  %s2108_s3 = inlined_call_operand.vmem [shape: f32[1,128], index: 3, kind: input, shape index: {}]   ;;  %s2109_s4 = inlined_call_operand.vmem [shape: f32[2,32], index: 4, kind: input, shape index: {}]   ;;  %s2110_s5 = inlined_call_operand.vmem [shape: f32[2,32], index: 5, kind: input, shape index: {}]   ;;  %s2111_s6 = inlined_call_operand.hbm [shape: bf16[2,8,32], index: 6, kind: output, shape index: {0}]   ;;  %s2112_s7 = inlined_call_operand.hbm [shape: f32[2,32], index: 7, kind: output, shape index: {1}]   ;;  %s2113_s8 = inlined_call_operand.hbm [shape: f32[2,32], index: 8, kind: output, shape index: {2}]  }
   0x1   :  { %15 = vsyncpa [#allocation9], 0 }
   0x2   :  { %16 = vsyncpa [#allocation7], 0 }
   0x3   :  { %17 = vsyncpa [#allocation13], 0  ;;  %s1737_s27 = smov [#allocation8]   ;;  %s1738_s29 = smov [#allocation5]  }
   0x4   :  { %s35_s28 = sshll.u32 %s1737_s27, 4  ;;  %s23_s30 = sshll.u32 %s1738_s29, 4  ;;  %s36_s28 = int_to_ptr.vmem [resolvable:$true] %s35_s28  ;;  %s24_s30 = int_to_ptr.vmem [resolvable:$true] %s23_s30 }
   0x5   :  { %s1617_s9 = scalar_lea.vmem %s36_s28, 128  ;;  %p1622_p1 = scmp.lt.s32.totalorder %s36_s28, %s36_s28 }
   0x6   :  { %p1618_p0 = scmp.ne.s32.totalorder %s36_s28, %s1617_s9  ;;  %p1623_p2 = scmp.lt.s32.totalorder %s1617_s9, %s1617_s9 }
   0x8   :  { %p1624_p3 = por %p1623_p2, %p1622_p1 }
   0xa   :  { %p1625_p4 = pnand %p1624_p3, %p1618_p0 }
   0xc   :  { %1628 = shalt.err (!%p1625_p4)
}
   0xd   :  { %s1739_s10 = smov 64   ;;  %s1740_s11 = smov 4  }
   0xe   :  { %41 = dma.hbm_to_vmem [thread:$0]  %s2106_s1, 128, %s36_s28, [#allocation9], %s1739_s10, %s1739_s10, %s1740_s11  }
   0xf   :  { %s1637_s14 = scalar_lea.vmem %s24_s30, 128  ;;  %p1642_p6 = scmp.lt.s32.totalorder %s24_s30, %s24_s30 }
  0x10   :  { %p1638_p5 = scmp.ne.s32.totalorder %s24_s30, %s1637_s14  ;;  %p1643_p7 = scmp.lt.s32.totalorder %s1637_s14, %s1637_s14 }
  0x12   :  { %p1644_p8 = por %p1643_p7, %p1642_p6 }
  0x14   :  { %p1645_p9 = pnand %p1644_p8, %p1638_p5 }
  0x16   :  { %1648 = shalt.err (!%p1645_p9)
}
  0x17   :  { %29 = dma.hbm_to_vmem [thread:$0]  %s2105_s0, 128, %s24_s30, [#allocation6], %s1739_s10, %s1739_s10, %s1740_s11  }
  0x18   :  { %s1741_s17 = smov [#allocation10]  }
  0x19   :  { %s47_s18 = sshll.u32 %s1741_s17, 4  ;;  %s48_s18 = int_to_ptr.vmem [resolvable:$true] %s47_s18 }
  0x1a   :  { %s1657_s19 = scalar_lea.vmem %s48_s18, 256  ;;  %p1662_p11 = scmp.lt.s32.totalorder %s48_s18, %s48_s18 }
  0x1b   :  { %p1658_p10 = scmp.ne.s32.totalorder %s48_s18, %s1657_s19  ;;  %p1663_p12 = scmp.lt.s32.totalorder %s1657_s19, %s1657_s19 }
  0x1d   :  { %p1664_p13 = por %p1663_p12, %p1662_p11 }
  0x1f   :  { %p1665_p0 = pnand %p1664_p13, %p1658_p10 }
  0x21   :  { %1668 = shalt.err (!%p1665_p0)
}
  0x22   :  { %53 = dma.hbm_to_vmem [thread:$0]  %s2107_s2, 256, %s48_s18, [#allocation9], %s1739_s10, %s1739_s10, %s1740_s11  }
  0x23   :  { %1729 = dma.done.wait [#allocation6], 128  }
  0x24   :  { %1730 = vsyncadd [#allocation6], 4294967168 }
  0x25   :  { %1731 = dma.done.wait [#allocation9], 384  }
  0x26   :  { %1732 = vsyncadd [#allocation9], 4294966912  ;;  %v1742_v0 = vmov 0.0   ;;  %vm1743_vm0 = vmmov 0   ;;  %v1477_v1 = vld [vmem:[#allocation8] sm:$0xff]   ;;  %v1818_v2 = vld [vmem:[#allocation10 + $0x8] sm:$0xff]  }
  0x27   :  { %1375 = vmatprep.subr.bf16.mxu0 %v1742_v0  ;;  %1381 = vmatprep.subr.bf16.mxu1 %v1742_v0  ;;  %vm101_vm1 = vcmask 130048   ;;  %v1479_v3 = vld [vmem:[#allocation5] sm:$0xff]   ;;  %vm75_vm2 = vcmask 254976   ;;  %v1821_v4 = vld [vmem:[#allocation10] sm:$0xff]   ;;  %v74_v5 = vld [vmem:[%s2109_s4] sm:$0x3] }
  0x28   :  { %1377 = vmatprep.mubr.msk.bf16.mxu0 %vm1743_vm0, %v1742_v0  ;;  %1385 = vmatprep.mubr.msk.bf16.mxu1 %vm1743_vm0, %v1742_v0  ;;  %v77_v6 = vld [vmem:[%s2110_s5] sm:$0x3]  ;;  %76 = vst.msk [vmem:[#allocation3] sm:$0x3] %vm75_vm2, %v74_v5  ;;  %vm169_vm3 = vcmask 261120   ;;  %s1744_s4 = smov 32  }
  0x29   :  { %1376 = vmatpush3.bf16.msra.mxu0 %v1477_v1  ;;  %1382 = vmatpush3.bf16.msra.mxu1 %v1818_v2  ;;  %78 = vst.msk [vmem:[#allocation4] sm:$0x3] %vm75_vm2, %v77_v6  ;;  %v1287_v11 = vld [vmem:[%s2108_s3] ss:$0 sm:$0xff]  ;;  %vm301_vm4 = vcmask 1041409   ;;  %vm289_vm5 = vcmask 253952  }
  0x2a   :  { %1389 = vmatprep.subr.bf16.mxu0 %v1742_v0  ;;  %1383 = vmatprep.subr.bf16.mxu1 %v1742_v0  ;;  %vm290_vm6 = vsmask.f32 256  ;;  %vm551_vm8 = vcmask 254977   ;;  %vm552_vm9 = vsmask.f32 1280  ;;  %vm814_vm11 = vcmask 256002  }
  0x2b   :  { %vm2038_vm7 = vmand %vm289_vm5, %vm290_vm6  ;;  %vm815_vm12 = vsmask.f32 2304  ;;  %vm1077_vm14 = vcmask 257027   ;;  %vm1078_vm15 = vsmask.f32 3328  ;;  %s1745_s3 = smov 96  }
  0x2c   :  { %1378 = vmatmul.mubr.msk.bf16.vlgmr.msra.gmra.mxu0 %vm101_vm1, %v1479_v3  ;;  %vm2045_vm10 = vmand %vm551_vm8, %vm552_vm9  ;;  %vm423_vm1 = vsmask.f32 7938  ;;  %vm949_vm6 = vsmask.f32 7946  ;;  %s1746_s24 = smov [#allocation12]  }
  0x2d   :  { %1390 = vmatpush3.bf16.msra.mxu0 %v1818_v2  ;;  %1393 = vmatprep.mubr.msk.bf16.mxu0 %vm1743_vm0, %v1742_v0  ;;  %vm2056_vm13 = vmand %vm814_vm11, %vm815_vm12  ;;  %s1260_s25 = sshll.u32 %s1746_s24, 4  ;;  %s1261_s25 = int_to_ptr.vmem [resolvable:$true] %s1260_s25 }
  0x2e   :  { %1384 = vmatpush3.bf16.msra.mxu1 %v1821_v4  ;;  %1391 = vmatprep.subr.bf16.mxu0 %v1742_v0  ;;  %vm2080_vm9 = vmand %vm814_vm11, %vm949_vm6  ;;  %s1669_s26 = scalar_lea.vmem %s1261_s25, 32  ;;  %p1674_p2 = scmp.lt.s32.totalorder %s1261_s25, %s1261_s25 }
  0x2f   :  { %1397 = vmatprep.subr.bf16.mxu1 %v1742_v0  ;;  %v152_v7 = vld [vmem:[#allocation3] sm:$0x3]  ;;  %p1670_p1 = scmp.ne.s32.totalorder %s1261_s25, %s1669_s26  ;;  %p1675_p3 = scmp.lt.s32.totalorder %s1669_s26, %s1669_s26 }
  0x30   :  { %v153_v8 = vld [vmem:[#allocation4] sm:$0x3]  ;;  %v156_v9 = vpack.c.bf16 %v152_v7, %v152_v7 }
  0x31   :  { %1392 = vmatpush3.bf16.msra.mxu0 %v1821_v4  ;;  %v234_v10 = vrot.slane %v153_v8, 1  ;;  %p1676_p4 = por %p1675_p3, %p1674_p2 }
  0x32   :  { %1405 = vmatprep.subr.bf16.mxu0 %v1742_v0  ;;  %1386 = vmatmul.mubr.msk.bf16.vlgmr.msra.gmra.mxu1 %vm169_vm3, %v156_v9 }
  0x33   :  { %237 = vrot.lane.b32.xlu1 %v234_v10, %s1744_s4  ;;  %1398 = vmatpush3.bf16.msra.mxu1 %v1818_v2  ;;  %p1677_p5 = pnand %p1676_p4, %p1670_p1 }
  0x34   :  { %1401 = vmatprep.mubr.msk.bf16.mxu1 %vm1743_vm0, %v1742_v0  ;;  %1399 = vmatprep.subr.bf16.mxu1 %v1742_v0 }
  0x37   :  { %235 = vrot.lane.b32.xlu1 %v153_v8, %s1744_s4  ;;  %1400 = vmatpush3.bf16.msra.mxu1 %v1821_v4 }
  0x38   :  { %1413 = vmatprep.subr.bf16.mxu1 %v1742_v0 }
  0xa5   :  { %v238_v41 = vpop.permute.xlu1 %237 }
  0xa9   :  { %v236_v43 = vpop.permute.xlu1 %235 }
  0xec   :  { %v139_v12 = vpop.f32.mrf.mxu0 }
  0xed   :  { %v140_v13 = vadd.f32 %v1287_v11, %v139_v12 }
  0xee   :  { %v1379_v14 = vpop.f32.mrf.mxu0 }
  0xef   :  { %146 = vst [vmem:[#allocation2] sm:$0xff] %v140_v13 }
  0xf0   :  { %v142_v15 = vpop.f32.mrf.mxu0 }
  0xf1   :  { %v143_v16 = vadd.f32 %v1287_v11, %v142_v15 }
  0xf2   :  { %v1380_v17 = vpop.f32.mrf.mxu0  ;;  %v207_v18 = vpop.f32.mrf.mxu1 }
  0xf3   :  { %147 = vst [vmem:[#allocation2 + $0x8] sm:$0xff] %v143_v16  ;;  %v214_v19 = vrot.slane %v207_v18, 1 }
  0xf4   :  { %v1387_v20 = vpop.f32.mrf.mxu1 }
  0xf6   :  { %v154_v21 = vld [vmem:[#allocation2] sm:$0x1]  ;;  %v210_v23 = vpop.f32.mrf.mxu1  ;;  %v298_v63 = vld [vmem:[#allocation2 + $0x1] sm:$0x1] }
  0xf7   :  { %v217_v26 = vadd.f32 %v207_v18, %v154_v21 }
  0xf8   :  { %v1388_v25 = vpop.f32.mrf.mxu1 }
  0xf9   :  { %v1294_v30 = vmul.f32 -1.442695, %v217_v26 }
  0xfa   :  { %v155_v22 = vld [vmem:[#allocation2 + $0x8] sm:$0x1]  ;;  %v299_v6 = vld [vmem:[#allocation2 + $0x9] sm:$0x1] }
  0xfb   :  { %v218_v24 = vadd.f32 %v214_v19, %v155_v22 }
  0xfd   :  { %1481 = vtanh.f32 %v218_v24  ;;  %v1295_v29 = vmul.f32 -1.442695, %v218_v24 }
  0xfe   :  { %1483 = vtanh.f32 %v217_v26 }
  0xff   :  { %1485 = vpow2.f32 %v1295_v29 }
 0x100   :  { %1487 = vpow2.f32 %v1294_v30 }
 0x10a   :  { %v1482_v27 = vpop.eup %1481 }
 0x10b   :  { %247 = vrot.lane.b32.xlu0 %v1482_v27, %s1744_s4  ;;  %v1484_v28 = vpop.eup %1483 }
 0x10c   :  { %v1486_v31 = vpop.eup %1485 }
 0x10d   :  { %v226_v32 = vadd.f32 1.0, %v1486_v31  ;;  %v1488_v33 = vpop.eup %1487 }
 0x10e   :  { %v225_v34 = vadd.f32 1.0, %v1488_v33 }
 0x10f   :  { %245 = vrot.lane.b32.xlu0 %v1484_v28, %s1744_s4  ;;  %1489 = vrcp.f32 %v226_v32 }
 0x110   :  { %1491 = vrcp.f32 %v225_v34 }
 0x11c   :  { %v1490_v35 = vpop.eup %1489 }
 0x11d   :  { %v1492_v38 = vpop.eup %1491  ;;  %v242_v42 = vmul.f32 %v1490_v35, %v238_v41 }
 0x11e   :  { %v241_v46 = vmul.f32 %v1492_v38, %v236_v43 }
 0x17d   :  { %v248_v36 = vpop.permute.xlu0 %247 }
 0x17e   :  { %v252_v37 = vmul.f32 %v1490_v35, %v248_v36 }
 0x180   :  { %257 = vrot.lane.b32.xlu0 %v252_v37, %s1744_s4 }
 0x181   :  { %v246_v39 = vpop.permute.xlu0 %245 }
 0x182   :  { %v251_v40 = vmul.f32 %v1492_v38, %v246_v39 }
 0x184   :  { %255 = vrot.lane.b32.xlu1 %v251_v40, %s1744_s4 }
 0x1f2   :  { %v258_v44 = vpop.permute.xlu0 %257 }
 0x1f3   :  { %v1857_v45 = vadd.f32 %v258_v44, %v242_v42 }
 0x1f5   :  { %1493 = vtanh.f32 %v1857_v45 }
 0x1f6   :  { %v256_v47 = vpop.permute.xlu1 %255 }
 0x1f7   :  { %v261_v48 = vadd.f32 %v256_v47, %v241_v46 }
 0x1f9   :  { %1495 = vtanh.f32 %v261_v48 }
 0x202   :  { %v1494_v49 = vpop.eup %1493 }
 0x203   :  { %269 = vrot.lane.b32.xlu0 %v1494_v49, %s1744_s4 }
 0x206   :  { %v1496_v50 = vpop.eup %1495 }
 0x207   :  { %267 = vrot.lane.b32.xlu1 %v1496_v50, %s1744_s4 }
 0x275   :  { %v270_v51 = vpop.permute.xlu0 %269 }
 0x276   :  { %v274_v52 = vmul.f32 %v1490_v35, %v270_v51 }
 0x278   :  { %v1862_v53 = vpack.c.bf16 %v274_v52, %v274_v52  ;;  %v432_v52 = vld [vmem:[#allocation2 + $0xa] sm:$0x1] }
 0x279   :  { %v268_v54 = vpop.permute.xlu1 %267 }
 0x27a   :  { %v280_v55 = vunpack.c.l.b16 %v1862_v53  ;;  %v273_v56 = vmul.f32 %v1492_v38, %v268_v54 }
 0x27c   :  { %v1865_v57 = vpack.c.bf16 %v273_v56, %v273_v56  ;;  %v300_v58 = vrot.slane %v280_v55, 7 }
 0x27e   :  { %v279_v59 = vunpack.c.l.b16 %v1865_v57 }
 0x280   :  { %v302_v60 = vsel %vm301_vm4, %v300_v58, %v279_v59 }
 0x281   :  { %v303_v61 = vpack.c.b16 %v302_v60, %v302_v60 }
 0x283   :  { %304 = vrot.lane.b32.xlu0 %v303_v61, %s1739_s10 }
 0x2f5   :  { %v305_v62 = vpop.permute.xlu0 %304 }
 0x2f6   :  { %1394 = vmatmul.mubr.msk.bf16.vlgmr.msra.gmra.mxu0 %vm169_vm3, %v305_v62 }
 0x2f7   :  { %1406 = vmatpush3.bf16.msra.mxu0 %v1818_v2  ;;  %1409 = vmatprep.mubr.msk.bf16.mxu0 %vm1743_vm0, %v1742_v0 }
 0x2f8   :  { %1407 = vmatprep.subr.bf16.mxu0 %v1742_v0 }
 0x2fb   :  { %1408 = vmatpush3.bf16.msra.mxu0 %v1821_v4 }
 0x2fc   :  { %1421 = vmatprep.subr.bf16.mxu0 %v1742_v0 }
 0x3b6   :  { %v343_v1 = vpop.f32.mrf.mxu0 }
 0x3b7   :  { %v350_v3 = vrot.slane %v343_v1, 1  ;;  %v353_v5 = vadd.f32 %v343_v1, %v298_v63 }
 0x3b8   :  { %v1395_v7 = vpop.f32.mrf.mxu0 }
 0x3b9   :  { %v354_v8 = vadd.f32 %v350_v3, %v299_v6  ;;  %1497 = vtanh.f32 %v353_v5  ;;  %v1299_v13 = vmul.f32 -1.442695, %v353_v5 }
 0x3ba   :  { %v346_v9 = vpop.f32.mrf.mxu0 }
 0x3bb   :  { %1499 = vtanh.f32 %v354_v8  ;;  %v1300_v14 = vmul.f32 -1.442695, %v354_v8 }
 0x3bc   :  { %v1396_v10 = vpop.f32.mrf.mxu0  ;;  %1501 = vpow2.f32 %v1299_v13 }
 0x3bd   :  { %1503 = vpow2.f32 %v1300_v14 }
 0x3c6   :  { %v1498_v11 = vpop.eup %1497 }
 0x3c7   :  { %373 = vrot.lane.b32.xlu0 %v1498_v11, %s1744_s4 }
 0x3c8   :  { %v1500_v12 = vpop.eup %1499 }
 0x3c9   :  { %375 = vrot.lane.b32.xlu1 %v1500_v12, %s1744_s4  ;;  %v1502_v15 = vpop.eup %1501 }
 0x3ca   :  { %v1504_v16 = vpop.eup %1503  ;;  %v361_v17 = vadd.f32 1.0, %v1502_v15 }
 0x3cb   :  { %v362_v18 = vadd.f32 1.0, %v1504_v16 }
 0x3cc   :  { %1505 = vrcp.f32 %v361_v17 }
 0x3cd   :  { %1507 = vrcp.f32 %v362_v18 }
 0x3d9   :  { %v1506_v19 = vpop.eup %1505 }
 0x3da   :  { %v1508_v22 = vpop.eup %1507  ;;  %v369_v25 = vmul.f32 %v1506_v19, %v261_v48  ;;  %v431_v48 = vld [vmem:[#allocation2 + $0x2] sm:$0x1] }
 0x3db   :  { %v370_v28 = vmul.f32 %v1508_v22, %v1857_v45 }
 0x439   :  { %v374_v20 = vpop.permute.xlu0 %373 }
 0x43a   :  { %v379_v21 = vmul.f32 %v1506_v19, %v374_v20 }
 0x43b   :  { %v376_v23 = vpop.permute.xlu1 %375 }
 0x43c   :  { %383 = vrot.lane.b32.xlu0 %v379_v21, %s1744_s4  ;;  %v380_v24 = vmul.f32 %v1508_v22, %v376_v23 }
 0x43e   :  { %385 = vrot.lane.b32.xlu1 %v380_v24, %s1744_s4 }
 0x4ae   :  { %v384_v26 = vpop.permute.xlu0 %383 }
 0x4af   :  { %v1881_v27 = vadd.f32 %v384_v26, %v369_v25 }
 0x4b0   :  { %v386_v29 = vpop.permute.xlu1 %385 }
 0x4b1   :  { %1509 = vtanh.f32 %v1881_v27  ;;  %v1885_v30 = vadd.f32 %v386_v29, %v370_v28 }
 0x4b3   :  { %1511 = vtanh.f32 %v1885_v30 }
 0x4be   :  { %v1510_v31 = vpop.eup %1509 }
 0x4bf   :  { %395 = vrot.lane.b32.xlu0 %v1510_v31, %s1744_s4 }
 0x4c0   :  { %v1512_v32 = vpop.eup %1511 }
 0x4c1   :  { %397 = vrot.lane.b32.xlu1 %v1512_v32, %s1744_s4  ;;  %v560_v32 = vld [vmem:[#allocation2 + $0x3] sm:$0x1] }
 0x531   :  { %v396_v33 = vpop.permute.xlu0 %395 }
 0x532   :  { %v401_v34 = vmul.f32 %v1506_v19, %v396_v33 }
 0x533   :  { %v398_v35 = vpop.permute.xlu1 %397 }
 0x534   :  { %v403_v36 = vpack.c.bf16 %v401_v34, %v401_v34  ;;  %v402_v37 = vmul.f32 %v1508_v22, %v398_v35 }
 0x536   :  { %v404_v38 = vpack.c.bf16 %v402_v37, %v402_v37  ;;  %v412_v39 = vshll.u32 %v403_v36, 16  ;;  %v407_v42 = vunpack.c.l.b16 %v403_v36  ;;  %v561_v36 = vld [vmem:[#allocation2 + $0xb] sm:$0x1] }
 0x538   :  { %v408_v40 = vunpack.c.l.b16 %v404_v38  ;;  %v415_v41 = vshll.u32 %v404_v38, 16 }
 0x53a   :  { %v433_v43 = vrot.slane %v408_v40, 7  ;;  %v1890_v44 = vpack.i.bf16 %v415_v41, %v412_v39 }
 0x53c   :  { %v434_v45 = vsel %vm301_vm4, %v433_v43, %v407_v42 }
 0x53d   :  { %v435_v46 = vpack.c.b16 %v434_v45, %v434_v45 }
 0x53f   :  { %436 = vrot.lane.b32.xlu1 %v435_v46, %s1739_s10 }
 0x5b1   :  { %v437_v47 = vpop.permute.xlu1 %436 }
 0x5b2   :  { %1402 = vmatmul.mubr.msk.bf16.vlgmr.msra.gmra.mxu1 %vm169_vm3, %v437_v47 }
 0x5b3   :  { %1414 = vmatpush3.bf16.msra.mxu1 %v1818_v2  ;;  %1417 = vmatprep.mubr.msk.bf16.mxu1 %vm1743_vm0, %v1742_v0 }
 0x5b4   :  { %1415 = vmatprep.subr.bf16.mxu1 %v1742_v0 }
 0x5b7   :  { %1416 = vmatpush3.bf16.msra.mxu1 %v1821_v4 }
 0x5b8   :  { %1429 = vmatprep.subr.bf16.mxu1 %v1742_v0 }
 0x672   :  { %v475_v49 = vpop.f32.mrf.mxu1 }
 0x673   :  { %v482_v50 = vrot.slane %v475_v49, 1  ;;  %v485_v51 = vadd.f32 %v475_v49, %v431_v48 }
 0x674   :  { %v1403_v54 = vpop.f32.mrf.mxu1 }
 0x675   :  { %v486_v55 = vadd.f32 %v482_v50, %v432_v52  ;;  %1513 = vtanh.f32 %v485_v51  ;;  %v1304_v61 = vmul.f32 -1.442695, %v485_v51 }
 0x676   :  { %v478_v56 = vpop.f32.mrf.mxu1 }
 0x677   :  { %1515 = vtanh.f32 %v486_v55  ;;  %v1305_v62 = vmul.f32 -1.442695, %v486_v55 }
 0x678   :  { %v1404_v58 = vpop.f32.mrf.mxu1  ;;  %1517 = vpow2.f32 %v1304_v61 }
 0x679   :  { %1519 = vpow2.f32 %v1305_v62 }
 0x682   :  { %v1514_v59 = vpop.eup %1513 }
 0x683   :  { %505 = vrot.lane.b32.xlu1 %v1514_v59, %s1744_s4 }
 0x684   :  { %v1516_v60 = vpop.eup %1515 }
 0x685   :  { %507 = vrot.lane.b32.xlu0 %v1516_v60, %s1744_s4  ;;  %v1518_v63 = vpop.eup %1517 }
 0x686   :  { %v1520_v1 = vpop.eup %1519  ;;  %v493_v3 = vadd.f32 1.0, %v1518_v63 }
 0x687   :  { %v494_v5 = vadd.f32 1.0, %v1520_v1 }
 0x688   :  { %1521 = vrcp.f32 %v493_v3 }
 0x689   :  { %1523 = vrcp.f32 %v494_v5 }
 0x695   :  { %v1522_v6 = vpop.eup %1521 }
 0x696   :  { %v1524_v9 = vpop.eup %1523  ;;  %v501_v12 = vmul.f32 %v1522_v6, %v1881_v27 }
 0x697   :  { %v502_v15 = vmul.f32 %v1524_v9, %v1885_v30 }
 0x6f5   :  { %v506_v7 = vpop.permute.xlu1 %505 }
 0x6f6   :  { %v511_v8 = vmul.f32 %v1522_v6, %v506_v7 }
 0x6f7   :  { %v508_v10 = vpop.permute.xlu0 %507 }
 0x6f8   :  { %515 = vrot.lane.b32.xlu1 %v511_v8, %s1744_s4  ;;  %v512_v11 = vmul.f32 %v1524_v9, %v508_v10 }
 0x6fa   :  { %517 = vrot.lane.b32.xlu0 %v512_v11, %s1744_s4 }
 0x76a   :  { %v516_v13 = vpop.permute.xlu1 %515 }
 0x76b   :  { %v521_v14 = vadd.f32 %v516_v13, %v501_v12 }
 0x76c   :  { %v518_v16 = vpop.permute.xlu0 %517 }
 0x76d   :  { %1525 = vtanh.f32 %v521_v14  ;;  %v522_v17 = vadd.f32 %v518_v16, %v502_v15 }
 0x76f   :  { %1527 = vtanh.f32 %v522_v17 }
 0x77a   :  { %v1526_v18 = vpop.eup %1525 }
 0x77b   :  { %527 = vrot.lane.b32.xlu1 %v1526_v18, %s1744_s4 }
 0x77c   :  { %v1528_v19 = vpop.eup %1527 }
 0x77d   :  { %529 = vrot.lane.b32.xlu0 %v1528_v19, %s1744_s4 }
 0x7ed   :  { %v528_v20 = vpop.permute.xlu1 %527 }
 0x7ee   :  { %v533_v21 = vmul.f32 %v1522_v6, %v528_v20 }
 0x7ef   :  { %v530_v22 = vpop.permute.xlu0 %529 }
 0x7f0   :  { %v534_v23 = vmul.f32 %v1524_v9, %v530_v22  ;;  %v1909_v24 = vpack.c.bf16 %v533_v21, %v533_v21  ;;  %v694_v22 = vld [vmem:[#allocation2 + $0x4] sm:$0x1] }
 0x7f2   :  { %v1911_v25 = vpack.c.bf16 %v534_v23, %v534_v23  ;;  %v539_v27 = vunpack.c.l.b16 %v1909_v24 }
 0x7f4   :  { %v540_v26 = vunpack.c.l.b16 %v1911_v25 }
 0x7f6   :  { %v562_v28 = vrot.slane %v540_v26, 7 }
 0x7f8   :  { %v563_v29 = vsel %vm301_vm4, %v562_v28, %v539_v27  ;;  %v695_v28 = vld [vmem:[#allocation2 + $0xc] sm:$0x1] }
 0x7f9   :  { %v564_v30 = vpack.c.b16 %v563_v29, %v563_v29 }
 0x7fb   :  { %565 = vrot.lane.b32.xlu0 %v564_v30, %s1739_s10 }
 0x86d   :  { %v566_v31 = vpop.permute.xlu0 %565 }
 0x86e   :  { %1410 = vmatmul.mubr.msk.bf16.vlgmr.msra.gmra.mxu0 %vm169_vm3, %v566_v31 }
 0x86f   :  { %1422 = vmatpush3.bf16.msra.mxu0 %v1818_v2  ;;  %1425 = vmatprep.mubr.msk.bf16.mxu0 %vm1743_vm0, %v1742_v0 }
 0x870   :  { %1423 = vmatprep.subr.bf16.mxu0 %v1742_v0 }
 0x873   :  { %1424 = vmatpush3.bf16.msra.mxu0 %v1821_v4 }
 0x874   :  { %1437 = vmatprep.subr.bf16.mxu0 %v1742_v0 }
 0x92e   :  { %v604_v33 = vpop.f32.mrf.mxu0 }
 0x92f   :  { %v611_v34 = vrot.slane %v604_v33, 1  ;;  %v614_v35 = vadd.f32 %v604_v33, %v560_v32 }
 0x930   :  { %v1411_v37 = vpop.f32.mrf.mxu0 }
 0x931   :  { %v615_v38 = vadd.f32 %v611_v34, %v561_v36  ;;  %1529 = vtanh.f32 %v614_v35  ;;  %v1309_v43 = vmul.f32 -1.442695, %v614_v35 }
 0x932   :  { %v607_v39 = vpop.f32.mrf.mxu0 }
 0x933   :  { %1531 = vtanh.f32 %v615_v38  ;;  %v1310_v45 = vmul.f32 -1.442695, %v615_v38 }
 0x934   :  { %v1412_v40 = vpop.f32.mrf.mxu0  ;;  %1533 = vpow2.f32 %v1309_v43 }
 0x935   :  { %1535 = vpow2.f32 %v1310_v45 }
 0x93e   :  { %v1530_v41 = vpop.eup %1529 }
 0x93f   :  { %634 = vrot.lane.b32.xlu0 %v1530_v41, %s1744_s4 }
 0x940   :  { %v1532_v42 = vpop.eup %1531 }
 0x941   :  { %636 = vrot.lane.b32.xlu1 %v1532_v42, %s1744_s4  ;;  %v1534_v46 = vpop.eup %1533 }
 0x942   :  { %v1536_v47 = vpop.eup %1535  ;;  %v622_v48 = vadd.f32 1.0, %v1534_v46 }
 0x943   :  { %v623_v49 = vadd.f32 1.0, %v1536_v47 }
 0x944   :  { %1537 = vrcp.f32 %v622_v48 }
 0x945   :  { %1539 = vrcp.f32 %v623_v49 }
 0x951   :  { %v1538_v50 = vpop.eup %1537 }
 0x952   :  { %v1540_v54 = vpop.eup %1539  ;;  %v630_v58 = vmul.f32 %v1538_v50, %v521_v14 }
 0x953   :  { %v631_v61 = vmul.f32 %v1540_v54, %v522_v17 }
 0x9b1   :  { %v635_v51 = vpop.permute.xlu0 %634 }
 0x9b2   :  { %v640_v52 = vmul.f32 %v1538_v50, %v635_v51 }
 0x9b3   :  { %v637_v55 = vpop.permute.xlu1 %636 }
 0x9b4   :  { %644 = vrot.lane.b32.xlu0 %v640_v52, %s1744_s4  ;;  %v641_v56 = vmul.f32 %v1540_v54, %v637_v55 }
 0x9b6   :  { %646 = vrot.lane.b32.xlu1 %v641_v56, %s1744_s4 }
 0xa26   :  { %v645_v59 = vpop.permute.xlu0 %644 }
 0xa27   :  { %v1928_v60 = vadd.f32 %v645_v59, %v630_v58 }
 0xa28   :  { %v647_v62 = vpop.permute.xlu1 %646 }
 0xa29   :  { %1541 = vtanh.f32 %v1928_v60  ;;  %v1931_v63 = vadd.f32 %v647_v62, %v631_v61 }
 0xa2b   :  { %1543 = vtanh.f32 %v1931_v63 }
 0xa36   :  { %v1542_v1 = vpop.eup %1541 }
 0xa37   :  { %656 = vrot.lane.b32.xlu0 %v1542_v1, %s1744_s4 }
 0xa38   :  { %v1544_v3 = vpop.eup %1543 }
 0xa39   :  { %658 = vrot.lane.b32.xlu1 %v1544_v3, %s1744_s4 }
 0xaa9   :  { %v657_v5 = vpop.permute.xlu0 %656 }
 0xaaa   :  { %v662_v6 = vmul.f32 %v1538_v50, %v657_v5 }
 0xaab   :  { %v659_v8 = vpop.permute.xlu1 %658 }
 0xaac   :  { %v664_v7 = vpack.c.bf16 %v662_v6, %v662_v6  ;;  %v663_v9 = vmul.f32 %v1540_v54, %v659_v8 }
 0xaae   :  { %v673_v10 = vshll.u32 %v664_v7, 16  ;;  %v665_v11 = vpack.c.bf16 %v663_v9, %v663_v9  ;;  %v668_v14 = vunpack.c.l.b16 %v664_v7  ;;  %v823_v9 = vld [vmem:[#allocation2 + $0x5] sm:$0x1] }
 0xab0   :  { %v669_v12 = vunpack.c.l.b16 %v665_v11  ;;  %v677_v13 = vshll.u32 %v665_v11, 16  ;;  %v1936_v16 = vrot.slane %v673_v10, 7 }
 0xab2   :  { %v696_v15 = vrot.slane %v669_v12, 7  ;;  %v1938_v17 = vrot.slane %v677_v13, 7  ;;  %v824_v13 = vld [vmem:[#allocation2 + $0xd] sm:$0x1] }
 0xab4   :  { %v697_v18 = vsel %vm301_vm4, %v696_v15, %v668_v14  ;;  %v1462_v19 = vpack.i.bf16 %v1938_v17, %v1936_v16 }
 0xab5   :  { %v698_v20 = vpack.c.b16 %v697_v18, %v697_v18 }
 0xab7   :  { %699 = vrot.lane.b32.xlu1 %v698_v20, %s1739_s10 }
 0xb29   :  { %v700_v21 = vpop.permute.xlu1 %699 }
 0xb2a   :  { %1418 = vmatmul.mubr.msk.bf16.vlgmr.msra.gmra.mxu1 %vm169_vm3, %v700_v21 }
 0xb2b   :  { %1430 = vmatpush3.bf16.msra.mxu1 %v1818_v2  ;;  %1433 = vmatprep.mubr.msk.bf16.mxu1 %vm1743_vm0, %v1742_v0 }
 0xb2c   :  { %1431 = vmatprep.subr.bf16.mxu1 %v1742_v0 }
 0xb2f   :  { %1432 = vmatpush3.bf16.msra.mxu1 %v1821_v4 }
 0xbea   :  { %v738_v23 = vpop.f32.mrf.mxu1 }
 0xbeb   :  { %v745_v26 = vrot.slane %v738_v23, 1  ;;  %v748_v27 = vadd.f32 %v738_v23, %v694_v22 }
 0xbec   :  { %v1419_v29 = vpop.f32.mrf.mxu1 }
 0xbed   :  { %v749_v30 = vadd.f32 %v745_v26, %v695_v28  ;;  %1545 = vtanh.f32 %v748_v27  ;;  %v1314_v35 = vmul.f32 -1.442695, %v748_v27 }
 0xbee   :  { %v741_v31 = vpop.f32.mrf.mxu1 }
 0xbef   :  { %1547 = vtanh.f32 %v749_v30  ;;  %v1315_v36 = vmul.f32 -1.442695, %v749_v30 }
 0xbf0   :  { %v1420_v32 = vpop.f32.mrf.mxu1  ;;  %1549 = vpow2.f32 %v1314_v35 }
 0xbf1   :  { %1551 = vpow2.f32 %v1315_v36 }
 0xbfa   :  { %v1546_v33 = vpop.eup %1545 }
 0xbfb   :  { %768 = vrot.lane.b32.xlu1 %v1546_v33, %s1744_s4 }
 0xbfc   :  { %v1548_v34 = vpop.eup %1547 }
 0xbfd   :  { %770 = vrot.lane.b32.xlu0 %v1548_v34, %s1744_s4  ;;  %v1550_v37 = vpop.eup %1549 }
 0xbfe   :  { %v1552_v38 = vpop.eup %1551  ;;  %v756_v39 = vadd.f32 1.0, %v1550_v37 }
 0xbff   :  { %v757_v40 = vadd.f32 1.0, %v1552_v38 }
 0xc00   :  { %1553 = vrcp.f32 %v756_v39 }
 0xc01   :  { %1555 = vrcp.f32 %v757_v40 }
 0xc0d   :  { %v1554_v41 = vpop.eup %1553 }
 0xc0e   :  { %v1556_v45 = vpop.eup %1555  ;;  %v764_v48 = vmul.f32 %v1554_v41, %v1928_v60 }
 0xc0f   :  { %v765_v51 = vmul.f32 %v1556_v45, %v1931_v63 }
 0xc6d   :  { %v769_v42 = vpop.permute.xlu1 %768 }
 0xc6e   :  { %v774_v43 = vmul.f32 %v1554_v41, %v769_v42 }
 0xc6f   :  { %v771_v46 = vpop.permute.xlu0 %770 }
 0xc70   :  { %778 = vrot.lane.b32.xlu1 %v774_v43, %s1744_s4  ;;  %v775_v47 = vmul.f32 %v1556_v45, %v771_v46 }
 0xc72   :  { %780 = vrot.lane.b32.xlu0 %v775_v47, %s1744_s4 }
 0xce2   :  { %v779_v49 = vpop.permute.xlu1 %778 }
 0xce3   :  { %v784_v50 = vadd.f32 %v779_v49, %v764_v48 }
 0xce4   :  { %v781_v52 = vpop.permute.xlu0 %780 }
 0xce5   :  { %1557 = vtanh.f32 %v784_v50  ;;  %v785_v54 = vadd.f32 %v781_v52, %v765_v51 }
 0xce7   :  { %1559 = vtanh.f32 %v785_v54 }
 0xcf2   :  { %v1558_v55 = vpop.eup %1557 }
 0xcf3   :  { %790 = vrot.lane.b32.xlu1 %v1558_v55, %s1744_s4 }
 0xcf4   :  { %v1560_v56 = vpop.eup %1559 }
 0xcf5   :  { %792 = vrot.lane.b32.xlu0 %v1560_v56, %s1744_s4 }
 0xd65   :  { %v791_v58 = vpop.permute.xlu1 %790 }
 0xd66   :  { %v796_v59 = vmul.f32 %v1554_v41, %v791_v58 }
 0xd67   :  { %v793_v61 = vpop.permute.xlu0 %792 }
 0xd68   :  { %v797_v62 = vmul.f32 %v1556_v45, %v793_v61  ;;  %v1958_v1 = vpack.c.bf16 %v796_v59, %v796_v59 }
 0xd6a   :  { %v1960_v60 = vpack.c.bf16 %v797_v62, %v797_v62  ;;  %v802_v3 = vunpack.c.l.b16 %v1958_v1 }
 0xd6c   :  { %v803_v63 = vunpack.c.l.b16 %v1960_v60 }
 0xd6e   :  { %v825_v5 = vrot.slane %v803_v63, 7  ;;  %v957_v63 = vld [vmem:[#allocation2 + $0x6] sm:$0x1] }
 0xd70   :  { %v826_v6 = vsel %vm301_vm4, %v825_v5, %v802_v3 }
 0xd71   :  { %v827_v7 = vpack.c.b16 %v826_v6, %v826_v6 }
 0xd73   :  { %828 = vrot.lane.b32.xlu0 %v827_v7, %s1739_s10  ;;  %v958_v7 = vld [vmem:[#allocation2 + $0xe] sm:$0x1] }
 0xde5   :  { %v829_v8 = vpop.permute.xlu0 %828 }
 0xde6   :  { %1426 = vmatmul.mubr.msk.bf16.vlgmr.msra.gmra.mxu0 %vm169_vm3, %v829_v8 }
 0xde7   :  { %1438 = vmatpush3.bf16.msra.mxu0 %v1818_v2  ;;  %1441 = vmatprep.mubr.msk.bf16.mxu0 %vm1743_vm0, %v1742_v0  ;;  %vm2066_vm0 = vmand %vm1077_vm14, %vm1078_vm15 }
 0xde8   :  { %1439 = vmatprep.subr.bf16.mxu0 %v1742_v0 }
 0xdeb   :  { %1440 = vmatpush3.bf16.msra.mxu0 %v1821_v4 }
 0xea6   :  { %v867_v10 = vpop.f32.mrf.mxu0 }
 0xea7   :  { %v874_v11 = vrot.slane %v867_v10, 1  ;;  %v877_v12 = vadd.f32 %v867_v10, %v823_v9 }
 0xea8   :  { %v1427_v14 = vpop.f32.mrf.mxu0 }
 0xea9   :  { %v878_v15 = vadd.f32 %v874_v11, %v824_v13  ;;  %1561 = vtanh.f32 %v877_v12  ;;  %v1319_v0 = vmul.f32 -1.442695, %v877_v12 }
 0xeaa   :  { %v870_v18 = vpop.f32.mrf.mxu0 }
 0xeab   :  { %1563 = vtanh.f32 %v878_v15  ;;  %v1320_v22 = vmul.f32 -1.442695, %v878_v15 }
 0xeac   :  { %v1428_v20 = vpop.f32.mrf.mxu0  ;;  %1565 = vpow2.f32 %v1319_v0 }
 0xead   :  { %1567 = vpow2.f32 %v1320_v22 }
 0xeb6   :  { %v1562_v21 = vpop.eup %1561 }
 0xeb7   :  { %897 = vrot.lane.b32.xlu0 %v1562_v21, %s1744_s4 }
 0xeb8   :  { %v1564_v2 = vpop.eup %1563 }
 0xeb9   :  { %899 = vrot.lane.b32.xlu1 %v1564_v2, %s1744_s4  ;;  %v1566_v4 = vpop.eup %1565 }
 0xeba   :  { %v1568_v23 = vpop.eup %1567  ;;  %v885_v26 = vadd.f32 1.0, %v1566_v4 }
 0xebb   :  { %v886_v27 = vadd.f32 1.0, %v1568_v23 }
 0xebc   :  { %1569 = vrcp.f32 %v885_v26 }
 0xebd   :  { %1571 = vrcp.f32 %v886_v27 }
 0xec9   :  { %v1570_v28 = vpop.eup %1569 }
 0xeca   :  { %v1572_v31 = vpop.eup %1571  ;;  %v893_v34 = vmul.f32 %v1570_v28, %v784_v50 }
 0xecb   :  { %v894_v37 = vmul.f32 %v1572_v31, %v785_v54 }
 0xf29   :  { %v898_v29 = vpop.permute.xlu0 %897 }
 0xf2a   :  { %v903_v30 = vmul.f32 %v1570_v28, %v898_v29 }
 0xf2b   :  { %v900_v32 = vpop.permute.xlu1 %899 }
 0xf2c   :  { %907 = vrot.lane.b32.xlu0 %v903_v30, %s1744_s4  ;;  %v904_v33 = vmul.f32 %v1572_v31, %v900_v32 }
 0xf2e   :  { %909 = vrot.lane.b32.xlu1 %v904_v33, %s1744_s4 }
 0xf9e   :  { %v908_v35 = vpop.permute.xlu0 %907 }
 0xf9f   :  { %v913_v36 = vadd.f32 %v908_v35, %v893_v34 }
 0xfa0   :  { %v910_v38 = vpop.permute.xlu1 %909 }
 0xfa1   :  { %1573 = vtanh.f32 %v913_v36  ;;  %v914_v39 = vadd.f32 %v910_v38, %v894_v37 }
 0xfa3   :  { %1575 = vtanh.f32 %v914_v39 }
 0xfae   :  { %v1574_v40 = vpop.eup %1573 }
 0xfaf   :  { %919 = vrot.lane.b32.xlu0 %v1574_v40, %s1744_s4 }
 0xfb0   :  { %v1576_v41 = vpop.eup %1575 }
 0xfb1   :  { %921 = vrot.lane.b32.xlu1 %v1576_v41, %s1744_s4 }
0x1021   :  { %v920_v42 = vpop.permute.xlu0 %919 }
0x1022   :  { %v925_v43 = vmul.f32 %v1570_v28, %v920_v42 }
0x1023   :  { %v922_v46 = vpop.permute.xlu1 %921 }
0x1024   :  { %v927_v45 = vpack.c.bf16 %v925_v43, %v925_v43  ;;  %v926_v47 = vmul.f32 %v1572_v31, %v922_v46 }
0x1026   :  { %v936_v48 = vshll.u32 %v927_v45, 16  ;;  %v928_v49 = vpack.c.bf16 %v926_v47, %v926_v47  ;;  %v931_v52 = vunpack.c.l.b16 %v927_v45 }
0x1028   :  { %v932_v50 = vunpack.c.l.b16 %v928_v49  ;;  %v940_v51 = vshll.u32 %v928_v49, 16  ;;  %v1978_v55 = vrot.slane %v936_v48, 6  ;;  %v1086_v49 = vld [vmem:[#allocation2 + $0x7] sm:$0x1] }
0x102a   :  { %v959_v54 = vrot.slane %v932_v50, 7  ;;  %v1980_v56 = vrot.slane %v940_v51, 6 }
0x102c   :  { %v960_v58 = vsel %vm301_vm4, %v959_v54, %v931_v52  ;;  %v1467_v59 = vpack.i.bf16 %v1980_v56, %v1978_v55  ;;  %v1087_v54 = vld [vmem:[#allocation2 + $0xf] sm:$0x1]  ;;  %v295_v55 = vld [vmem:[#allocation11 + $0x4] sm:$0x1] }
0x102d   :  { %v961_v61 = vpack.c.b16 %v960_v58, %v960_v58 }
0x102f   :  { %962 = vrot.lane.b32.xlu1 %v961_v61, %s1739_s10 }
0x10a1   :  { %v963_v62 = vpop.permute.xlu1 %962 }
0x10a2   :  { %1434 = vmatmul.mubr.msk.bf16.vlgmr.msra.gmra.mxu1 %vm169_vm3, %v963_v62 }
0x1162   :  { %v1001_v3 = vpop.f32.mrf.mxu1 }
0x1163   :  { %v1008_v5 = vrot.slane %v1001_v3, 1  ;;  %v1011_v6 = vadd.f32 %v1001_v3, %v957_v63 }
0x1164   :  { %v1435_v8 = vpop.f32.mrf.mxu1 }
0x1165   :  { %v1012_v9 = vadd.f32 %v1008_v5, %v958_v7  ;;  %1577 = vtanh.f32 %v1011_v6  ;;  %v1324_v14 = vmul.f32 -1.442695, %v1011_v6 }
0x1166   :  { %v1004_v10 = vpop.f32.mrf.mxu1 }
0x1167   :  { %1579 = vtanh.f32 %v1012_v9  ;;  %v1325_v15 = vmul.f32 -1.442695, %v1012_v9 }
0x1168   :  { %v1436_v11 = vpop.f32.mrf.mxu1  ;;  %1581 = vpow2.f32 %v1324_v14 }
0x1169   :  { %1583 = vpow2.f32 %v1325_v15 }
0x1172   :  { %v1578_v12 = vpop.eup %1577 }
0x1173   :  { %1031 = vrot.lane.b32.xlu1 %v1578_v12, %s1744_s4 }
0x1174   :  { %v1580_v13 = vpop.eup %1579 }
0x1175   :  { %1033 = vrot.lane.b32.xlu0 %v1580_v13, %s1744_s4  ;;  %v1582_v18 = vpop.eup %1581 }
0x1176   :  { %v1584_v20 = vpop.eup %1583  ;;  %v1019_v21 = vadd.f32 1.0, %v1582_v18 }
0x1177   :  { %v1020_v2 = vadd.f32 1.0, %v1584_v20 }
0x1178   :  { %1585 = vrcp.f32 %v1019_v21 }
0x1179   :  { %1587 = vrcp.f32 %v1020_v2 }
0x1185   :  { %v1586_v0 = vpop.eup %1585 }
0x1186   :  { %v1588_v23 = vpop.eup %1587  ;;  %v1027_v28 = vmul.f32 %v1586_v0, %v913_v36 }
0x1187   :  { %v1028_v31 = vmul.f32 %v1588_v23, %v914_v39 }
0x11e5   :  { %v1032_v22 = vpop.permute.xlu1 %1031 }
0x11e6   :  { %v1037_v4 = vmul.f32 %v1586_v0, %v1032_v22 }
0x11e7   :  { %v1034_v26 = vpop.permute.xlu0 %1033 }
0x11e8   :  { %1041 = vrot.lane.b32.xlu1 %v1037_v4, %s1744_s4  ;;  %v1038_v27 = vmul.f32 %v1588_v23, %v1034_v26 }
0x11ea   :  { %1043 = vrot.lane.b32.xlu0 %v1038_v27, %s1744_s4 }
0x125a   :  { %v1042_v29 = vpop.permute.xlu1 %1041 }
0x125b   :  { %v1047_v30 = vadd.f32 %v1042_v29, %v1027_v28 }
0x125c   :  { %v1044_v32 = vpop.permute.xlu0 %1043 }
0x125d   :  { %1589 = vtanh.f32 %v1047_v30  ;;  %v1048_v33 = vadd.f32 %v1044_v32, %v1028_v31  ;;  %v544_v31 = vrot.slane %v1911_v25, 7  ;;  %v806_v32 = vrot.slane %v1958_v1, 6 }
0x125f   :  { %1591 = vtanh.f32 %v1048_v33 }
0x126a   :  { %v1590_v34 = vpop.eup %1589 }
0x126b   :  { %1053 = vrot.lane.b32.xlu1 %v1590_v34, %s1744_s4 }
0x126c   :  { %v1592_v35 = vpop.eup %1591 }
0x126d   :  { %1055 = vrot.lane.b32.xlu0 %v1592_v35, %s1744_s4 }
0x12dd   :  { %v1054_v37 = vpop.permute.xlu1 %1053 }
0x12de   :  { %v1059_v38 = vmul.f32 %v1586_v0, %v1054_v37 }
0x12df   :  { %v1056_v40 = vpop.permute.xlu0 %1055 }
0x12e0   :  { %v1060_v41 = vmul.f32 %v1588_v23, %v1056_v40  ;;  %v1993_v42 = vpack.c.bf16 %v1059_v38, %v1059_v38  ;;  %v554_v38 = vld [vmem:[#allocation11] sm:$0x2] }
0x12e2   :  { %v1995_v36 = vpack.c.bf16 %v1060_v41, %v1060_v41  ;;  %v1065_v43 = vunpack.c.l.b16 %v1993_v42  ;;  %v1069_v34 = vrot.slane %v1993_v42, 5 }
0x12e4   :  { %v1066_v39 = vunpack.c.l.b16 %v1995_v36 }
0x12e6   :  { %v1088_v45 = vrot.slane %v1066_v39, 7 }
0x12e8   :  { %v1089_v46 = vsel %vm301_vm4, %v1088_v45, %v1065_v43  ;;  %v557_v45 = vld [vmem:[#allocation11 + $0x4] sm:$0x2] }
0x12e9   :  { %v1090_v47 = vpack.c.b16 %v1089_v46, %v1089_v46 }
0x12eb   :  { %1091 = vrot.lane.b32.xlu0 %v1090_v47, %s1739_s10  ;;  %v817_v47 = vld [vmem:[#allocation11] sm:$0x4] }
0x135d   :  { %v1092_v48 = vpop.permute.xlu0 %1091 }
0x135e   :  { %1442 = vmatmul.mubr.msk.bf16.vlgmr.msra.gmra.mxu0 %vm169_vm3, %v1092_v48  ;;  %vm424_vm3 = vmand %vm289_vm5, %vm423_vm1  ;;  %vm1212_vm5 = vsmask.f32 7950 }
0x141e   :  { %v1130_v50 = vpop.f32.mrf.mxu0 }
0x141f   :  { %v1137_v51 = vrot.slane %v1130_v50, 1  ;;  %v1140_v52 = vadd.f32 %v1130_v50, %v1086_v49 }
0x1420   :  { %v1443_v58 = vpop.f32.mrf.mxu0 }
0x1421   :  { %v1141_v61 = vadd.f32 %v1137_v51, %v1087_v54  ;;  %1593 = vtanh.f32 %v1140_v52  ;;  %v1329_v6 = vmul.f32 -1.442695, %v1140_v52 }
0x1422   :  { %v1133_v62 = vpop.f32.mrf.mxu0 }
0x1423   :  { %1595 = vtanh.f32 %v1141_v61  ;;  %v1330_v7 = vmul.f32 -1.442695, %v1141_v61  ;;  %v820_v61 = vld [vmem:[#allocation11 + $0x4] sm:$0x4] }
0x1424   :  { %v1444_v63 = vpop.f32.mrf.mxu0  ;;  %1597 = vpow2.f32 %v1329_v6 }
0x1425   :  { %1599 = vpow2.f32 %v1330_v7  ;;  %v1080_v63 = vld [vmem:[#allocation11] sm:$0x8] }
0x142e   :  { %v1594_v3 = vpop.eup %1593 }
0x142f   :  { %1160 = vrot.lane.b32.xlu1 %v1594_v3, %s1744_s4 }
0x1430   :  { %v1596_v5 = vpop.eup %1595 }
0x1431   :  { %1162 = vrot.lane.b32.xlu0 %v1596_v5, %s1744_s4  ;;  %v1598_v8 = vpop.eup %1597 }
0x1432   :  { %v1600_v9 = vpop.eup %1599  ;;  %v1148_v10 = vadd.f32 1.0, %v1598_v8  ;;  %v1083_v8 = vld [vmem:[#allocation11 + $0x4] sm:$0x8] }
0x1433   :  { %v1149_v11 = vadd.f32 1.0, %v1600_v9 }
0x1434   :  { %1601 = vrcp.f32 %v1148_v10 }
0x1435   :  { %1603 = vrcp.f32 %v1149_v11 }
0x1441   :  { %v1602_v12 = vpop.eup %1601 }
0x1442   :  { %v1604_v15 = vpop.eup %1603  ;;  %v1156_v21 = vmul.f32 %v1602_v12, %v1047_v30  ;;  %v543_v30 = vrot.slane %v1909_v24, 7 }
0x1443   :  { %v1157_v22 = vmul.f32 %v1604_v15, %v1048_v33  ;;  %v807_v33 = vrot.slane %v1960_v60, 6 }
0x14a1   :  { %v1161_v13 = vpop.permute.xlu1 %1160 }
0x14a2   :  { %v1166_v14 = vmul.f32 %v1602_v12, %v1161_v13 }
0x14a3   :  { %v1163_v18 = vpop.permute.xlu0 %1162 }
0x14a4   :  { %1170 = vrot.lane.b32.xlu1 %v1166_v14, %s1744_s4  ;;  %v1167_v20 = vmul.f32 %v1604_v15, %v1163_v18 }
0x14a6   :  { %1172 = vrot.lane.b32.xlu0 %v1167_v20, %s1744_s4 }
0x1516   :  { %v1171_v2 = vpop.permute.xlu1 %1170 }
0x1517   :  { %v1176_v0 = vadd.f32 %v1171_v2, %v1156_v21 }
0x1518   :  { %v1173_v4 = vpop.permute.xlu0 %1172 }
0x1519   :  { %1605 = vtanh.f32 %v1176_v0  ;;  %v1177_v23 = vadd.f32 %v1173_v4, %v1157_v22 }
0x151b   :  { %1607 = vtanh.f32 %v1177_v23  ;;  %v1231_v26 = vrot.slane %v1177_v23, 7 }
0x151d   :  { %v2007_v27 = vsel %vm301_vm4, %v1231_v26, %v1176_v0 }
0x1526   :  { %v1606_v28 = vpop.eup %1605 }
0x1527   :  { %1182 = vrot.lane.b32.xlu1 %v1606_v28, %s1744_s4 }
0x1528   :  { %v1608_v29 = vpop.eup %1607 }
0x1529   :  { %1184 = vrot.lane.b32.xlu0 %v1608_v29, %s1744_s4 }
0x152b   :  { %283 = vrot.lane.b32.xlu1 %v1865_v57, %s1739_s10 }
0x152d   :  { %285 = vrot.lane.b32.xlu0 %v1862_v53, %s1739_s10  ;;  %v1070_v53 = vrot.slane %v1995_v36, 5 }
0x152f   :  { %545 = vrot.lane.b32.xlu1 %v543_v30, %s1739_s10 }
0x1531   :  { %547 = vrot.lane.b32.xlu0 %v544_v31, %s1739_s10 }
0x1533   :  { %808 = vrot.lane.b32.xlu1 %v806_v32, %s1739_s10 }
0x1535   :  { %810 = vrot.lane.b32.xlu0 %v807_v33, %s1739_s10 }
0x1537   :  { %1071 = vrot.lane.b32.xlu1 %v1069_v34, %s1739_s10 }
0x1539   :  { %1073 = vrot.lane.b32.xlu0 %v1070_v53, %s1739_s10 }
0x153b   :  { %1458 = vrot.lane.b32.xlu1 %v1890_v44, %s1739_s10  ;;  %v292_v44 = vld [vmem:[#allocation11] sm:$0x1] }
0x153d   :  { %1463 = vrot.lane.b32.xlu0 %v1462_v19, %s1739_s10 }
0x153f   :  { %1468 = vrot.lane.b32.xlu1 %v1467_v59, %s1739_s10 }
0x1599   :  { %v1183_v57 = vpop.permute.xlu1 %1182 }
0x159a   :  { %v1188_v24 = vmul.f32 %v1602_v12, %v1183_v57 }
0x159b   :  { %v1185_v60 = vpop.permute.xlu0 %1184 }
0x159c   :  { %v1347_v1 = vpack.c.bf16 %v1188_v24, %v1188_v24  ;;  %v1189_v16 = vmul.f32 %v1604_v15, %v1185_v60 }
0x159d   :  { %v284_v17 = vpop.permute.xlu1 %283 }
0x159e   :  { %v293_v19 = vsel %vm2038_vm7, %v284_v17, %v292_v44  ;;  %v1199_v56 = vshll.u32 %v1347_v1, 16  ;;  %v1348_v59 = vpack.c.bf16 %v1189_v16, %v1189_v16  ;;  %v1222_v35 = vrot.slane %v1189_v16, 7 }
0x159f   :  { %294 = vst [vmem:[#allocation11] sm:$0x1] %v293_v19  ;;  %v286_v40 = vpop.permute.xlu0 %285 }
0x15a0   :  { %v1203_v41 = vshll.u32 %v1348_v59, 16  ;;  %v296_v42 = vsel %vm2038_vm7, %v286_v40, %v295_v55  ;;  %v1223_v39 = vsel %vm301_vm4, %v1222_v35, %v1188_v24  ;;  %v1201_v48 = vrot.slane %v1199_v56, 5 }
0x15a1   :  { %v546_v36 = vpop.permute.xlu1 %545  ;;  %297 = vst [vmem:[#allocation11 + $0x4] sm:$0x1] %v296_v42  ;;  %1224 = vrot.lane.b32.xlu1 %v1223_v39, %s1739_s10  ;;  %vm686_vm4 = vsmask.f32 7942 }
0x15a2   :  { %v555_v43 = vsel %vm2045_vm10, %v546_v36, %v554_v38  ;;  %v1205_v49 = vrot.slane %v1203_v41, 5  ;;  %vm687_vm7 = vmand %vm551_vm8, %vm686_vm4 }
0x15a3   :  { %556 = vst [vmem:[#allocation11] sm:$0x2] %v555_v43  ;;  %v548_v50 = vpop.permute.xlu0 %547 }
0x15a4   :  { %v558_v51 = vsel %vm2045_vm10, %v548_v50, %v557_v45  ;;  %v1472_v54 = vpack.i.bf16 %v1205_v49, %v1201_v48 }
0x15a5   :  { %v809_v52 = vpop.permute.xlu1 %808  ;;  %559 = vst [vmem:[#allocation11 + $0x4] sm:$0x2] %v558_v51 }
0x15a6   :  { %v818_v58 = vsel %vm2056_vm13, %v809_v52, %v817_v47  ;;  %1473 = vrot.lane.b32.xlu0 %v1472_v54, %s1739_s10  ;;  %v425_v14 = vld [vmem:[#allocation11] sm:$0x1] }
0x15a7   :  { %819 = vst [vmem:[#allocation11] sm:$0x4] %v818_v58  ;;  %v811_v3 = vpop.permute.xlu0 %810 }
0x15a8   :  { %v821_v5 = vsel %vm2056_vm13, %v811_v3, %v820_v61  ;;  %v428_v15 = vld [vmem:[#allocation11 + $0x4] sm:$0x1] }
0x15a9   :  { %v1072_v6 = vpop.permute.xlu1 %1071  ;;  %822 = vst [vmem:[#allocation11 + $0x4] sm:$0x4] %v821_v5 }
0x15aa   :  { %v1081_v7 = vsel %vm2066_vm0, %v1072_v6, %v1080_v63  ;;  %1233 = vrot.lane.b32.xlu0 %v2007_v27, %s1745_s3  ;;  %v688_v23 = vld [vmem:[#allocation11] sm:$0x2] }
0x15ab   :  { %1082 = vst [vmem:[#allocation11] sm:$0x8] %v1081_v7  ;;  %v1074_v9 = vpop.permute.xlu0 %1073 }
0x15ac   :  { %v1084_v10 = vsel %vm2066_vm0, %v1074_v9, %v1083_v8  ;;  %v691_v26 = vld [vmem:[#allocation11 + $0x4] sm:$0x2] }
0x15ad   :  { %v1459_v11 = vpop.permute.xlu1 %1458  ;;  %1085 = vst [vmem:[#allocation11 + $0x4] sm:$0x8] %v1084_v10 }
0x15ae   :  { %v1461_v12 = vunpack.i.h.bf16 %v1459_v11  ;;  %v1460_v13 = vunpack.i.l.bf16 %v1459_v11  ;;  %v951_v31 = vld [vmem:[#allocation11] sm:$0x4] }
0x15af   :  { %v1464_v21 = vpop.permute.xlu0 %1463 }
0x15b0   :  { %v426_v18 = vsel %vm424_vm3, %v1460_v13, %v425_v14  ;;  %v429_v20 = vsel %vm424_vm3, %v1461_v12, %v428_v15  ;;  %v1466_v0 = vunpack.i.h.bf16 %v1464_v21  ;;  %v1465_v22 = vunpack.i.l.bf16 %v1464_v21  ;;  %v954_v32 = vld [vmem:[#allocation11 + $0x4] sm:$0x4] }
0x15b1   :  { %427 = vst [vmem:[#allocation11] sm:$0x1] %v426_v18  ;;  %430 = vst [vmem:[#allocation11 + $0x4] sm:$0x1] %v429_v20  ;;  %v1469_v4 = vpop.permute.xlu1 %1468 }
0x15b2   :  { %v1471_v27 = vunpack.i.h.bf16 %v1469_v4  ;;  %v1470_v28 = vunpack.i.l.bf16 %v1469_v4  ;;  %v692_v29 = vsel %vm687_vm7, %v1466_v0, %v691_v26  ;;  %v689_v30 = vsel %vm687_vm7, %v1465_v22, %v688_v23 }
0x15b3   :  { %693 = vst [vmem:[#allocation11 + $0x4] sm:$0x2] %v692_v29  ;;  %690 = vst [vmem:[#allocation11] sm:$0x2] %v689_v30 }
0x15b4   :  { %v952_v33 = vsel %vm2080_vm9, %v1470_v28, %v951_v31  ;;  %v955_v34 = vsel %vm2080_vm9, %v1471_v27, %v954_v32 }
0x15b5   :  { %953 = vst [vmem:[#allocation11] sm:$0x4] %v952_v33  ;;  %956 = vst [vmem:[#allocation11 + $0x4] sm:$0x4] %v955_v34 }
0x1613   :  { %v1225_v53 = vpop.permute.xlu1 %1224 }
0x1614   :  { %1228 = vst.msk [vmem:[#allocation3] sm:$0x3] %vm75_vm2, %v1225_v53  ;;  %1240 = vst.msk [vmem:[#allocation12] sm:$0x3] %vm75_vm2, %v1225_v53 }
0x1615   :  { %1680 = shalt.err (!%p1677_p5)
}
0x1616   :  { %1263 = dma.vmem_to_hbm [thread:$0]  %s1261_s25, 32, %s2112_s7, [#allocation13]   ;;  %vm1213_vm8 = vmand %vm1077_vm14, %vm1212_vm5  ;;  %v1214_v44 = vld [vmem:[#allocation11] sm:$0x8]  ;;  %v1217_v1 = vld [vmem:[#allocation11 + $0x4] sm:$0x8] }
0x1617   :  { %s1747_s29 = smov [#allocation11]   ;;  %s1748_s9 = smov [#allocation14]  }
0x1618   :  { %s1247_s30 = sshll.u32 %s1747_s29, 4  ;;  %v1474_v57 = vpop.permute.xlu0 %1473  ;;  %s1270_s12 = sshll.u32 %s1748_s9, 4  ;;  %s1248_s30 = int_to_ptr.vmem [resolvable:$true] %s1247_s30  ;;  %s1271_s12 = int_to_ptr.vmem [resolvable:$true] %s1270_s12 }
0x1619   :  { %v1476_v24 = vunpack.i.h.bf16 %v1474_v57  ;;  %v1475_v25 = vunpack.i.l.bf16 %v1474_v57  ;;  %s1689_s7 = scalar_lea.vmem %s1248_s30, 128  ;;  %p1694_p7 = scmp.lt.s32.totalorder %s1248_s30, %s1248_s30 }
0x161a   :  { %p1690_p6 = scmp.ne.s32.totalorder %s1248_s30, %s1689_s7  ;;  %p1695_p8 = scmp.lt.s32.totalorder %s1689_s7, %s1689_s7 }
0x161b   :  { %v1218_v60 = vsel %vm1213_vm8, %v1476_v24, %v1217_v1  ;;  %v1215_v16 = vsel %vm1213_vm8, %v1475_v25, %v1214_v44 }
0x161c   :  { %1219 = vst [vmem:[#allocation11 + $0x4] sm:$0x8] %v1218_v60  ;;  %1216 = vst [vmem:[#allocation11] sm:$0x8] %v1215_v16  ;;  %v1234_v17 = vpop.permute.xlu0 %1233  ;;  %p1696_p9 = por %p1695_p8, %p1694_p7 }
0x161d   :  { %1236 = vst.msk [vmem:[#allocation4] sm:$0x3] %vm75_vm2, %v1234_v17  ;;  %1241 = vst.msk [vmem:[#allocation14] sm:$0x3] %vm75_vm2, %v1234_v17 }
0x161e   :  { %p1697_p10 = pnand %p1696_p9, %p1690_p6 }
0x1620   :  { %1700 = shalt.err (!%p1697_p10)
}
0x1621   :  { %1253 = dma.vmem_to_hbm [thread:$0]  %s1248_s30, 128, %s2111_s6, [#allocation7], %s1739_s10, %s1739_s10, %s1740_s11  }
0x1622   :  { %s1709_s15 = scalar_lea.vmem %s1271_s12, 32  ;;  %p1714_p12 = scmp.lt.s32.totalorder %s1271_s12, %s1271_s12 }
0x1623   :  { %p1710_p11 = scmp.ne.s32.totalorder %s1271_s12, %s1709_s15  ;;  %p1715_p13 = scmp.lt.s32.totalorder %s1709_s15, %s1709_s15 }
0x1625   :  { %p1716_p0 = por %p1715_p13, %p1714_p12 }
0x1627   :  { %p1717_p1 = pnand %p1716_p0, %p1710_p11 }
0x1629   :  { %1720 = shalt.err (!%p1717_p1)
}
0x162a   :  { %1273 = dma.vmem_to_hbm [thread:$0]  %s1271_s12, 32, %s2113_s8, [#allocation13]  }
0x162b   :  { %1733 = dma.done.wait [#allocation7], 128  }
0x162c   :  { %1734 = vsyncadd [#allocation7], 4294967168 }
0x162d   :  { %1735 = dma.done.wait [#allocation13], 64  }
0x162e   :  { %1736 = vsyncadd [#allocation13], 4294967232 }
0x162f   :  { %1283 = vsyncpa [#allocation6], 1 }
0x1630   :  { %1284 = vsyncpa [#allocation9], 1 }
0x1631   :  { %1285 = vsyncpa [#allocation7], 1 }
0x1632   :  { %1286 = vsyncpa [#allocation13], 1 }

// kernel: tpu_custom_call.1
= control target key start
LH: loop header
LB: loop body
LE: loop exit
PB: predicated region body
PF: predicated region fallthrough
CT: control target
= control target key end

     0   :  { %14 = vsyncpa [#allocation6], 0  ;;  %s2105_s0 = inlined_call_operand.hbm [shape: bf16[2,8,16], index: 0, kind: input, shape index: {}]   ;;  %s2106_s1 = inlined_call_operand.hbm [shape: bf16[16,128], index: 1, kind: input, shape index: {}]   ;;  %s2107_s2 = inlined_call_operand.hbm [shape: bf16[32,128], index: 2, kind: input, shape index: {}]   ;;  %s2108_s3 = inlined_call_operand.vmem [shape: f32[1,128], index: 3, kind: input, shape index: {}]   ;;  %s2109_s4 = inlined_call_operand.vmem [shape: f32[2,32], index: 4, kind: input, shape index: {}]   ;;  %s2110_s5 = inlined_call_operand.vmem [shape: f32[2,32], index: 5, kind: input, shape index: {}]   ;;  %s2111_s6 = inlined_call_operand.hbm [shape: bf16[2,8,32], index: 6, kind: output, shape index: {0}]   ;;  %s2112_s7 = inlined_call_operand.hbm [shape: f32[2,32], index: 7, kind: output, shape index: {1}]   ;;  %s2113_s8 = inlined_call_operand.hbm [shape: f32[2,32], index: 8, kind: output, shape index: {2}]  }
   0x1   :  { %15 = vsyncpa [#allocation9], 0 }
   0x2   :  { %16 = vsyncpa [#allocation7], 0 }
   0x3   :  { %17 = vsyncpa [#allocation13], 0  ;;  %s1737_s27 = smov [#allocation8]   ;;  %s1738_s29 = smov [#allocation5]  }
   0x4   :  { %s35_s28 = sshll.u32 %s1737_s27, 4  ;;  %s23_s30 = sshll.u32 %s1738_s29, 4  ;;  %s36_s28 = int_to_ptr.vmem [resolvable:$true] %s35_s28  ;;  %s24_s30 = int_to_ptr.vmem [resolvable:$true] %s23_s30 }
   0x5   :  { %s1617_s9 = scalar_lea.vmem %s36_s28, 128  ;;  %p1622_p1 = scmp.lt.s32.totalorder %s36_s28, %s36_s28 }
   0x6   :  { %p1618_p0 = scmp.ne.s32.totalorder %s36_s28, %s1617_s9  ;;  %p1623_p2 = scmp.lt.s32.totalorder %s1617_s9, %s1617_s9 }
   0x8   :  { %p1624_p3 = por %p1623_p2, %p1622_p1 }
   0xa   :  { %p1625_p4 = pnand %p1624_p3, %p1618_p0 }
   0xc   :  { %1628 = shalt.err (!%p1625_p4)
}
   0xd   :  { %s1739_s10 = smov 64   ;;  %s1740_s11 = smov 4  }
   0xe   :  { %41 = dma.hbm_to_vmem [thread:$0]  %s2106_s1, 128, %s36_s28, [#allocation9], %s1739_s10, %s1739_s10, %s1740_s11  }
   0xf   :  { %s1637_s14 = scalar_lea.vmem %s24_s30, 128  ;;  %p1642_p6 = scmp.lt.s32.totalorder %s24_s30, %s24_s30 }
  0x10   :  { %p1638_p5 = scmp.ne.s32.totalorder %s24_s30, %s1637_s14  ;;  %p1643_p7 = scmp.lt.s32.totalorder %s1637_s14, %s1637_s14 }
  0x12   :  { %p1644_p8 = por %p1643_p7, %p1642_p6 }
  0x14   :  { %p1645_p9 = pnand %p1644_p8, %p1638_p5 }
  0x16   :  { %1648 = shalt.err (!%p1645_p9)
}
  0x17   :  { %29 = dma.hbm_to_vmem [thread:$0]  %s2105_s0, 128, %s24_s30, [#allocation6], %s1739_s10, %s1739_s10, %s1740_s11  }
  0x18   :  { %s1741_s17 = smov [#allocation10]  }
  0x19   :  { %s47_s18 = sshll.u32 %s1741_s17, 4  ;;  %s48_s18 = int_to_ptr.vmem [resolvable:$true] %s47_s18 }
  0x1a   :  { %s1657_s19 = scalar_lea.vmem %s48_s18, 256  ;;  %p1662_p11 = scmp.lt.s32.totalorder %s48_s18, %s48_s18 }
  0x1b   :  { %p1658_p10 = scmp.ne.s32.totalorder %s48_s18, %s1657_s19  ;;  %p1663_p12 = scmp.lt.s32.totalorder %s1657_s19, %s1657_s19 }
  0x1d   :  { %p1664_p13 = por %p1663_p12, %p1662_p11 }
  0x1f   :  { %p1665_p0 = pnand %p1664_p13, %p1658_p10 }
  0x21   :  { %1668 = shalt.err (!%p1665_p0)
}
  0x22   :  { %53 = dma.hbm_to_vmem [thread:$0]  %s2107_s2, 256, %s48_s18, [#allocation9], %s1739_s10, %s1739_s10, %s1740_s11  }
  0x23   :  { %1729 = dma.done.wait [#allocation6], 128  }
  0x24   :  { %1730 = vsyncadd [#allocation6], 4294967168 }
  0x25   :  { %1731 = dma.done.wait [#allocation9], 384  }
  0x26   :  { %1732 = vsyncadd [#allocation9], 4294966912  ;;  %v1742_v0 = vmov 0.0   ;;  %vm1743_vm0 = vmmov 0   ;;  %v1477_v1 = vld [vmem:[#allocation8] sm:$0xff]   ;;  %v1818_v2 = vld [vmem:[#allocation10 + $0x8] sm:$0xff]  }
  0x27   :  { %1375 = vmatprep.subr.bf16.mxu0 %v1742_v0  ;;  %1381 = vmatprep.subr.bf16.mxu1 %v1742_v0  ;;  %vm101_vm1 = vcmask 130048   ;;  %v1479_v3 = vld [vmem:[#allocation5] sm:$0xff]   ;;  %vm75_vm2 = vcmask 254976   ;;  %v1821_v4 = vld [vmem:[#allocation10] sm:$0xff]   ;;  %v74_v5 = vld [vmem:[%s2109_s4] sm:$0x3] }
  0x28   :  { %1377 = vmatprep.mubr.msk.bf16.mxu0 %vm1743_vm0, %v1742_v0  ;;  %1385 = vmatprep.mubr.msk.bf16.mxu1 %vm1743_vm0, %v1742_v0  ;;  %v77_v6 = vld [vmem:[%s2110_s5] sm:$0x3]  ;;  %76 = vst.msk [vmem:[#allocation3] sm:$0x3] %vm75_vm2, %v74_v5  ;;  %vm169_vm3 = vcmask 261120   ;;  %s1744_s4 = smov 32  }
  0x29   :  { %1376 = vmatpush3.bf16.msra.mxu0 %v1477_v1  ;;  %1382 = vmatpush3.bf16.msra.mxu1 %v1818_v2  ;;  %78 = vst.msk [vmem:[#allocation4] sm:$0x3] %vm75_vm2, %v77_v6  ;;  %v1287_v11 = vld [vmem:[%s2108_s3] ss:$0 sm:$0xff]  ;;  %vm301_vm4 = vcmask 1041409   ;;  %vm289_vm5 = vcmask 253952  }
  0x2a   :  { %1389 = vmatprep.subr.bf16.mxu0 %v1742_v0  ;;  %1383 = vmatprep.subr.bf16.mxu1 %v1742_v0  ;;  %vm290_vm6 = vsmask.f32 256  ;;  %vm551_vm8 = vcmask 254977   ;;  %vm552_vm9 = vsmask.f32 1280  ;;  %vm814_vm11 = vcmask 256002  }
  0x2b   :  { %vm2038_vm7 = vmand %vm289_vm5, %vm290_vm6  ;;  %vm815_vm12 = vsmask.f32 2304  ;;  %vm1077_vm14 = vcmask 257027   ;;  %vm1078_vm15 = vsmask.f32 3328  ;;  %s1745_s3 = smov 96  }
  0x2c   :  { %1378 = vmatmul.mubr.msk.bf16.vlgmr.msra.gmra.mxu0 %vm101_vm1, %v1479_v3  ;;  %vm2045_vm10 = vmand %vm551_vm8, %vm552_vm9  ;;  %vm423_vm1 = vsmask.f32 7938  ;;  %vm949_vm6 = vsmask.f32 7946  ;;  %s1746_s24 = smov [#allocation12]  }
  0x2d   :  { %1390 = vmatpush3.bf16.msra.mxu0 %v1818_v2  ;;  %1393 = vmatprep.mubr.msk.bf16.mxu0 %vm1743_vm0, %v1742_v0  ;;  %vm2056_vm13 = vmand %vm814_vm11, %vm815_vm12  ;;  %s1260_s25 = sshll.u32 %s1746_s24, 4  ;;  %s1261_s25 = int_to_ptr.vmem [resolvable:$true] %s1260_s25 }
  0x2e   :  { %1384 = vmatpush3.bf16.msra.mxu1 %v1821_v4  ;;  %1391 = vmatprep.subr.bf16.mxu0 %v1742_v0  ;;  %vm2080_vm9 = vmand %vm814_vm11, %vm949_vm6  ;;  %s1669_s26 = scalar_lea.vmem %s1261_s25, 32  ;;  %p1674_p2 = scmp.lt.s32.totalorder %s1261_s25, %s1261_s25 }
  0x2f   :  { %1397 = vmatprep.subr.bf16.mxu1 %v1742_v0  ;;  %v152_v7 = vld [vmem:[#allocation3] sm:$0x3]  ;;  %p1670_p1 = scmp.ne.s32.totalorder %s1261_s25, %s1669_s26  ;;  %p1675_p3 = scmp.lt.s32.totalorder %s1669_s26, %s1669_s26 }
  0x30   :  { %v153_v8 = vld [vmem:[#allocation4] sm:$0x3]  ;;  %v156_v9 = vpack.c.bf16 %v152_v7, %v152_v7 }
  0x31   :  { %1392 = vmatpush3.bf16.msra.mxu0 %v1821_v4  ;;  %v234_v10 = vrot.slane %v153_v8, 1  ;;  %p1676_p4 = por %p1675_p3, %p1674_p2 }
  0x32   :  { %1405 = vmatprep.subr.bf16.mxu0 %v1742_v0  ;;  %1386 = vmatmul.mubr.msk.bf16.vlgmr.msra.gmra.mxu1 %vm169_vm3, %v156_v9 }
  0x33   :  { %237 = vrot.lane.b32.xlu1 %v234_v10, %s1744_s4  ;;  %1398 = vmatpush3.bf16.msra.mxu1 %v1818_v2  ;;  %p1677_p5 = pnand %p1676_p4, %p1670_p1 }
  0x34   :  { %1401 = vmatprep.mubr.msk.bf16.mxu1 %vm1743_vm0, %v1742_v0  ;;  %1399 = vmatprep.subr.bf16.mxu1 %v1742_v0 }
  0x37   :  { %235 = vrot.lane.b32.xlu1 %v153_v8, %s1744_s4  ;;  %1400 = vmatpush3.bf16.msra.mxu1 %v1821_v4 }
  0x38   :  { %1413 = vmatprep.subr.bf16.mxu1 %v1742_v0 }
  0xa5   :  { %v238_v41 = vpop.permute.xlu1 %237 }
  0xa9   :  { %v236_v43 = vpop.permute.xlu1 %235 }
  0xec   :  { %v139_v12 = vpop.f32.mrf.mxu0 }
  0xed   :  { %v140_v13 = vadd.f32 %v1287_v11, %v139_v12 }
  0xee   :  { %v1379_v14 = vpop.f32.mrf.mxu0 }
  0xef   :  { %146 = vst [vmem:[#allocation2] sm:$0xff] %v140_v13 }
  0xf0   :  { %v142_v15 = vpop.f32.mrf.mxu0 }
  0xf1   :  { %v143_v16 = vadd.f32 %v1287_v11, %v142_v15 }
  0xf2   :  { %v1380_v17 = vpop.f32.mrf.mxu0  ;;  %v207_v18 = vpop.f32.mrf.mxu1 }
  0xf3   :  { %147 = vst [vmem:[#allocation2 + $0x8] sm:$0xff] %v143_v16  ;;  %v214_v19 = vrot.slane %v207_v18, 1 }
  0xf4   :  { %v1387_v20 = vpop.f32.mrf.mxu1 }
  0xf6   :  { %v154_v21 = vld [vmem:[#allocation2] sm:$0x1]  ;;  %v210_v23 = vpop.f32.mrf.mxu1  ;;  %v298_v63 = vld [vmem:[#allocation2 + $0x1] sm:$0x1] }
  0xf7   :  { %v217_v26 = vadd.f32 %v207_v18, %v154_v21 }
  0xf8   :  { %v1388_v25 = vpop.f32.mrf.mxu1 }
  0xf9   :  { %v1294_v30 = vmul.f32 -1.442695, %v217_v26 }
  0xfa   :  { %v155_v22 = vld [vmem:[#allocation2 + $0x8] sm:$0x1]  ;;  %v299_v6 = vld [vmem:[#allocation2 + $0x9] sm:$0x1] }
  0xfb   :  { %v218_v24 = vadd.f32 %v214_v19, %v155_v22 }
  0xfd   :  { %1481 = vtanh.f32 %v218_v24  ;;  %v1295_v29 = vmul.f32 -1.442695, %v218_v24 }
  0xfe   :  { %1483 = vtanh.f32 %v217_v26 }
  0xff   :  { %1485 = vpow2.f32 %v1295_v29 }
 0x100   :  { %1487 = vpow2.f32 %v1294_v30 }
 0x10a   :  { %v1482_v27 = vpop.eup %1481 }
 0x10b   :  { %247 = vrot.lane.b32.xlu0 %v1482_v27, %s1744_s4  ;;  %v1484_v28 = vpop.eup %1483 }
 0x10c   :  { %v1486_v31 = vpop.eup %1485 }
 0x10d   :  { %v226_v32 = vadd.f32 1.0, %v1486_v31  ;;  %v1488_v33 = vpop.eup %1487 }
 0x10e   :  { %v225_v34 = vadd.f32 1.0, %v1488_v33 }
 0x10f   :  { %245 = vrot.lane.b32.xlu0 %v1484_v28, %s1744_s4  ;;  %1489 = vrcp.f32 %v226_v32 }
 0x110   :  { %1491 = vrcp.f32 %v225_v34 }
 0x11c   :  { %v1490_v35 = vpop.eup %1489 }
 0x11d   :  { %v1492_v38 = vpop.eup %1491  ;;  %v242_v42 = vmul.f32 %v1490_v35, %v238_v41 }
 0x11e   :  { %v241_v46 = vmul.f32 %v1492_v38, %v236_v43 }
 0x17d   :  { %v248_v36 = vpop.permute.xlu0 %247 }
 0x17e   :  { %v252_v37 = vmul.f32 %v1490_v35, %v248_v36 }
 0x180   :  { %257 = vrot.lane.b32.xlu0 %v252_v37, %s1744_s4 }
 0x181   :  { %v246_v39 = vpop.permute.xlu0 %245 }
 0x182   :  { %v251_v40 = vmul.f32 %v1492_v38, %v246_v39 }
 0x184   :  { %255 = vrot.lane.b32.xlu1 %v251_v40, %s1744_s4 }
 0x1f2   :  { %v258_v44 = vpop.permute.xlu0 %257 }
 0x1f3   :  { %v1857_v45 = vadd.f32 %v258_v44, %v242_v42 }
 0x1f5   :  { %1493 = vtanh.f32 %v1857_v45 }
 0x1f6   :  { %v256_v47 = vpop.permute.xlu1 %255 }
 0x1f7   :  { %v261_v48 = vadd.f32 %v256_v47, %v241_v46 }
 0x1f9   :  { %1495 = vtanh.f32 %v261_v48 }
 0x202   :  { %v1494_v49 = vpop.eup %1493 }
 0x203   :  { %269 = vrot.lane.b32.xlu0 %v1494_v49, %s1744_s4 }
 0x206   :  { %v1496_v50 = vpop.eup %1495 }
 0x207   :  { %267 = vrot.lane.b32.xlu1 %v1496_v50, %s1744_s4 }
 0x275   :  { %v270_v51 = vpop.permute.xlu0 %269 }
 0x276   :  { %v274_v52 = vmul.f32 %v1490_v35, %v270_v51 }
 0x278   :  { %v1862_v53 = vpack.c.bf16 %v274_v52, %v274_v52  ;;  %v432_v52 = vld [vmem:[#allocation2 + $0xa] sm:$0x1] }
 0x279   :  { %v268_v54 = vpop.permute.xlu1 %267 }
 0x27a   :  { %v280_v55 = vunpack.c.l.b16 %v1862_v53  ;;  %v273_v56 = vmul.f32 %v1492_v38, %v268_v54 }
 0x27c   :  { %v1865_v57 = vpack.c.bf16 %v273_v56, %v273_v56  ;;  %v300_v58 = vrot.slane %v280_v55, 7 }
 0x27e   :  { %v279_v59 = vunpack.c.l.b16 %v1865_v57 }
 0x280   :  { %v302_v60 = vsel %vm301_vm4, %v300_v58, %v279_v59 }
 0x281   :  { %v303_v61 = vpack.c.b16 %v302_v60, %v302_v60 }
 0x283   :  { %304 = vrot.lane.b32.xlu0 %v303_v61, %s1739_s10 }
 0x2f5   :  { %v305_v62 = vpop.permute.xlu0 %304 }
 0x2f6   :  { %1394 = vmatmul.mubr.msk.bf16.vlgmr.msra.gmra.mxu0 %vm169_vm3, %v305_v62 }
 0x2f7   :  { %1406 = vmatpush3.bf16.msra.mxu0 %v1818_v2  ;;  %1409 = vmatprep.mubr.msk.bf16.mxu0 %vm1743_vm0, %v1742_v0 }
 0x2f8   :  { %1407 = vmatprep.subr.bf16.mxu0 %v1742_v0 }
 0x2fb   :  { %1408 = vmatpush3.bf16.msra.mxu0 %v1821_v4 }
 0x2fc   :  { %1421 = vmatprep.subr.bf16.mxu0 %v1742_v0 }
 0x3b6   :  { %v343_v1 = vpop.f32.mrf.mxu0 }
 0x3b7   :  { %v350_v3 = vrot.slane %v343_v1, 1  ;;  %v353_v5 = vadd.f32 %v343_v1, %v298_v63 }
 0x3b8   :  { %v1395_v7 = vpop.f32.mrf.mxu0 }
 0x3b9   :  { %v354_v8 = vadd.f32 %v350_v3, %v299_v6  ;;  %1497 = vtanh.f32 %v353_v5  ;;  %v1299_v13 = vmul.f32 -1.442695, %v353_v5 }
 0x3ba   :  { %v346_v9 = vpop.f32.mrf.mxu0 }
 0x3bb   :  { %1499 = vtanh.f32 %v354_v8  ;;  %v1300_v14 = vmul.f32 -1.442695, %v354_v8 }
 0x3bc   :  { %v1396_v10 = vpop.f32.mrf.mxu0  ;;  %1501 = vpow2.f32 %v1299_v13 }
 0x3bd   :  { %1503 = vpow2.f32 %v1300_v14 }
 0x3c6   :  { %v1498_v11 = vpop.eup %1497 }
 0x3c7   :  { %373 = vrot.lane.b32.xlu0 %v1498_v11, %s1744_s4 }
 0x3c8   :  { %v1500_v12 = vpop.eup %1499 }
 0x3c9   :  { %375 = vrot.lane.b32.xlu1 %v1500_v12, %s1744_s4  ;;  %v1502_v15 = vpop.eup %1501 }
 0x3ca   :  { %v1504_v16 = vpop.eup %1503  ;;  %v361_v17 = vadd.f32 1.0, %v1502_v15 }
 0x3cb   :  { %v362_v18 = vadd.f32 1.0, %v1504_v16 }
 0x3cc   :  { %1505 = vrcp.f32 %v361_v17 }
 0x3cd   :  { %1507 = vrcp.f32 %v362_v18 }
 0x3d9   :  { %v1506_v19 = vpop.eup %1505 }
 0x3da   :  { %v1508_v22 = vpop.eup %1507  ;;  %v369_v25 = vmul.f32 %v1506_v19, %v261_v48  ;;  %v431_v48 = vld [vmem:[#allocation2 + $0x2] sm:$0x1] }
 0x3db   :  { %v370_v28 = vmul.f32 %v1508_v22, %v1857_v45 }
 0x439   :  { %v374_v20 = vpop.permute.xlu0 %373 }
 0x43a   :  { %v379_v21 = vmul.f32 %v1506_v19, %v374_v20 }
 0x43b   :  { %v376_v23 = vpop.permute.xlu1 %375 }
 0x43c   :  { %383 = vrot.lane.b32.xlu0 %v379_v21, %s1744_s4  ;;  %v380_v24 = vmul.f32 %v1508_v22, %v376_v23 }
 0x43e   :  { %385 = vrot.lane.b32.xlu1 %v380_v24, %s1744_s4 }
 0x4ae   :  { %v384_v26 = vpop.permute.xlu0 %383 }
 0x4af   :  { %v1881_v27 = vadd.f32 %v384_v26, %v369_v25 }
 0x4b0   :  { %v386_v29 = vpop.permute.xlu1 %385 }
 0x4b1   :  { %1509 = vtanh.f32 %v1881_v27  ;;  %v1885_v30 = vadd.f32 %v386_v29, %v370_v28 }
 0x4b3   :  { %1511 = vtanh.f32 %v1885_v30 }
 0x4be   :  { %v1510_v31 = vpop.eup %1509 }
 0x4bf   :  { %395 = vrot.lane.b32.xlu0 %v1510_v31, %s1744_s4 }
 0x4c0   :  { %v1512_v32 = vpop.eup %1511 }
 0x4c1   :  { %397 = vrot.lane.b32.xlu1 %v1512_v32, %s1744_s4  ;;  %v560_v32 = vld [vmem:[#allocation2 + $0x3] sm:$0x1] }
 0x531   :  { %v396_v33 = vpop.permute.xlu0 %395 }
 0x532   :  { %v401_v34 = vmul.f32 %v1506_v19, %v396_v33 }
 0x533   :  { %v398_v35 = vpop.permute.xlu1 %397 }
 0x534   :  { %v403_v36 = vpack.c.bf16 %v401_v34, %v401_v34  ;;  %v402_v37 = vmul.f32 %v1508_v22, %v398_v35 }
 0x536   :  { %v404_v38 = vpack.c.bf16 %v402_v37, %v402_v37  ;;  %v412_v39 = vshll.u32 %v403_v36, 16  ;;  %v407_v42 = vunpack.c.l.b16 %v403_v36  ;;  %v561_v36 = vld [vmem:[#allocation2 + $0xb] sm:$0x1] }
 0x538   :  { %v408_v40 = vunpack.c.l.b16 %v404_v38  ;;  %v415_v41 = vshll.u32 %v404_v38, 16 }
 0x53a   :  { %v433_v43 = vrot.slane %v408_v40, 7  ;;  %v1890_v44 = vpack.i.bf16 %v415_v41, %v412_v39 }
 0x53c   :  { %v434_v45 = vsel %vm301_vm4, %v433_v43, %v407_v42 }
 0x53d   :  { %v435_v46 = vpack.c.b16 %v434_v45, %v434_v45 }
 0x53f   :  { %436 = vrot.lane.b32.xlu1 %v435_v46, %s1739_s10 }
 0x5b1   :  { %v437_v47 = vpop.permute.xlu1 %436 }
 0x5b2   :  { %1402 = vmatmul.mubr.msk.bf16.vlgmr.msra.gmra.mxu1 %vm169_vm3, %v437_v47 }
 0x5b3   :  { %1414 = vmatpush3.bf16.msra.mxu1 %v1818_v2  ;;  %1417 = vmatprep.mubr.msk.bf16.mxu1 %vm1743_vm0, %v1742_v0 }
 0x5b4   :  { %1415 = vmatprep.subr.bf16.mxu1 %v1742_v0 }
 0x5b7   :  { %1416 = vmatpush3.bf16.msra.mxu1 %v1821_v4 }
 0x5b8   :  { %1429 = vmatprep.subr.bf16.mxu1 %v1742_v0 }
 0x672   :  { %v475_v49 = vpop.f32.mrf.mxu1 }
 0x673   :  { %v482_v50 = vrot.slane %v475_v49, 1  ;;  %v485_v51 = vadd.f32 %v475_v49, %v431_v48 }
 0x674   :  { %v1403_v54 = vpop.f32.mrf.mxu1 }
 0x675   :  { %v486_v55 = vadd.f32 %v482_v50, %v432_v52  ;;  %1513 = vtanh.f32 %v485_v51  ;;  %v1304_v61 = vmul.f32 -1.442695, %v485_v51 }
 0x676   :  { %v478_v56 = vpop.f32.mrf.mxu1 }
 0x677   :  { %1515 = vtanh.f32 %v486_v55  ;;  %v1305_v62 = vmul.f32 -1.442695, %v486_v55 }
 0x678   :  { %v1404_v58 = vpop.f32.mrf.mxu1  ;;  %1517 = vpow2.f32 %v1304_v61 }
 0x679   :  { %1519 = vpow2.f32 %v1305_v62 }
 0x682   :  { %v1514_v59 = vpop.eup %1513 }
 0x683   :  { %505 = vrot.lane.b32.xlu1 %v1514_v59, %s1744_s4 }
 0x684   :  { %v1516_v60 = vpop.eup %1515 }
 0x685   :  { %507 = vrot.lane.b32.xlu0 %v1516_v60, %s1744_s4  ;;  %v1518_v63 = vpop.eup %1517 }
 0x686   :  { %v1520_v1 = vpop.eup %1519  ;;  %v493_v3 = vadd.f32 1.0, %v1518_v63 }
 0x687   :  { %v494_v5 = vadd.f32 1.0, %v1520_v1 }
 0x688   :  { %1521 = vrcp.f32 %v493_v3 }
 0x689   :  { %1523 = vrcp.f32 %v494_v5 }
 0x695   :  { %v1522_v6 = vpop.eup %1521 }
 0x696   :  { %v1524_v9 = vpop.eup %1523  ;;  %v501_v12 = vmul.f32 %v1522_v6, %v1881_v27 }
 0x697   :  { %v502_v15 = vmul.f32 %v1524_v9, %v1885_v30 }
 0x6f5   :  { %v506_v7 = vpop.permute.xlu1 %505 }
 0x6f6   :  { %v511_v8 = vmul.f32 %v1522_v6, %v506_v7 }
 0x6f7   :  { %v508_v10 = vpop.permute.xlu0 %507 }
 0x6f8   :  { %515 = vrot.lane.b32.xlu1 %v511_v8, %s1744_s4  ;;  %v512_v11 = vmul.f32 %v1524_v9, %v508_v10 }
 0x6fa   :  { %517 = vrot.lane.b32.xlu0 %v512_v11, %s1744_s4 }
 0x76a   :  { %v516_v13 = vpop.permute.xlu1 %515 }
 0x76b   :  { %v521_v14 = vadd.f32 %v516_v13, %v501_v12 }
 0x76c   :  { %v518_v16 = vpop.permute.xlu0 %517 }
 0x76d   :  { %1525 = vtanh.f32 %v521_v14  ;;  %v522_v17 = vadd.f32 %v518_v16, %v502_v15 }
 0x76f   :  { %1527 = vtanh.f32 %v522_v17 }
 0x77a   :  { %v1526_v18 = vpop.eup %1525 }
 0x77b   :  { %527 = vrot.lane.b32.xlu1 %v1526_v18, %s1744_s4 }
 0x77c   :  { %v1528_v19 = vpop.eup %1527 }
 0x77d   :  { %529 = vrot.lane.b32.xlu0 %v1528_v19, %s1744_s4 }
 0x7ed   :  { %v528_v20 = vpop.permute.xlu1 %527 }
 0x7ee   :  { %v533_v21 = vmul.f32 %v1522_v6, %v528_v20 }
 0x7ef   :  { %v530_v22 = vpop.permute.xlu0 %529 }
 0x7f0   :  { %v534_v23 = vmul.f32 %v1524_v9, %v530_v22  ;;  %v1909_v24 = vpack.c.bf16 %v533_v21, %v533_v21  ;;  %v694_v22 = vld [vmem:[#allocation2 + $0x4] sm:$0x1] }
 0x7f2   :  { %v1911_v25 = vpack.c.bf16 %v534_v23, %v534_v23  ;;  %v539_v27 = vunpack.c.l.b16 %v1909_v24 }
 0x7f4   :  { %v540_v26 = vunpack.c.l.b16 %v1911_v25 }
 0x7f6   :  { %v562_v28 = vrot.slane %v540_v26, 7 }
 0x7f8   :  { %v563_v29 = vsel %vm301_vm4, %v562_v28, %v539_v27  ;;  %v695_v28 = vld [vmem:[#allocation2 + $0xc] sm:$0x1] }
 0x7f9   :  { %v564_v30 = vpack.c.b16 %v563_v29, %v563_v29 }
 0x7fb   :  { %565 = vrot.lane.b32.xlu0 %v564_v30, %s1739_s10 }
 0x86d   :  { %v566_v31 = vpop.permute.xlu0 %565 }
 0x86e   :  { %1410 = vmatmul.mubr.msk.bf16.vlgmr.msra.gmra.mxu0 %vm169_vm3, %v566_v31 }
 0x86f   :  { %1422 = vmatpush3.bf16.msra.mxu0 %v1818_v2  ;;  %1425 = vmatprep.mubr.msk.bf16.mxu0 %vm1743_vm0, %v1742_v0 }
 0x870   :  { %1423 = vmatprep.subr.bf16.mxu0 %v1742_v0 }
 0x873   :  { %1424 = vmatpush3.bf16.msra.mxu0 %v1821_v4 }
 0x874   :  { %1437 = vmatprep.subr.bf16.mxu0 %v1742_v0 }
 0x92e   :  { %v604_v33 = vpop.f32.mrf.mxu0 }
 0x92f   :  { %v611_v34 = vrot.slane %v604_v33, 1  ;;  %v614_v35 = vadd.f32 %v604_v33, %v560_v32 }
 0x930   :  { %v1411_v37 = vpop.f32.mrf.mxu0 }
 0x931   :  { %v615_v38 = vadd.f32 %v611_v34, %v561_v36  ;;  %1529 = vtanh.f32 %v614_v35  ;;  %v1309_v43 = vmul.f32 -1.442695, %v614_v35 }
 0x932   :  { %v607_v39 = vpop.f32.mrf.mxu0 }
 0x933   :  { %1531 = vtanh.f32 %v615_v38  ;;  %v1310_v45 = vmul.f32 -1.442695, %v615_v38 }
 0x934   :  { %v1412_v40 = vpop.f32.mrf.mxu0  ;;  %1533 = vpow2.f32 %v1309_v43 }
 0x935   :  { %1535 = vpow2.f32 %v1310_v45 }
 0x93e   :  { %v1530_v41 = vpop.eup %1529 }
 0x93f   :  { %634 = vrot.lane.b32.xlu0 %v1530_v41, %s1744_s4 }
 0x940   :  { %v1532_v42 = vpop.eup %1531 }
 0x941   :  { %636 = vrot.lane.b32.xlu1 %v1532_v42, %s1744_s4  ;;  %v1534_v46 = vpop.eup %1533 }
 0x942   :  { %v1536_v47 = vpop.eup %1535  ;;  %v622_v48 = vadd.f32 1.0, %v1534_v46 }
 0x943   :  { %v623_v49 = vadd.f32 1.0, %v1536_v47 }
 0x944   :  { %1537 = vrcp.f32 %v622_v48 }
 0x945   :  { %1539 = vrcp.f32 %v623_v49 }
 0x951   :  { %v1538_v50 = vpop.eup %1537 }
 0x952   :  { %v1540_v54 = vpop.eup %1539  ;;  %v630_v58 = vmul.f32 %v1538_v50, %v521_v14 }
 0x953   :  { %v631_v61 = vmul.f32 %v1540_v54, %v522_v17 }
 0x9b1   :  { %v635_v51 = vpop.permute.xlu0 %634 }
 0x9b2   :  { %v640_v52 = vmul.f32 %v1538_v50, %v635_v51 }
 0x9b3   :  { %v637_v55 = vpop.permute.xlu1 %636 }
 0x9b4   :  { %644 = vrot.lane.b32.xlu0 %v640_v52, %s1744_s4  ;;  %v641_v56 = vmul.f32 %v1540_v54, %v637_v55 }
 0x9b6   :  { %646 = vrot.lane.b32.xlu1 %v641_v56, %s1744_s4 }
 0xa26   :  { %v645_v59 = vpop.permute.xlu0 %644 }
 0xa27   :  { %v1928_v60 = vadd.f32 %v645_v59, %v630_v58 }
 0xa28   :  { %v647_v62 = vpop.permute.xlu1 %646 }
 0xa29   :  { %1541 = vtanh.f32 %v1928_v60  ;;  %v1931_v63 = vadd.f32 %v647_v62, %v631_v61 }
 0xa2b   :  { %1543 = vtanh.f32 %v1931_v63 }
 0xa36   :  { %v1542_v1 = vpop.eup %1541 }
 0xa37   :  { %656 = vrot.lane.b32.xlu0 %v1542_v1, %s1744_s4 }
 0xa38   :  { %v1544_v3 = vpop.eup %1543 }
 0xa39   :  { %658 = vrot.lane.b32.xlu1 %v1544_v3, %s1744_s4 }
 0xaa9   :  { %v657_v5 = vpop.permute.xlu0 %656 }
 0xaaa   :  { %v662_v6 = vmul.f32 %v1538_v50, %v657_v5 }
 0xaab   :  { %v659_v8 = vpop.permute.xlu1 %658 }
 0xaac   :  { %v664_v7 = vpack.c.bf16 %v662_v6, %v662_v6  ;;  %v663_v9 = vmul.f32 %v1540_v54, %v659_v8 }
 0xaae   :  { %v673_v10 = vshll.u32 %v664_v7, 16  ;;  %v665_v11 = vpack.c.bf16 %v663_v9, %v663_v9  ;;  %v668_v14 = vunpack.c.l.b16 %v664_v7  ;;  %v823_v9 = vld [vmem:[#allocation2 + $0x5] sm:$0x1] }
 0xab0   :  { %v669_v12 = vunpack.c.l.b16 %v665_v11  ;;  %v677_v13 = vshll.u32 %v665_v11, 16  ;;  %v1936_v16 = vrot.slane %v673_v10, 7 }
 0xab2   :  { %v696_v15 = vrot.slane %v669_v12, 7  ;;  %v1938_v17 = vrot.slane %v677_v13, 7  ;;  %v824_v13 = vld [vmem:[#allocation2 + $0xd] sm:$0x1] }
 0xab4   :  { %v697_v18 = vsel %vm301_vm4, %v696_v15, %v668_v14  ;;  %v1462_v19 = vpack.i.bf16 %v1938_v17, %v1936_v16 }
 0xab5   :  { %v698_v20 = vpack.c.b16 %v697_v18, %v697_v18 }
 0xab7   :  { %699 = vrot.lane.b32.xlu1 %v698_v20, %s1739_s10 }
 0xb29   :  { %v700_v21 = vpop.permute.xlu1 %699 }
 0xb2a   :  { %1418 = vmatmul.mubr.msk.bf16.vlgmr.msra.gmra.mxu1 %vm169_vm3, %v700_v21 }
 0xb2b   :  { %1430 = vmatpush3.bf16.msra.mxu1 %v1818_v2  ;;  %1433 = vmatprep.mubr.msk.bf16.mxu1 %vm1743_vm0, %v1742_v0 }
 0xb2c   :  { %1431 = vmatprep.subr.bf16.mxu1 %v1742_v0 }
 0xb2f   :  { %1432 = vmatpush3.bf16.msra.mxu1 %v1821_v4 }
 0xbea   :  { %v738_v23 = vpop.f32.mrf.mxu1 }
 0xbeb   :  { %v745_v26 = vrot.slane %v738_v23, 1  ;;  %v748_v27 = vadd.f32 %v738_v23, %v694_v22 }
 0xbec   :  { %v1419_v29 = vpop.f32.mrf.mxu1 }
 0xbed   :  { %v749_v30 = vadd.f32 %v745_v26, %v695_v28  ;;  %1545 = vtanh.f32 %v748_v27  ;;  %v1314_v35 = vmul.f32 -1.442695, %v748_v27 }
 0xbee   :  { %v741_v31 = vpop.f32.mrf.mxu1 }
 0xbef   :  { %1547 = vtanh.f32 %v749_v30  ;;  %v1315_v36 = vmul.f32 -1.442695, %v749_v30 }
 0xbf0   :  { %v1420_v32 = vpop.f32.mrf.mxu1  ;;  %1549 = vpow2.f32 %v1314_v35 }
 0xbf1   :  { %1551 = vpow2.f32 %v1315_v36 }
 0xbfa   :  { %v1546_v33 = vpop.eup %1545 }
 0xbfb   :  { %768 = vrot.lane.b32.xlu1 %v1546_v33, %s1744_s4 }
 0xbfc   :  { %v1548_v34 = vpop.eup %1547 }
 0xbfd   :  { %770 = vrot.lane.b32.xlu0 %v1548_v34, %s1744_s4  ;;  %v1550_v37 = vpop.eup %1549 }
 0xbfe   :  { %v1552_v38 = vpop.eup %1551  ;;  %v756_v39 = vadd.f32 1.0, %v1550_v37 }
 0xbff   :  { %v757_v40 = vadd.f32 1.0, %v1552_v38 }
 0xc00   :  { %1553 = vrcp.f32 %v756_v39 }
 0xc01   :  { %1555 = vrcp.f32 %v757_v40 }
 0xc0d   :  { %v1554_v41 = vpop.eup %1553 }
 0xc0e   :  { %v1556_v45 = vpop.eup %1555  ;;  %v764_v48 = vmul.f32 %v1554_v41, %v1928_v60 }
 0xc0f   :  { %v765_v51 = vmul.f32 %v1556_v45, %v1931_v63 }
 0xc6d   :  { %v769_v42 = vpop.permute.xlu1 %768 }
 0xc6e   :  { %v774_v43 = vmul.f32 %v1554_v41, %v769_v42 }
 0xc6f   :  { %v771_v46 = vpop.permute.xlu0 %770 }
 0xc70   :  { %778 = vrot.lane.b32.xlu1 %v774_v43, %s1744_s4  ;;  %v775_v47 = vmul.f32 %v1556_v45, %v771_v46 }
 0xc72   :  { %780 = vrot.lane.b32.xlu0 %v775_v47, %s1744_s4 }
 0xce2   :  { %v779_v49 = vpop.permute.xlu1 %778 }
 0xce3   :  { %v784_v50 = vadd.f32 %v779_v49, %v764_v48 }
 0xce4   :  { %v781_v52 = vpop.permute.xlu0 %780 }
 0xce5   :  { %1557 = vtanh.f32 %v784_v50  ;;  %v785_v54 = vadd.f32 %v781_v52, %v765_v51 }
 0xce7   :  { %1559 = vtanh.f32 %v785_v54 }
 0xcf2   :  { %v1558_v55 = vpop.eup %1557 }
 0xcf3   :  { %790 = vrot.lane.b32.xlu1 %v1558_v55, %s1744_s4 }
 0xcf4   :  { %v1560_v56 = vpop.eup %1559 }
 0xcf5   :  { %792 = vrot.lane.b32.xlu0 %v1560_v56, %s1744_s4 }
 0xd65   :  { %v791_v58 = vpop.permute.xlu1 %790 }
 0xd66   :  { %v796_v59 = vmul.f32 %v1554_v41, %v791_v58 }
 0xd67   :  { %v793_v61 = vpop.permute.xlu0 %792 }
 0xd68   :  { %v797_v62 = vmul.f32 %v1556_v45, %v793_v61  ;;  %v1958_v1 = vpack.c.bf16 %v796_v59, %v796_v59 }
 0xd6a   :  { %v1960_v60 = vpack.c.bf16 %v797_v62, %v797_v62  ;;  %v802_v3 = vunpack.c.l.b16 %v1958_v1 }
 0xd6c   :  { %v803_v63 = vunpack.c.l.b16 %v1960_v60 }
 0xd6e   :  { %v825_v5 = vrot.slane %v803_v63, 7  ;;  %v957_v63 = vld [vmem:[#allocation2 + $0x6] sm:$0x1] }
 0xd70   :  { %v826_v6 = vsel %vm301_vm4, %v825_v5, %v802_v3 }
 0xd71   :  { %v827_v7 = vpack.c.b16 %v826_v6, %v826_v6 }
 0xd73   :  { %828 = vrot.lane.b32.xlu0 %v827_v7, %s1739_s10  ;;  %v958_v7 = vld [vmem:[#allocation2 + $0xe] sm:$0x1] }
 0xde5   :  { %v829_v8 = vpop.permute.xlu0 %828 }
 0xde6   :  { %1426 = vmatmul.mubr.msk.bf16.vlgmr.msra.gmra.mxu0 %vm169_vm3, %v829_v8 }
 0xde7   :  { %1438 = vmatpush3.bf16.msra.mxu0 %v1818_v2  ;;  %1441 = vmatprep.mubr.msk.bf16.mxu0 %vm1743_vm0, %v1742_v0  ;;  %vm2066_vm0 = vmand %vm1077_vm14, %vm1078_vm15 }
 0xde8   :  { %1439 = vmatprep.subr.bf16.mxu0 %v1742_v0 }
 0xdeb   :  { %1440 = vmatpush3.bf16.msra.mxu0 %v1821_v4 }
 0xea6   :  { %v867_v10 = vpop.f32.mrf.mxu0 }
 0xea7   :  { %v874_v11 = vrot.slane %v867_v10, 1  ;;  %v877_v12 = vadd.f32 %v867_v10, %v823_v9 }
 0xea8   :  { %v1427_v14 = vpop.f32.mrf.mxu0 }
 0xea9   :  { %v878_v15 = vadd.f32 %v874_v11, %v824_v13  ;;  %1561 = vtanh.f32 %v877_v12  ;;  %v1319_v0 = vmul.f32 -1.442695, %v877_v12 }
 0xeaa   :  { %v870_v18 = vpop.f32.mrf.mxu0 }
 0xeab   :  { %1563 = vtanh.f32 %v878_v15  ;;  %v1320_v22 = vmul.f32 -1.442695, %v878_v15 }
 0xeac   :  { %v1428_v20 = vpop.f32.mrf.mxu0  ;;  %1565 = vpow2.f32 %v1319_v0 }
 0xead   :  { %1567 = vpow2.f32 %v1320_v22 }
 0xeb6   :  { %v1562_v21 = vpop.eup %1561 }
 0xeb7   :  { %897 = vrot.lane.b32.xlu0 %v1562_v21, %s1744_s4 }
 0xeb8   :  { %v1564_v2 = vpop.eup %1563 }
 0xeb9   :  { %899 = vrot.lane.b32.xlu1 %v1564_v2, %s1744_s4  ;;  %v1566_v4 = vpop.eup %1565 }
 0xeba   :  { %v1568_v23 = vpop.eup %1567  ;;  %v885_v26 = vadd.f32 1.0, %v1566_v4 }
 0xebb   :  { %v886_v27 = vadd.f32 1.0, %v1568_v23 }
 0xebc   :  { %1569 = vrcp.f32 %v885_v26 }
 0xebd   :  { %1571 = vrcp.f32 %v886_v27 }
 0xec9   :  { %v1570_v28 = vpop.eup %1569 }
 0xeca   :  { %v1572_v31 = vpop.eup %1571  ;;  %v893_v34 = vmul.f32 %v1570_v28, %v784_v50 }
 0xecb   :  { %v894_v37 = vmul.f32 %v1572_v31, %v785_v54 }
 0xf29   :  { %v898_v29 = vpop.permute.xlu0 %897 }
 0xf2a   :  { %v903_v30 = vmul.f32 %v1570_v28, %v898_v29 }
 0xf2b   :  { %v900_v32 = vpop.permute.xlu1 %899 }
 0xf2c   :  { %907 = vrot.lane.b32.xlu0 %v903_v30, %s1744_s4  ;;  %v904_v33 = vmul.f32 %v1572_v31, %v900_v32 }
 0xf2e   :  { %909 = vrot.lane.b32.xlu1 %v904_v33, %s1744_s4 }
 0xf9e   :  { %v908_v35 = vpop.permute.xlu0 %907 }
 0xf9f   :  { %v913_v36 = vadd.f32 %v908_v35, %v893_v34 }
 0xfa0   :  { %v910_v38 = vpop.permute.xlu1 %909 }
 0xfa1   :  { %1573 = vtanh.f32 %v913_v36  ;;  %v914_v39 = vadd.f32 %v910_v38, %v894_v37 }
 0xfa3   :  { %1575 = vtanh.f32 %v914_v39 }
 0xfae   :  { %v1574_v40 = vpop.eup %1573 }
 0xfaf   :  { %919 = vrot.lane.b32.xlu0 %v1574_v40, %s1744_s4 }
 0xfb0   :  { %v1576_v41 = vpop.eup %1575 }
 0xfb1   :  { %921 = vrot.lane.b32.xlu1 %v1576_v41, %s1744_s4 }
0x1021   :  { %v920_v42 = vpop.permute.xlu0 %919 }
0x1022   :  { %v925_v43 = vmul.f32 %v1570_v28, %v920_v42 }
0x1023   :  { %v922_v46 = vpop.permute.xlu1 %921 }
0x1024   :  { %v927_v45 = vpack.c.bf16 %v925_v43, %v925_v43  ;;  %v926_v47 = vmul.f32 %v1572_v31, %v922_v46 }
0x1026   :  { %v936_v48 = vshll.u32 %v927_v45, 16  ;;  %v928_v49 = vpack.c.bf16 %v926_v47, %v926_v47  ;;  %v931_v52 = vunpack.c.l.b16 %v927_v45 }
0x1028   :  { %v932_v50 = vunpack.c.l.b16 %v928_v49  ;;  %v940_v51 = vshll.u32 %v928_v49, 16  ;;  %v1978_v55 = vrot.slane %v936_v48, 6  ;;  %v1086_v49 = vld [vmem:[#allocation2 + $0x7] sm:$0x1] }
0x102a   :  { %v959_v54 = vrot.slane %v932_v50, 7  ;;  %v1980_v56 = vrot.slane %v940_v51, 6 }
0x102c   :  { %v960_v58 = vsel %vm301_vm4, %v959_v54, %v931_v52  ;;  %v1467_v59 = vpack.i.bf16 %v1980_v56, %v1978_v55  ;;  %v1087_v54 = vld [vmem:[#allocation2 + $0xf] sm:$0x1]  ;;  %v295_v55 = vld [vmem:[#allocation11 + $0x4] sm:$0x1] }
0x102d   :  { %v961_v61 = vpack.c.b16 %v960_v58, %v960_v58 }
0x102f   :  { %962 = vrot.lane.b32.xlu1 %v961_v61, %s1739_s10 }
0x10a1   :  { %v963_v62 = vpop.permute.xlu1 %962 }
0x10a2   :  { %1434 = vmatmul.mubr.msk.bf16.vlgmr.msra.gmra.mxu1 %vm169_vm3, %v963_v62 }
0x1162   :  { %v1001_v3 = vpop.f32.mrf.mxu1 }
0x1163   :  { %v1008_v5 = vrot.slane %v1001_v3, 1  ;;  %v1011_v6 = vadd.f32 %v1001_v3, %v957_v63 }
0x1164   :  { %v1435_v8 = vpop.f32.mrf.mxu1 }
0x1165   :  { %v1012_v9 = vadd.f32 %v1008_v5, %v958_v7  ;;  %1577 = vtanh.f32 %v1011_v6  ;;  %v1324_v14 = vmul.f32 -1.442695, %v1011_v6 }
0x1166   :  { %v1004_v10 = vpop.f32.mrf.mxu1 }
0x1167   :  { %1579 = vtanh.f32 %v1012_v9  ;;  %v1325_v15 = vmul.f32 -1.442695, %v1012_v9 }
0x1168   :  { %v1436_v11 = vpop.f32.mrf.mxu1  ;;  %1581 = vpow2.f32 %v1324_v14 }
0x1169   :  { %1583 = vpow2.f32 %v1325_v15 }
0x1172   :  { %v1578_v12 = vpop.eup %1577 }
0x1173   :  { %1031 = vrot.lane.b32.xlu1 %v1578_v12, %s1744_s4 }
0x1174   :  { %v1580_v13 = vpop.eup %1579 }
0x1175   :  { %1033 = vrot.lane.b32.xlu0 %v1580_v13, %s1744_s4  ;;  %v1582_v18 = vpop.eup %1581 }
0x1176   :  { %v1584_v20 = vpop.eup %1583  ;;  %v1019_v21 = vadd.f32 1.0, %v1582_v18 }
0x1177   :  { %v1020_v2 = vadd.f32 1.0, %v1584_v20 }
0x1178   :  { %1585 = vrcp.f32 %v1019_v21 }
0x1179   :  { %1587 = vrcp.f32 %v1020_v2 }
0x1185   :  { %v1586_v0 = vpop.eup %1585 }
0x1186   :  { %v1588_v23 = vpop.eup %1587  ;;  %v1027_v28 = vmul.f32 %v1586_v0, %v913_v36 }
0x1187   :  { %v1028_v31 = vmul.f32 %v1588_v23, %v914_v39 }
0x11e5   :  { %v1032_v22 = vpop.permute.xlu1 %1031 }
0x11e6   :  { %v1037_v4 = vmul.f32 %v1586_v0, %v1032_v22 }
0x11e7   :  { %v1034_v26 = vpop.permute.xlu0 %1033 }
0x11e8   :  { %1041 = vrot.lane.b32.xlu1 %v1037_v4, %s1744_s4  ;;  %v1038_v27 = vmul.f32 %v1588_v23, %v1034_v26 }
0x11ea   :  { %1043 = vrot.lane.b32.xlu0 %v1038_v27, %s1744_s4 }
0x125a   :  { %v1042_v29 = vpop.permute.xlu1 %1041 }
0x125b   :  { %v1047_v30 = vadd.f32 %v1042_v29, %v1027_v28 }
0x125c   :  { %v1044_v32 = vpop.permute.xlu0 %1043 }
0x125d   :  { %1589 = vtanh.f32 %v1047_v30  ;;  %v1048_v33 = vadd.f32 %v1044_v32, %v1028_v31  ;;  %v544_v31 = vrot.slane %v1911_v25, 7  ;;  %v806_v32 = vrot.slane %v1958_v1, 6 }
0x125f   :  { %1591 = vtanh.f32 %v1048_v33 }
0x126a   :  { %v1590_v34 = vpop.eup %1589 }
0x126b   :  { %1053 = vrot.lane.b32.xlu1 %v1590_v34, %s1744_s4 }
0x126c   :  { %v1592_v35 = vpop.eup %1591 }
0x126d   :  { %1055 = vrot.lane.b32.xlu0 %v1592_v35, %s1744_s4 }
0x12dd   :  { %v1054_v37 = vpop.permute.xlu1 %1053 }
0x12de   :  { %v1059_v38 = vmul.f32 %v1586_v0, %v1054_v37 }
0x12df   :  { %v1056_v40 = vpop.permute.xlu0 %1055 }
0x12e0   :  { %v1060_v41 = vmul.f32 %v1588_v23, %v1056_v40  ;;  %v1993_v42 = vpack.c.bf16 %v1059_v38, %v1059_v38  ;;  %v554_v38 = vld [vmem:[#allocation11] sm:$0x2] }
0x12e2   :  { %v1995_v36 = vpack.c.bf16 %v1060_v41, %v1060_v41  ;;  %v1065_v43 = vunpack.c.l.b16 %v1993_v42  ;;  %v1069_v34 = vrot.slane %v1993_v42, 5 }
0x12e4   :  { %v1066_v39 = vunpack.c.l.b16 %v1995_v36 }
0x12e6   :  { %v1088_v45 = vrot.slane %v1066_v39, 7 }
0x12e8   :  { %v1089_v46 = vsel %vm301_vm4, %v1088_v45, %v1065_v43  ;;  %v557_v45 = vld [vmem:[#allocation11 + $0x4] sm:$0x2] }
0x12e9   :  { %v1090_v47 = vpack.c.b16 %v1089_v46, %v1089_v46 }
0x12eb   :  { %1091 = vrot.lane.b32.xlu0 %v1090_v47, %s1739_s10  ;;  %v817_v47 = vld [vmem:[#allocation11] sm:$0x4] }
0x135d   :  { %v1092_v48 = vpop.permute.xlu0 %1091 }
0x135e   :  { %1442 = vmatmul.mubr.msk.bf16.vlgmr.msra.gmra.mxu0 %vm169_vm3, %v1092_v48  ;;  %vm424_vm3 = vmand %vm289_vm5, %vm423_vm1  ;;  %vm1212_vm5 = vsmask.f32 7950 }
0x141e   :  { %v1130_v50 = vpop.f32.mrf.mxu0 }
0x141f   :  { %v1137_v51 = vrot.slane %v1130_v50, 1  ;;  %v1140_v52 = vadd.f32 %v1130_v50, %v1086_v49 }
0x1420   :  { %v1443_v58 = vpop.f32.mrf.mxu0 }
0x1421   :  { %v1141_v61 = vadd.f32 %v1137_v51, %v1087_v54  ;;  %1593 = vtanh.f32 %v1140_v52  ;;  %v1329_v6 = vmul.f32 -1.442695, %v1140_v52 }
0x1422   :  { %v1133_v62 = vpop.f32.mrf.mxu0 }
0x1423   :  { %1595 = vtanh.f32 %v1141_v61  ;;  %v1330_v7 = vmul.f32 -1.442695, %v1141_v61  ;;  %v820_v61 = vld [vmem:[#allocation11 + $0x4] sm:$0x4] }
0x1424   :  { %v1444_v63 = vpop.f32.mrf.mxu0  ;;  %1597 = vpow2.f32 %v1329_v6 }
0x1425   :  { %1599 = vpow2.f32 %v1330_v7  ;;  %v1080_v63 = vld [vmem:[#allocation11] sm:$0x8] }
0x142e   :  { %v1594_v3 = vpop.eup %1593 }
0x142f   :  { %1160 = vrot.lane.b32.xlu1 %v1594_v3, %s1744_s4 }
0x1430   :  { %v1596_v5 = vpop.eup %1595 }
0x1431   :  { %1162 = vrot.lane.b32.xlu0 %v1596_v5, %s1744_s4  ;;  %v1598_v8 = vpop.eup %1597 }
0x1432   :  { %v1600_v9 = vpop.eup %1599  ;;  %v1148_v10 = vadd.f32 1.0, %v1598_v8  ;;  %v1083_v8 = vld [vmem:[#allocation11 + $0x4] sm:$0x8] }
0x1433   :  { %v1149_v11 = vadd.f32 1.0, %v1600_v9 }
0x1434   :  { %1601 = vrcp.f32 %v1148_v10 }
0x1435   :  { %1603 = vrcp.f32 %v1149_v11 }
0x1441   :  { %v1602_v12 = vpop.eup %1601 }
0x1442   :  { %v1604_v15 = vpop.eup %1603  ;;  %v1156_v21 = vmul.f32 %v1602_v12, %v1047_v30  ;;  %v543_v30 = vrot.slane %v1909_v24, 7 }
0x1443   :  { %v1157_v22 = vmul.f32 %v1604_v15, %v1048_v33  ;;  %v807_v33 = vrot.slane %v1960_v60, 6 }
0x14a1   :  { %v1161_v13 = vpop.permute.xlu1 %1160 }
0x14a2   :  { %v1166_v14 = vmul.f32 %v1602_v12, %v1161_v13 }
0x14a3   :  { %v1163_v18 = vpop.permute.xlu0 %1162 }
0x14a4   :  { %1170 = vrot.lane.b32.xlu1 %v1166_v14, %s1744_s4  ;;  %v1167_v20 = vmul.f32 %v1604_v15, %v1163_v18 }
0x14a6   :  { %1172 = vrot.lane.b32.xlu0 %v1167_v20, %s1744_s4 }
0x1516   :  { %v1171_v2 = vpop.permute.xlu1 %1170 }
0x1517   :  { %v1176_v0 = vadd.f32 %v1171_v2, %v1156_v21 }
0x1518   :  { %v1173_v4 = vpop.permute.xlu0 %1172 }
0x1519   :  { %1605 = vtanh.f32 %v1176_v0  ;;  %v1177_v23 = vadd.f32 %v1173_v4, %v1157_v22 }
0x151b   :  { %1607 = vtanh.f32 %v1177_v23  ;;  %v1231_v26 = vrot.slane %v1177_v23, 7 }
0x151d   :  { %v2007_v27 = vsel %vm301_vm4, %v1231_v26, %v1176_v0 }
0x1526   :  { %v1606_v28 = vpop.eup %1605 }
0x1527   :  { %1182 = vrot.lane.b32.xlu1 %v1606_v28, %s1744_s4 }
0x1528   :  { %v1608_v29 = vpop.eup %1607 }
0x1529   :  { %1184 = vrot.lane.b32.xlu0 %v1608_v29, %s1744_s4 }
0x152b   :  { %283 = vrot.lane.b32.xlu1 %v1865_v57, %s1739_s10 }
0x152d   :  { %285 = vrot.lane.b32.xlu0 %v1862_v53, %s1739_s10  ;;  %v1070_v53 = vrot.slane %v1995_v36, 5 }
0x152f   :  { %545 = vrot.lane.b32.xlu1 %v543_v30, %s1739_s10 }
0x1531   :  { %547 = vrot.lane.b32.xlu0 %v544_v31, %s1739_s10 }
0x1533   :  { %808 = vrot.lane.b32.xlu1 %v806_v32, %s1739_s10 }
0x1535   :  { %810 = vrot.lane.b32.xlu0 %v807_v33, %s1739_s10 }
0x1537   :  { %1071 = vrot.lane.b32.xlu1 %v1069_v34, %s1739_s10 }
0x1539   :  { %1073 = vrot.lane.b32.xlu0 %v1070_v53, %s1739_s10 }
0x153b   :  { %1458 = vrot.lane.b32.xlu1 %v1890_v44, %s1739_s10  ;;  %v292_v44 = vld [vmem:[#allocation11] sm:$0x1] }
0x153d   :  { %1463 = vrot.lane.b32.xlu0 %v1462_v19, %s1739_s10 }
0x153f   :  { %1468 = vrot.lane.b32.xlu1 %v1467_v59, %s1739_s10 }
0x1599   :  { %v1183_v57 = vpop.permute.xlu1 %1182 }
0x159a   :  { %v1188_v24 = vmul.f32 %v1602_v12, %v1183_v57 }
0x159b   :  { %v1185_v60 = vpop.permute.xlu0 %1184 }
0x159c   :  { %v1347_v1 = vpack.c.bf16 %v1188_v24, %v1188_v24  ;;  %v1189_v16 = vmul.f32 %v1604_v15, %v1185_v60 }
0x159d   :  { %v284_v17 = vpop.permute.xlu1 %283 }
0x159e   :  { %v293_v19 = vsel %vm2038_vm7, %v284_v17, %v292_v44  ;;  %v1199_v56 = vshll.u32 %v1347_v1, 16  ;;  %v1348_v59 = vpack.c.bf16 %v1189_v16, %v1189_v16  ;;  %v1222_v35 = vrot.slane %v1189_v16, 7 }
0x159f   :  { %294 = vst [vmem:[#allocation11] sm:$0x1] %v293_v19  ;;  %v286_v40 = vpop.permute.xlu0 %285 }
0x15a0   :  { %v1203_v41 = vshll.u32 %v1348_v59, 16  ;;  %v296_v42 = vsel %vm2038_vm7, %v286_v40, %v295_v55  ;;  %v1223_v39 = vsel %vm301_vm4, %v1222_v35, %v1188_v24  ;;  %v1201_v48 = vrot.slane %v1199_v56, 5 }
0x15a1   :  { %v546_v36 = vpop.permute.xlu1 %545  ;;  %297 = vst [vmem:[#allocation11 + $0x4] sm:$0x1] %v296_v42  ;;  %1224 = vrot.lane.b32.xlu1 %v1223_v39, %s1739_s10  ;;  %vm686_vm4 = vsmask.f32 7942 }
0x15a2   :  { %v555_v43 = vsel %vm2045_vm10, %v546_v36, %v554_v38  ;;  %v1205_v49 = vrot.slane %v1203_v41, 5  ;;  %vm687_vm7 = vmand %vm551_vm8, %vm686_vm4 }
0x15a3   :  { %556 = vst [vmem:[#allocation11] sm:$0x2] %v555_v43  ;;  %v548_v50 = vpop.permute.xlu0 %547 }
0x15a4   :  { %v558_v51 = vsel %vm2045_vm10, %v548_v50, %v557_v45  ;;  %v1472_v54 = vpack.i.bf16 %v1205_v49, %v1201_v48 }
0x15a5   :  { %v809_v52 = vpop.permute.xlu1 %808  ;;  %559 = vst [vmem:[#allocation11 + $0x4] sm:$0x2] %v558_v51 }
0x15a6   :  { %v818_v58 = vsel %vm2056_vm13, %v809_v52, %v817_v47  ;;  %1473 = vrot.lane.b32.xlu0 %v1472_v54, %s1739_s10  ;;  %v425_v14 = vld [vmem:[#allocation11] sm:$0x1] }
0x15a7   :  { %819 = vst [vmem:[#allocation11] sm:$0x4] %v818_v58  ;;  %v811_v3 = vpop.permute.xlu0 %810 }
0x15a8   :  { %v821_v5 = vsel %vm2056_vm13, %v811_v3, %v820_v61  ;;  %v428_v15 = vld [vmem:[#allocation11 + $0x4] sm:$0x1] }
0x15a9   :  { %v1072_v6 = vpop.permute.xlu1 %1071  ;;  %822 = vst [vmem:[#allocation11 + $0x4] sm:$0x4] %v821_v5 }
0x15aa   :  { %v1081_v7 = vsel %vm2066_vm0, %v1072_v6, %v1080_v63  ;;  %1233 = vrot.lane.b32.xlu0 %v2007_v27, %s1745_s3  ;;  %v688_v23 = vld [vmem:[#allocation11] sm:$0x2] }
0x15ab   :  { %1082 = vst [vmem:[#allocation11] sm:$0x8] %v1081_v7  ;;  %v1074_v9 = vpop.permute.xlu0 %1073 }
0x15ac   :  { %v1084_v10 = vsel %vm2066_vm0, %v1074_v9, %v1083_v8  ;;  %v691_v26 = vld [vmem:[#allocation11 + $0x4] sm:$0x2] }
0x15ad   :  { %v1459_v11 = vpop.permute.xlu1 %1458  ;;  %1085 = vst [vmem:[#allocation11 + $0x4] sm:$0x8] %v1084_v10 }
0x15ae   :  { %v1461_v12 = vunpack.i.h.bf16 %v1459_v11  ;;  %v1460_v13 = vunpack.i.l.bf16 %v1459_v11  ;;  %v951_v31 = vld [vmem:[#allocation11] sm:$0x4] }
0x15af   :  { %v1464_v21 = vpop.permute.xlu0 %1463 }
0x15b0   :  { %v426_v18 = vsel %vm424_vm3, %v1460_v13, %v425_v14  ;;  %v429_v20 = vsel %vm424_vm3, %v1461_v12, %v428_v15  ;;  %v1466_v0 = vunpack.i.h.bf16 %v1464_v21  ;;  %v1465_v22 = vunpack.i.l.bf16 %v1464_v21  ;;  %v954_v32 = vld [vmem:[#allocation11 + $0x4] sm:$0x4] }
0x15b1   :  { %427 = vst [vmem:[#allocation11] sm:$0x1] %v426_v18  ;;  %430 = vst [vmem:[#allocation11 + $0x4] sm:$0x1] %v429_v20  ;;  %v1469_v4 = vpop.permute.xlu1 %1468 }
0x15b2   :  { %v1471_v27 = vunpack.i.h.bf16 %v1469_v4  ;;  %v1470_v28 = vunpack.i.l.bf16 %v1469_v4  ;;  %v692_v29 = vsel %vm687_vm7, %v1466_v0, %v691_v26  ;;  %v689_v30 = vsel %vm687_vm7, %v1465_v22, %v688_v23 }
0x15b3   :  { %693 = vst [vmem:[#allocation11 + $0x4] sm:$0x2] %v692_v29  ;;  %690 = vst [vmem:[#allocation11] sm:$0x2] %v689_v30 }
0x15b4   :  { %v952_v33 = vsel %vm2080_vm9, %v1470_v28, %v951_v31  ;;  %v955_v34 = vsel %vm2080_vm9, %v1471_v27, %v954_v32 }
0x15b5   :  { %953 = vst [vmem:[#allocation11] sm:$0x4] %v952_v33  ;;  %956 = vst [vmem:[#allocation11 + $0x4] sm:$0x4] %v955_v34 }
0x1613   :  { %v1225_v53 = vpop.permute.xlu1 %1224 }
0x1614   :  { %1228 = vst.msk [vmem:[#allocation3] sm:$0x3] %vm75_vm2, %v1225_v53  ;;  %1240 = vst.msk [vmem:[#allocation12] sm:$0x3] %vm75_vm2, %v1225_v53 }
0x1615   :  { %1680 = shalt.err (!%p1677_p5)
}
0x1616   :  { %1263 = dma.vmem_to_hbm [thread:$0]  %s1261_s25, 32, %s2112_s7, [#allocation13]   ;;  %vm1213_vm8 = vmand %vm1077_vm14, %vm1212_vm5  ;;  %v1214_v44 = vld [vmem:[#allocation11] sm:$0x8]  ;;  %v1217_v1 = vld [vmem:[#allocation11 + $0x4] sm:$0x8] }
0x1617   :  { %s1747_s29 = smov [#allocation11]   ;;  %s1748_s9 = smov [#allocation14]  }
0x1618   :  { %s1247_s30 = sshll.u32 %s1747_s29, 4  ;;  %v1474_v57 = vpop.permute.xlu0 %1473  ;;  %s1270_s12 = sshll.u32 %s1748_s9, 4  ;;  %s1248_s30 = int_to_ptr.vmem [resolvable:$true] %s1247_s30  ;;  %s1271_s12 = int_to_ptr.vmem [resolvable:$true] %s1270_s12 }
0x1619   :  { %v1476_v24 = vunpack.i.h.bf16 %v1474_v57  ;;  %v1475_v25 = vunpack.i.l.bf16 %v1474_v57  ;;  %s1689_s7 = scalar_lea.vmem %s1248_s30, 128  ;;  %p1694_p7 = scmp.lt.s32.totalorder %s1248_s30, %s1248_s30 }
0x161a   :  { %p1690_p6 = scmp.ne.s32.totalorder %s1248_s30, %s1689_s7  ;;  %p1695_p8 = scmp.lt.s32.totalorder %s1689_s7, %s1689_s7 }
0x161b   :  { %v1218_v60 = vsel %vm1213_vm8, %v1476_v24, %v1217_v1  ;;  %v1215_v16 = vsel %vm1213_vm8, %v1475_v25, %v1214_v44 }
0x161c   :  { %1219 = vst [vmem:[#allocation11 + $0x4] sm:$0x8] %v1218_v60  ;;  %1216 = vst [vmem:[#allocation11] sm:$0x8] %v1215_v16  ;;  %v1234_v17 = vpop.permute.xlu0 %1233  ;;  %p1696_p9 = por %p1695_p8, %p1694_p7 }
0x161d   :  { %1236 = vst.msk [vmem:[#allocation4] sm:$0x3] %vm75_vm2, %v1234_v17  ;;  %1241 = vst.msk [vmem:[#allocation14] sm:$0x3] %vm75_vm2, %v1234_v17 }
0x161e   :  { %p1697_p10 = pnand %p1696_p9, %p1690_p6 }
0x1620   :  { %1700 = shalt.err (!%p1697_p10)
}
0x1621   :  { %1253 = dma.vmem_to_hbm [thread:$0]  %s1248_s30, 128, %s2111_s6, [#allocation7], %s1739_s10, %s1739_s10, %s1740_s11  }
0x1622   :  { %s1709_s15 = scalar_lea.vmem %s1271_s12, 32  ;;  %p1714_p12 = scmp.lt.s32.totalorder %s1271_s12, %s1271_s12 }
0x1623   :  { %p1710_p11 = scmp.ne.s32.totalorder %s1271_s12, %s1709_s15  ;;  %p1715_p13 = scmp.lt.s32.totalorder %s1709_s15, %s1709_s15 }
0x1625   :  { %p1716_p0 = por %p1715_p13, %p1714_p12 }
0x1627   :  { %p1717_p1 = pnand %p1716_p0, %p1710_p11 }
0x1629   :  { %1720 = shalt.err (!%p1717_p1)
}
0x162a   :  { %1273 = dma.vmem_to_hbm [thread:$0]  %s1271_s12, 32, %s2113_s8, [#allocation13]  }
0x162b   :  { %1733 = dma.done.wait [#allocation7], 128  }
0x162c   :  { %1734 = vsyncadd [#allocation7], 4294967168 }
0x162d   :  { %1735 = dma.done.wait [#allocation13], 64  }
0x162e   :  { %1736 = vsyncadd [#allocation13], 4294967232 }
0x162f   :  { %1283 = vsyncpa [#allocation6], 1 }
0x1630   :  { %1284 = vsyncpa [#allocation9], 1 }
0x1631   :  { %1285 = vsyncpa [#allocation7], 1 }
0x1632   :  { %1286 = vsyncpa [#allocation13], 1 }

</bundles_post_ra>
